<compile_context>
chip_gen: v7x
topology: tpu7x:2x2x1
jax: 0.10.0
libtpu: 0.0.40
codegen_flags: <defaults>
</compile_context>

<pallas_src>
import jax
import jax.numpy as jnp
from jax.experimental import pallas as pl
from jax.experimental.pallas import tpu as pltpu

# Model constants implied by the PyTorch module (Linear(128*64, 11) => T=128).
IN1 = 2      # lstm1 input size
H1 = 128     # lstm1 hidden size
H2 = 64      # lstm2 hidden size
H2P = 128    # lstm2 hidden size padded to a full 128-lane tile
NC = 11      # num_classes
CP = 128     # FC output padded to a full 128-lane tile
T = 128      # sequence length
UNROLL = 4   # manual unroll factor of the interleaved recurrence (sweep 2..8)


# ---------------------------------------------------------------------------
# Fused kernel: interleaved layer-1 / layer-2 recurrence + FC, one invocation.
# PyTorch gate order: i, f, g, o.
# ---------------------------------------------------------------------------
def _lstm2_fused_kernel(x0_ref, x1_ref, wih1_ref, whh1_ref, w2cat_ref,
                        fcw_ref, fcb_ref, out_ref):
    BP = out_ref.shape[0]                       # padded batch (multiple of 8)
    bf16 = jnp.bfloat16

    # Loop-invariant broadcasts of the two layer-1 input-projection weight rows
    # (hoisted: JAX does not CSE broadcast_in_dim inside the loop).
    w1b0 = jnp.broadcast_to(wih1_ref[0:1, :], (BP, 4 * H1))
    w1b1 = jnp.broadcast_to(wih1_ref[1:2, :], (BP, 4 * H1))

    def l1_step(t, h1, c1):
        # Layer-1 LSTM step t.  The K=2 input projection is two VPU
        # broadcast-FMAs, so only the recurrent K=128 matmul touches the MXU.
        off = pl.multiple_of(t * BP, BP)
        x0_t = x0_ref[pl.ds(off, BP), :]                       # (BP, 1)
        x1_t = x1_ref[pl.ds(off, BP), :]                       # (BP, 1)
        g = (x0_t * w1b0 + x1_t * w1b1
             + jnp.dot(h1.astype(bf16), whh1_ref[...],
                       preferred_element_type=jnp.float32))    # (BP, 512)
        i = jax.nn.sigmoid(g[:, 0 * H1:1 * H1])
        f = jax.nn.sigmoid(g[:, 1 * H1:2 * H1])
        gg = jnp.tanh(g[:, 2 * H1:3 * H1])
        o = jax.nn.sigmoid(g[:, 3 * H1:4 * H1])
        c1 = f * c1 + i * gg
        h1 = o * jnp.tanh(c1)
        return h1, c1

    def l2_step(h1_in, h2, c2, acc, fcw_blk):
        # Layer-2 LSTM step (input h1_in) + its FC contribution.  Input and
        # recurrent matmuls fused into a single K=256 MXU pass.
        l2_in = jnp.concatenate([h1_in, h2], axis=1)           # (BP, 256)
        g = jnp.dot(l2_in.astype(bf16), w2cat_ref[...],
                    preferred_element_type=jnp.float32)        # (BP, 512)
        i = jax.nn.sigmoid(g[:, 0 * H2P:1 * H2P])
        f = jax.nn.sigmoid(g[:, 1 * H2P:2 * H2P])
        gg = jnp.tanh(g[:, 2 * H2P:3 * H2P])
        o = jax.nn.sigmoid(g[:, 3 * H2P:4 * H2P])
        c2 = f * c2 + i * gg
        h2 = o * jnp.tanh(c2)
        # FC contracts only the 64 real hidden lanes against this timestep's
        # (64, 128) weight block; accumulate in f32.
        acc = acc + jnp.dot(h2[:, :H2].astype(bf16), fcw_blk,
                            preferred_element_type=jnp.float32)
        return h2, c2, acc

    def body(tt, carry):
        h1, c1, h2, c2, acc = carry
        # Manual unroll: several interleaved (layer-2[t-1], layer-1[t]) steps
        # per basic block -> cross-chain and cross-timestep ILP.
        for u in range(UNROLL):
            t = tt * UNROLL + u
            # Layer 2 consumes h1[t-1] (the carry).  At t == 0 every layer-2
            # input is exactly zero, so that step is an exact no-op.
            h2, c2, acc = l2_step(h1, h2, c2, acc, fcw_ref[t])
            # Layer 1 produces h1[t] (independent of the layer-2 chain above).
            h1, c1 = l1_step(t, h1, c1)
        return h1, c1, h2, c2, acc

    z1 = jnp.zeros((BP, H1), jnp.float32)
    z2 = jnp.zeros((BP, H2P), jnp.float32)
    acc0 = jnp.zeros((BP, CP), jnp.float32)
    h1, c1, h2, c2, acc = jax.lax.fori_loop(
        0, T // UNROLL, body, (z1, c1 := z1, h2 := z2, c2 := z2, acc0))

    # Epilogue: layer-2 step for timestep T-1 (+ its FC block, index T in the
    # shifted FC weight).
    _, _, acc = l2_step(h1, h2, c2, acc, fcw_ref[T])
    out_ref[...] = acc + fcb_ref[...]


# ---------------------------------------------------------------------------
# One-time weight preparation (transpose + pad + bf16 cast), not per forward.
# ---------------------------------------------------------------------------
def _pad_gate_cols(w_t, h, hp):
    """(In, 4h) -> (In, 4hp): zero-pad each gate block's columns to hp lanes."""
    d_in = w_t.shape[0]
    w4 = w_t.reshape(d_in, 4, h)
    return jnp.pad(w4, ((0, 0), (0, 0), (0, hp - h))).reshape(d_in, 4 * hp)


def prepare_params(params):
    f32, bf16 = jnp.float32, jnp.bfloat16
    # layer-1: input-projection rows stay f32 (used on the VPU), recurrent bf16
    wih1_t = jnp.asarray(params["w_ih1"], f32).T                       # (2, 512)
    whh1_t = jnp.asarray(params["w_hh1"], f32).T.astype(bf16)          # (128, 512)
    # layer-2: gate-column-padded input + (row- and column-padded) recurrent
    # weights concatenated into one K=256 operand.
    wih2_t = _pad_gate_cols(jnp.asarray(params["w_ih2"], f32).T, H2, H2P)   # (128, 512)
    whh2_t = jnp.pad(
        _pad_gate_cols(jnp.asarray(params["w_hh2"], f32).T, H2, H2P),
        ((0, H2P - H2), (0, 0)))                                       # (128, 512)
    w2cat = jnp.concatenate([wih2_t, whh2_t], axis=0).astype(bf16)     # (256, 512)
    # fc: out[b,c] = sum_t h2[b,t,:64] @ fcw[t] ; stored time-shifted by one so
    # the in-loop index is simply t (block 0 is a dummy for the t==0 no-op).
    fcw = jnp.asarray(params["fc_w"], f32).reshape(NC, T, H2)
    fcw = jnp.transpose(fcw, (1, 2, 0))                                # (T, 64, 11)
    fcw = jnp.pad(fcw, ((1, 0), (0, 0), (0, CP - NC))).astype(bf16)    # (T+1, 64, 128)
    fcb = jnp.pad(jnp.asarray(params["fc_b"], f32), (0, CP - NC)).reshape(1, CP)
    return dict(wih1=wih1_t, whh1=whh1_t, w2cat=w2cat, fcw=fcw, fcb=fcb)


# ---------------------------------------------------------------------------
# Full lstm2 forward (single fused pallas_call)
# ---------------------------------------------------------------------------
@jax.jit
def lstm2_forward(x, prep):
    """x: (B, 2, T) NCL input, like the PyTorch module."""
    B = x.shape[0]
    assert x.shape[1] == IN1 and x.shape[2] == T
    BP = max(8, ((B + 7) // 8) * 8)              # pad batch to a sublane multiple

    xf = x.astype(jnp.float32)

    def chan(c):
        # per-channel, time-major column: row t*BP + b  ==  x[b, c, t]
        xc = jnp.transpose(xf[:, c, :], (1, 0))              # (T, B)
        xc = jnp.pad(xc, ((0, 0), (0, BP - B)))              # (T, BP)
        return xc.reshape(T * BP, 1)

    x0, x1 = chan(0), chan(1)

    out_p = pl.pallas_call(
        _lstm2_fused_kernel,
        out_shape=jax.ShapeDtypeStruct((BP, CP), jnp.float32),
        compiler_params=pltpu.CompilerParams(
            vmem_limit_bytes=32 * 1024 * 1024),
    )(x0, x1, prep["wih1"], prep["whh1"], prep["w2cat"], prep["fcw"],
      prep["fcb"])

    return out_p[:B, :NC]


# ---------------------------------------------------------------------------
# Pure-JAX references (lax.scan) for correctness checks
# ---------------------------------------------------------------------------
def _lstm_ref(x_bt, w_ih, w_hh, ih_dt=jnp.float32, hh_dt=jnp.float32):
    B = x_bt.shape[0]
    H = w_hh.shape[1]
    prec = jax.lax.Precision.HIGHEST
    wih_t = w_ih.T.astype(ih_dt)
    whh_t = w_hh.T.astype(hh_dt)

    def step(carry, x_t):
        h, c = carry
        gates = (jnp.dot(x_t.astype(ih_dt), wih_t, precision=prec,
                         preferred_element_type=jnp.float32)
                 + jnp.dot(h.astype(hh_dt), whh_t, precision=prec,
                           preferred_element_type=jnp.float32))
        i = jax.nn.sigmoid(gates[:, 0 * H:1 * H])
        f = jax.nn.sigmoid(gates[:, 1 * H:2 * H])
        g = jnp.tanh(gates[:, 2 * H:3 * H])
        o = jax.nn.sigmoid(gates[:, 3 * H:4 * H])
        c = f * c + i * g
        h = o * jnp.tanh(c)
        return (h, c), h

    init = (jnp.zeros((B, H), jnp.float32), jnp.zeros((B, H), jnp.float32))
    _, hs = jax.lax.scan(step, init, jnp.transpose(x_bt, (1, 0, 2)))
    return jnp.transpose(hs, (1, 0, 2))


def lstm2_ref(x, params, matmul_dtype=jnp.float32):
    """matmul_dtype=bf16 mimics the kernel's mixed precision (f32 state,
    bf16 matmul operands); f32 is the original module's numerics."""
    dt = matmul_dtype
    prec = jax.lax.Precision.HIGHEST
    xb = jnp.transpose(x, (0, 2, 1)).astype(jnp.float32)
    # the kernel keeps the layer-1 input projection in f32 (VPU FMAs)
    h1 = _lstm_ref(xb, params["w_ih1"], params["w_hh1"],
                   ih_dt=jnp.float32, hh_dt=dt)
    h2 = _lstm_ref(h1, params["w_ih2"], params["w_hh2"], ih_dt=dt, hh_dt=dt)
    flat = h2.reshape(h2.shape[0], -1)
    return (jnp.dot(flat.astype(dt), params["fc_w"].T.astype(dt),
                    precision=prec, preferred_element_type=jnp.float32)
            + params["fc_b"])


def init_params(key):
    ks = jax.random.split(key, 6)
    s1 = 1.0 / jnp.sqrt(H1)
    s2 = 1.0 / jnp.sqrt(H2)
    sf = 1.0 / jnp.sqrt(T * H2)
    return {
        "w_ih1": jax.random.uniform(ks[0], (4 * H1, IN1), jnp.float32, -s1, s1),
        "w_hh1": jax.random.uniform(ks[1], (4 * H1, H1), jnp.float32, -s1, s1),
        "w_ih2": jax.random.uniform(ks[2], (4 * H2, H1), jnp.float32, -s2, s2),
        "w_hh2": jax.random.uniform(ks[3], (4 * H2, H2), jnp.float32, -s2, s2),
        "fc_w": jax.random.uniform(ks[4], (NC, T * H2), jnp.float32, -sf, sf),
        "fc_b": jax.random.uniform(ks[5], (NC,), jnp.float32, -sf, sf),
    }


if __name__ == "__main__":
    key = jax.random.PRNGKey(0)
    kx, kp = jax.random.split(key)
    B = 2                                 # T=128 is fixed by Linear(128*64, 11)
    x = jax.random.normal(kx, (B, IN1, T), jnp.float32)
    params = init_params(kp)
    prep = prepare_params(params)

    out = jax.block_until_ready(lstm2_forward(x, prep))
    assert out.shape == (B, NC), out.shape

    # Tight check vs a reference using the SAME mixed precision as the kernel
    # (bf16 matmul operands, f32 state / accumulation).
    ref_mixed = jax.block_until_ready(lstm2_ref(x, params, jnp.bfloat16))
    err_mixed = float(jnp.max(jnp.abs(out - ref_mixed)))
    assert err_mixed < 1e-3, f"mismatch vs matched-precision ref: {err_mixed}"

    # Loose check vs the original full-f32 module numerics (only difference is
    # the bf16 MXU operands inside the kernel).
    ref_f32 = jax.block_until_ready(lstm2_ref(x, params, jnp.float32))
    err_f32 = float(jnp.max(jnp.abs(out - ref_f32)))
    assert err_f32 < 2e-2, f"mismatch vs f32 ref: {err_f32}"

    print("KERNEL_OK")
</pallas_src>

<mosaic_0001>
module attributes {stable_mosaic.version = 11 : i64} {
  func.func @_lstm2_fused_kernel(%arg0: memref<1024x1xf32, #tpu.memory_space<vmem>>, %arg1: memref<1024x1xf32, #tpu.memory_space<vmem>>, %arg2: memref<2x512xf32, #tpu.memory_space<vmem>>, %arg3: memref<128x512xbf16, #tpu.memory_space<vmem>>, %arg4: memref<256x512xbf16, #tpu.memory_space<vmem>>, %arg5: memref<129x64x128xbf16, #tpu.memory_space<vmem>>, %arg6: memref<1x128xf32, #tpu.memory_space<vmem>>, %arg7: memref<8x128xf32, #tpu.memory_space<vmem>>) attributes {dimension_semantics = [], scalar_prefetch = 0 : i64, scratch_operands = 0 : i64, tpu.core_type = #tpu.core_type<tc>} {
    %c0 = arith.constant 0 : index
    %c0_0 = arith.constant 0 : index
    %0 = vector.load %arg2[%c0, %c0_0] : memref<2x512xf32, #tpu.memory_space<vmem>>, vector<1x512xf32>
    %1 = vector.shape_cast %0 : vector<1x512xf32> to vector<1x512xf32>
    %2 = vector.broadcast %1 : vector<1x512xf32> to vector<8x512xf32>
    %c1 = arith.constant 1 : index
    %c0_1 = arith.constant 0 : index
    %3 = vector.load %arg2[%c1, %c0_1] : memref<2x512xf32, #tpu.memory_space<vmem>>, vector<1x512xf32>
    %4 = vector.shape_cast %3 : vector<1x512xf32> to vector<1x512xf32>
    %5 = vector.broadcast %4 : vector<1x512xf32> to vector<8x512xf32>
    %cst = arith.constant 0.000000e+00 : f32
    %6 = vector.broadcast %cst : f32 to vector<8x128xf32>
    %cst_2 = arith.constant 0.000000e+00 : f32
    %7 = vector.broadcast %cst_2 : f32 to vector<8x128xf32>
    %cst_3 = arith.constant 0.000000e+00 : f32
    %8 = vector.broadcast %cst_3 : f32 to vector<8x128xf32>
    %c0_i32 = arith.constant 0 : i32
    %c32_i32 = arith.constant 32 : i32
    %9 = arith.addi %c0_i32, %c32_i32 : i32
    %c1_i32 = arith.constant 1 : i32
    %10:5 = scf.for %arg8 = %c0_i32 to %9 step %c1_i32 iter_args(%arg9 = %6, %arg10 = %6, %arg11 = %7, %arg12 = %7, %arg13 = %8) -> (vector<8x128xf32>, vector<8x128xf32>, vector<8x128xf32>, vector<8x128xf32>, vector<8x128xf32>)  : i32 {
      %c4_i32 = arith.constant 4 : i32
      %50 = arith.muli %arg8, %c4_i32 : i32
      %c0_i32_18 = arith.constant 0 : i32
      %51 = arith.addi %50, %c0_i32_18 : i32
      %52 = arith.index_cast %51 : i32 to index
      %c0_19 = arith.constant 0 : index
      %c0_20 = arith.constant 0 : index
      %53 = vector.load %arg5[%52, %c0_19, %c0_20] : memref<129x64x128xbf16, #tpu.memory_space<vmem>>, vector<1x64x128xbf16>
      %54 = vector.shape_cast %53 : vector<1x64x128xbf16> to vector<64x128xbf16>
      %55 = tpu.concatenate %arg9, %arg11 in 1 : vector<8x128xf32>, vector<8x128xf32> -> vector<8x256xf32>
      %56 = arith.truncf %55 : vector<8x256xf32> to vector<8x256xbf16>
      %c0_21 = arith.constant 0 : index
      %c0_22 = arith.constant 0 : index
      %57 = vector.load %arg4[%c0_21, %c0_22] : memref<256x512xbf16, #tpu.memory_space<vmem>>, vector<256x512xbf16>
      %cst_23 = arith.constant dense<0.000000e+00> : vector<8x512xf32>
      %58 = tpu.matmul %56, %57, %cst_23 {dimension_numbers = #tpu.dot_dimension_numbers<[1], [0], [0], [1], [0, 0, 1, 1], [], []>} : vector<8x256xbf16>, vector<256x512xbf16>, vector<8x512xf32> -> vector<8x512xf32>
      %59 = vector.extract_strided_slice %58 {offsets = [0, 0], sizes = [8, 128], strides = [1, 1]} : vector<8x512xf32> to vector<8x128xf32>
      %60 = arith.negf %59 : vector<8x128xf32>
      %61 = math.exp %60 : vector<8x128xf32>
      %cst_24 = arith.constant 1.000000e+00 : f32
      %62 = vector.broadcast %cst_24 : f32 to vector<8x128xf32>
      %63 = arith.addf %62, %61 : vector<8x128xf32>
      %64 = arith.divf %62, %63 : vector<8x128xf32>
      %65 = vector.extract_strided_slice %58 {offsets = [0, 128], sizes = [8, 128], strides = [1, 1]} : vector<8x512xf32> to vector<8x128xf32>
      %66 = arith.negf %65 : vector<8x128xf32>
      %67 = math.exp %66 : vector<8x128xf32>
      %cst_25 = arith.constant 1.000000e+00 : f32
      %68 = vector.broadcast %cst_25 : f32 to vector<8x128xf32>
      %69 = arith.addf %68, %67 : vector<8x128xf32>
      %70 = arith.divf %68, %69 : vector<8x128xf32>
      %71 = vector.extract_strided_slice %58 {offsets = [0, 256], sizes = [8, 128], strides = [1, 1]} : vector<8x512xf32> to vector<8x128xf32>
      %72 = math.tanh %71 : vector<8x128xf32>
      %73 = vector.extract_strided_slice %58 {offsets = [0, 384], sizes = [8, 128], strides = [1, 1]} : vector<8x512xf32> to vector<8x128xf32>
      %74 = arith.negf %73 : vector<8x128xf32>
      %75 = math.exp %74 : vector<8x128xf32>
      %cst_26 = arith.constant 1.000000e+00 : f32
      %76 = vector.broadcast %cst_26 : f32 to vector<8x128xf32>
      %77 = arith.addf %76, %75 : vector<8x128xf32>
      %78 = arith.divf %76, %77 : vector<8x128xf32>
      %79 = arith.mulf %70, %arg12 : vector<8x128xf32>
      %80 = arith.mulf %64, %72 : vector<8x128xf32>
      %81 = arith.addf %79, %80 : vector<8x128xf32>
      %82 = math.tanh %81 : vector<8x128xf32>
      %83 = arith.mulf %78, %82 : vector<8x128xf32>
      %84 = vector.extract_strided_slice %83 {offsets = [0, 0], sizes = [8, 64], strides = [1, 1]} : vector<8x128xf32> to vector<8x64xf32>
      %85 = arith.truncf %84 : vector<8x64xf32> to vector<8x64xbf16>
      %cst_27 = arith.constant dense<0.000000e+00> : vector<8x128xf32>
      %86 = tpu.matmul %85, %54, %cst_27 {dimension_numbers = #tpu.dot_dimension_numbers<[1], [0], [0], [1], [0, 0, 1, 1], [], []>} : vector<8x64xbf16>, vector<64x128xbf16>, vector<8x128xf32> -> vector<8x128xf32>
      %87 = arith.addf %arg13, %86 : vector<8x128xf32>
      %c8_i32 = arith.constant 8 : i32
      %88 = arith.muli %51, %c8_i32 : i32
      %89 = tpu.assume_multiple %88, 8 : i32
      %90 = arith.index_cast %89 : i32 to index
      %c0_28 = arith.constant 0 : index
      %91 = vector.load %arg0[%90, %c0_28] : memref<1024x1xf32, #tpu.memory_space<vmem>>, vector<8x1xf32>
      %92 = arith.index_cast %89 : i32 to index
      %c0_29 = arith.constant 0 : index
      %93 = vector.load %arg1[%92, %c0_29] : memref<1024x1xf32, #tpu.memory_space<vmem>>, vector<8x1xf32>
      %94 = vector.broadcast %91 : vector<8x1xf32> to vector<8x512xf32>
      %95 = arith.mulf %94, %2 : vector<8x512xf32>
      %96 = vector.broadcast %93 : vector<8x1xf32> to vector<8x512xf32>
      %97 = arith.mulf %96, %5 : vector<8x512xf32>
      %98 = arith.addf %95, %97 : vector<8x512xf32>
      %99 = arith.truncf %arg9 : vector<8x128xf32> to vector<8x128xbf16>
      %c0_30 = arith.constant 0 : index
      %c0_31 = arith.constant 0 : index
      %100 = vector.load %arg3[%c0_30, %c0_31] : memref<128x512xbf16, #tpu.memory_space<vmem>>, vector<128x512xbf16>
      %cst_32 = arith.constant dense<0.000000e+00> : vector<8x512xf32>
      %101 = tpu.matmul %99, %100, %cst_32 {dimension_numbers = #tpu.dot_dimension_numbers<[1], [0], [0], [1], [0, 0, 1, 1], [], []>} : vector<8x128xbf16>, vector<128x512xbf16>, vector<8x512xf32> -> vector<8x512xf32>
      %102 = arith.addf %98, %101 : vector<8x512xf32>
      %103 = vector.extract_strided_slice %102 {offsets = [0, 0], sizes = [8, 128], strides = [1, 1]} : vector<8x512xf32> to vector<8x128xf32>
      %104 = arith.negf %103 : vector<8x128xf32>
      %105 = math.exp %104 : vector<8x128xf32>
      %cst_33 = arith.constant 1.000000e+00 : f32
      %106 = vector.broadcast %cst_33 : f32 to vector<8x128xf32>
      %107 = arith.addf %106, %105 : vector<8x128xf32>
      %108 = arith.divf %106, %107 : vector<8x128xf32>
      %109 = vector.extract_strided_slice %102 {offsets = [0, 128], sizes = [8, 128], strides = [1, 1]} : vector<8x512xf32> to vector<8x128xf32>
      %110 = arith.negf %109 : vector<8x128xf32>
      %111 = math.exp %110 : vector<8x128xf32>
      %cst_34 = arith.constant 1.000000e+00 : f32
      %112 = vector.broadcast %cst_34 : f32 to vector<8x128xf32>
      %113 = arith.addf %112, %111 : vector<8x128xf32>
      %114 = arith.divf %112, %113 : vector<8x128xf32>
      %115 = vector.extract_strided_slice %102 {offsets = [0, 256], sizes = [8, 128], strides = [1, 1]} : vector<8x512xf32> to vector<8x128xf32>
      %116 = math.tanh %115 : vector<8x128xf32>
      %117 = vector.extract_strided_slice %102 {offsets = [0, 384], sizes = [8, 128], strides = [1, 1]} : vector<8x512xf32> to vector<8x128xf32>
      %118 = arith.negf %117 : vector<8x128xf32>
      %119 = math.exp %118 : vector<8x128xf32>
      %cst_35 = arith.constant 1.000000e+00 : f32
      %120 = vector.broadcast %cst_35 : f32 to vector<8x128xf32>
      %121 = arith.addf %120, %119 : vector<8x128xf32>
      %122 = arith.divf %120, %121 : vector<8x128xf32>
      %123 = arith.mulf %114, %arg10 : vector<8x128xf32>
      %124 = arith.mulf %108, %116 : vector<8x128xf32>
      %125 = arith.addf %123, %124 : vector<8x128xf32>
      %126 = math.tanh %125 : vector<8x128xf32>
      %127 = arith.mulf %122, %126 : vector<8x128xf32>
      %c4_i32_36 = arith.constant 4 : i32
      %128 = arith.muli %arg8, %c4_i32_36 : i32
      %c1_i32_37 = arith.constant 1 : i32
      %129 = arith.addi %128, %c1_i32_37 : i32
      %130 = arith.index_cast %129 : i32 to index
      %c0_38 = arith.constant 0 : index
      %c0_39 = arith.constant 0 : index
      %131 = vector.load %arg5[%130, %c0_38, %c0_39] : memref<129x64x128xbf16, #tpu.memory_space<vmem>>, vector<1x64x128xbf16>
      %132 = vector.shape_cast %131 : vector<1x64x128xbf16> to vector<64x128xbf16>
      %133 = tpu.concatenate %127, %83 in 1 : vector<8x128xf32>, vector<8x128xf32> -> vector<8x256xf32>
      %134 = arith.truncf %133 : vector<8x256xf32> to vector<8x256xbf16>
      %c0_40 = arith.constant 0 : index
      %c0_41 = arith.constant 0 : index
      %135 = vector.load %arg4[%c0_40, %c0_41] : memref<256x512xbf16, #tpu.memory_space<vmem>>, vector<256x512xbf16>
      %cst_42 = arith.constant dense<0.000000e+00> : vector<8x512xf32>
      %136 = tpu.matmul %134, %135, %cst_42 {dimension_numbers = #tpu.dot_dimension_numbers<[1], [0], [0], [1], [0, 0, 1, 1], [], []>} : vector<8x256xbf16>, vector<256x512xbf16>, vector<8x512xf32> -> vector<8x512xf32>
      %137 = vector.extract_strided_slice %136 {offsets = [0, 0], sizes = [8, 128], strides = [1, 1]} : vector<8x512xf32> to vector<8x128xf32>
      %138 = arith.negf %137 : vector<8x128xf32>
      %139 = math.exp %138 : vector<8x128xf32>
      %cst_43 = arith.constant 1.000000e+00 : f32
      %140 = vector.broadcast %cst_43 : f32 to vector<8x128xf32>
      %141 = arith.addf %140, %139 : vector<8x128xf32>
      %142 = arith.divf %140, %141 : vector<8x128xf32>
      %143 = vector.extract_strided_slice %136 {offsets = [0, 128], sizes = [8, 128], strides = [1, 1]} : vector<8x512xf32> to vector<8x128xf32>
      %144 = arith.negf %143 : vector<8x128xf32>
      %145 = math.exp %144 : vector<8x128xf32>
      %cst_44 = arith.constant 1.000000e+00 : f32
      %146 = vector.broadcast %cst_44 : f32 to vector<8x128xf32>
      %147 = arith.addf %146, %145 : vector<8x128xf32>
      %148 = arith.divf %146, %147 : vector<8x128xf32>
      %149 = vector.extract_strided_slice %136 {offsets = [0, 256], sizes = [8, 128], strides = [1, 1]} : vector<8x512xf32> to vector<8x128xf32>
      %150 = math.tanh %149 : vector<8x128xf32>
      %151 = vector.extract_strided_slice %136 {offsets = [0, 384], sizes = [8, 128], strides = [1, 1]} : vector<8x512xf32> to vector<8x128xf32>
      %152 = arith.negf %151 : vector<8x128xf32>
      %153 = math.exp %152 : vector<8x128xf32>
      %cst_45 = arith.constant 1.000000e+00 : f32
      %154 = vector.broadcast %cst_45 : f32 to vector<8x128xf32>
      %155 = arith.addf %154, %153 : vector<8x128xf32>
      %156 = arith.divf %154, %155 : vector<8x128xf32>
      %157 = arith.mulf %148, %81 : vector<8x128xf32>
      %158 = arith.mulf %142, %150 : vector<8x128xf32>
      %159 = arith.addf %157, %158 : vector<8x128xf32>
      %160 = math.tanh %159 : vector<8x128xf32>
      %161 = arith.mulf %156, %160 : vector<8x128xf32>
      %162 = vector.extract_strided_slice %161 {offsets = [0, 0], sizes = [8, 64], strides = [1, 1]} : vector<8x128xf32> to vector<8x64xf32>
      %163 = arith.truncf %162 : vector<8x64xf32> to vector<8x64xbf16>
      %cst_46 = arith.constant dense<0.000000e+00> : vector<8x128xf32>
      %164 = tpu.matmul %163, %132, %cst_46 {dimension_numbers = #tpu.dot_dimension_numbers<[1], [0], [0], [1], [0, 0, 1, 1], [], []>} : vector<8x64xbf16>, vector<64x128xbf16>, vector<8x128xf32> -> vector<8x128xf32>
      %165 = arith.addf %87, %164 : vector<8x128xf32>
      %c8_i32_47 = arith.constant 8 : i32
      %166 = arith.muli %129, %c8_i32_47 : i32
      %167 = tpu.assume_multiple %166, 8 : i32
      %168 = arith.index_cast %167 : i32 to index
      %c0_48 = arith.constant 0 : index
      %169 = vector.load %arg0[%168, %c0_48] : memref<1024x1xf32, #tpu.memory_space<vmem>>, vector<8x1xf32>
      %170 = arith.index_cast %167 : i32 to index
      %c0_49 = arith.constant 0 : index
      %171 = vector.load %arg1[%170, %c0_49] : memref<1024x1xf32, #tpu.memory_space<vmem>>, vector<8x1xf32>
      %172 = vector.broadcast %169 : vector<8x1xf32> to vector<8x512xf32>
      %173 = arith.mulf %172, %2 : vector<8x512xf32>
      %174 = vector.broadcast %171 : vector<8x1xf32> to vector<8x512xf32>
      %175 = arith.mulf %174, %5 : vector<8x512xf32>
      %176 = arith.addf %173, %175 : vector<8x512xf32>
      %177 = arith.truncf %127 : vector<8x128xf32> to vector<8x128xbf16>
      %c0_50 = arith.constant 0 : index
      %c0_51 = arith.constant 0 : index
      %178 = vector.load %arg3[%c0_50, %c0_51] : memref<128x512xbf16, #tpu.memory_space<vmem>>, vector<128x512xbf16>
      %cst_52 = arith.constant dense<0.000000e+00> : vector<8x512xf32>
      %179 = tpu.matmul %177, %178, %cst_52 {dimension_numbers = #tpu.dot_dimension_numbers<[1], [0], [0], [1], [0, 0, 1, 1], [], []>} : vector<8x128xbf16>, vector<128x512xbf16>, vector<8x512xf32> -> vector<8x512xf32>
      %180 = arith.addf %176, %179 : vector<8x512xf32>
      %181 = vector.extract_strided_slice %180 {offsets = [0, 0], sizes = [8, 128], strides = [1, 1]} : vector<8x512xf32> to vector<8x128xf32>
      %182 = arith.negf %181 : vector<8x128xf32>
      %183 = math.exp %182 : vector<8x128xf32>
      %cst_53 = arith.constant 1.000000e+00 : f32
      %184 = vector.broadcast %cst_53 : f32 to vector<8x128xf32>
      %185 = arith.addf %184, %183 : vector<8x128xf32>
      %186 = arith.divf %184, %185 : vector<8x128xf32>
      %187 = vector.extract_strided_slice %180 {offsets = [0, 128], sizes = [8, 128], strides = [1, 1]} : vector<8x512xf32> to vector<8x128xf32>
      %188 = arith.negf %187 : vector<8x128xf32>
      %189 = math.exp %188 : vector<8x128xf32>
      %cst_54 = arith.constant 1.000000e+00 : f32
      %190 = vector.broadcast %cst_54 : f32 to vector<8x128xf32>
      %191 = arith.addf %190, %189 : vector<8x128xf32>
      %192 = arith.divf %190, %191 : vector<8x128xf32>
      %193 = vector.extract_strided_slice %180 {offsets = [0, 256], sizes = [8, 128], strides = [1, 1]} : vector<8x512xf32> to vector<8x128xf32>
      %194 = math.tanh %193 : vector<8x128xf32>
      %195 = vector.extract_strided_slice %180 {offsets = [0, 384], sizes = [8, 128], strides = [1, 1]} : vector<8x512xf32> to vector<8x128xf32>
      %196 = arith.negf %195 : vector<8x128xf32>
      %197 = math.exp %196 : vector<8x128xf32>
      %cst_55 = arith.constant 1.000000e+00 : f32
      %198 = vector.broadcast %cst_55 : f32 to vector<8x128xf32>
      %199 = arith.addf %198, %197 : vector<8x128xf32>
      %200 = arith.divf %198, %199 : vector<8x128xf32>
      %201 = arith.mulf %192, %125 : vector<8x128xf32>
      %202 = arith.mulf %186, %194 : vector<8x128xf32>
      %203 = arith.addf %201, %202 : vector<8x128xf32>
      %204 = math.tanh %203 : vector<8x128xf32>
      %205 = arith.mulf %200, %204 : vector<8x128xf32>
      %c4_i32_56 = arith.constant 4 : i32
      %206 = arith.muli %arg8, %c4_i32_56 : i32
      %c2_i32 = arith.constant 2 : i32
      %207 = arith.addi %206, %c2_i32 : i32
      %208 = arith.index_cast %207 : i32 to index
      %c0_57 = arith.constant 0 : index
      %c0_58 = arith.constant 0 : index
      %209 = vector.load %arg5[%208, %c0_57, %c0_58] : memref<129x64x128xbf16, #tpu.memory_space<vmem>>, vector<1x64x128xbf16>
      %210 = vector.shape_cast %209 : vector<1x64x128xbf16> to vector<64x128xbf16>
      %211 = tpu.concatenate %205, %161 in 1 : vector<8x128xf32>, vector<8x128xf32> -> vector<8x256xf32>
      %212 = arith.truncf %211 : vector<8x256xf32> to vector<8x256xbf16>
      %c0_59 = arith.constant 0 : index
      %c0_60 = arith.constant 0 : index
      %213 = vector.load %arg4[%c0_59, %c0_60] : memref<256x512xbf16, #tpu.memory_space<vmem>>, vector<256x512xbf16>
      %cst_61 = arith.constant dense<0.000000e+00> : vector<8x512xf32>
      %214 = tpu.matmul %212, %213, %cst_61 {dimension_numbers = #tpu.dot_dimension_numbers<[1], [0], [0], [1], [0, 0, 1, 1], [], []>} : vector<8x256xbf16>, vector<256x512xbf16>, vector<8x512xf32> -> vector<8x512xf32>
      %215 = vector.extract_strided_slice %214 {offsets = [0, 0], sizes = [8, 128], strides = [1, 1]} : vector<8x512xf32> to vector<8x128xf32>
      %216 = arith.negf %215 : vector<8x128xf32>
      %217 = math.exp %216 : vector<8x128xf32>
      %cst_62 = arith.constant 1.000000e+00 : f32
      %218 = vector.broadcast %cst_62 : f32 to vector<8x128xf32>
      %219 = arith.addf %218, %217 : vector<8x128xf32>
      %220 = arith.divf %218, %219 : vector<8x128xf32>
      %221 = vector.extract_strided_slice %214 {offsets = [0, 128], sizes = [8, 128], strides = [1, 1]} : vector<8x512xf32> to vector<8x128xf32>
      %222 = arith.negf %221 : vector<8x128xf32>
      %223 = math.exp %222 : vector<8x128xf32>
      %cst_63 = arith.constant 1.000000e+00 : f32
      %224 = vector.broadcast %cst_63 : f32 to vector<8x128xf32>
      %225 = arith.addf %224, %223 : vector<8x128xf32>
      %226 = arith.divf %224, %225 : vector<8x128xf32>
      %227 = vector.extract_strided_slice %214 {offsets = [0, 256], sizes = [8, 128], strides = [1, 1]} : vector<8x512xf32> to vector<8x128xf32>
      %228 = math.tanh %227 : vector<8x128xf32>
      %229 = vector.extract_strided_slice %214 {offsets = [0, 384], sizes = [8, 128], strides = [1, 1]} : vector<8x512xf32> to vector<8x128xf32>
      %230 = arith.negf %229 : vector<8x128xf32>
      %231 = math.exp %230 : vector<8x128xf32>
      %cst_64 = arith.constant 1.000000e+00 : f32
      %232 = vector.broadcast %cst_64 : f32 to vector<8x128xf32>
      %233 = arith.addf %232, %231 : vector<8x128xf32>
      %234 = arith.divf %232, %233 : vector<8x128xf32>
      %235 = arith.mulf %226, %159 : vector<8x128xf32>
      %236 = arith.mulf %220, %228 : vector<8x128xf32>
      %237 = arith.addf %235, %236 : vector<8x128xf32>
      %238 = math.tanh %237 : vector<8x128xf32>
      %239 = arith.mulf %234, %238 : vector<8x128xf32>
      %240 = vector.extract_strided_slice %239 {offsets = [0, 0], sizes = [8, 64], strides = [1, 1]} : vector<8x128xf32> to vector<8x64xf32>
      %241 = arith.truncf %240 : vector<8x64xf32> to vector<8x64xbf16>
      %cst_65 = arith.constant dense<0.000000e+00> : vector<8x128xf32>
      %242 = tpu.matmul %241, %210, %cst_65 {dimension_numbers = #tpu.dot_dimension_numbers<[1], [0], [0], [1], [0, 0, 1, 1], [], []>} : vector<8x64xbf16>, vector<64x128xbf16>, vector<8x128xf32> -> vector<8x128xf32>
      %243 = arith.addf %165, %242 : vector<8x128xf32>
      %c8_i32_66 = arith.constant 8 : i32
      %244 = arith.muli %207, %c8_i32_66 : i32
      %245 = tpu.assume_multiple %244, 8 : i32
      %246 = arith.index_cast %245 : i32 to index
      %c0_67 = arith.constant 0 : index
      %247 = vector.load %arg0[%246, %c0_67] : memref<1024x1xf32, #tpu.memory_space<vmem>>, vector<8x1xf32>
      %248 = arith.index_cast %245 : i32 to index
      %c0_68 = arith.constant 0 : index
      %249 = vector.load %arg1[%248, %c0_68] : memref<1024x1xf32, #tpu.memory_space<vmem>>, vector<8x1xf32>
      %250 = vector.broadcast %247 : vector<8x1xf32> to vector<8x512xf32>
      %251 = arith.mulf %250, %2 : vector<8x512xf32>
      %252 = vector.broadcast %249 : vector<8x1xf32> to vector<8x512xf32>
      %253 = arith.mulf %252, %5 : vector<8x512xf32>
      %254 = arith.addf %251, %253 : vector<8x512xf32>
      %255 = arith.truncf %205 : vector<8x128xf32> to vector<8x128xbf16>
      %c0_69 = arith.constant 0 : index
      %c0_70 = arith.constant 0 : index
      %256 = vector.load %arg3[%c0_69, %c0_70] : memref<128x512xbf16, #tpu.memory_space<vmem>>, vector<128x512xbf16>
      %cst_71 = arith.constant dense<0.000000e+00> : vector<8x512xf32>
      %257 = tpu.matmul %255, %256, %cst_71 {dimension_numbers = #tpu.dot_dimension_numbers<[1], [0], [0], [1], [0, 0, 1, 1], [], []>} : vector<8x128xbf16>, vector<128x512xbf16>, vector<8x512xf32> -> vector<8x512xf32>
      %258 = arith.addf %254, %257 : vector<8x512xf32>
      %259 = vector.extract_strided_slice %258 {offsets = [0, 0], sizes = [8, 128], strides = [1, 1]} : vector<8x512xf32> to vector<8x128xf32>
      %260 = arith.negf %259 : vector<8x128xf32>
      %261 = math.exp %260 : vector<8x128xf32>
      %cst_72 = arith.constant 1.000000e+00 : f32
      %262 = vector.broadcast %cst_72 : f32 to vector<8x128xf32>
      %263 = arith.addf %262, %261 : vector<8x128xf32>
      %264 = arith.divf %262, %263 : vector<8x128xf32>
      %265 = vector.extract_strided_slice %258 {offsets = [0, 128], sizes = [8, 128], strides = [1, 1]} : vector<8x512xf32> to vector<8x128xf32>
      %266 = arith.negf %265 : vector<8x128xf32>
      %267 = math.exp %266 : vector<8x128xf32>
      %cst_73 = arith.constant 1.000000e+00 : f32
      %268 = vector.broadcast %cst_73 : f32 to vector<8x128xf32>
      %269 = arith.addf %268, %267 : vector<8x128xf32>
      %270 = arith.divf %268, %269 : vector<8x128xf32>
      %271 = vector.extract_strided_slice %258 {offsets = [0, 256], sizes = [8, 128], strides = [1, 1]} : vector<8x512xf32> to vector<8x128xf32>
      %272 = math.tanh %271 : vector<8x128xf32>
      %273 = vector.extract_strided_slice %258 {offsets = [0, 384], sizes = [8, 128], strides = [1, 1]} : vector<8x512xf32> to vector<8x128xf32>
      %274 = arith.negf %273 : vector<8x128xf32>
      %275 = math.exp %274 : vector<8x128xf32>
      %cst_74 = arith.constant 1.000000e+00 : f32
      %276 = vector.broadcast %cst_74 : f32 to vector<8x128xf32>
      %277 = arith.addf %276, %275 : vector<8x128xf32>
      %278 = arith.divf %276, %277 : vector<8x128xf32>
      %279 = arith.mulf %270, %203 : vector<8x128xf32>
      %280 = arith.mulf %264, %272 : vector<8x128xf32>
      %281 = arith.addf %279, %280 : vector<8x128xf32>
      %282 = math.tanh %281 : vector<8x128xf32>
      %283 = arith.mulf %278, %282 : vector<8x128xf32>
      %c4_i32_75 = arith.constant 4 : i32
      %284 = arith.muli %arg8, %c4_i32_75 : i32
      %c3_i32 = arith.constant 3 : i32
      %285 = arith.addi %284, %c3_i32 : i32
      %286 = arith.index_cast %285 : i32 to index
      %c0_76 = arith.constant 0 : index
      %c0_77 = arith.constant 0 : index
      %287 = vector.load %arg5[%286, %c0_76, %c0_77] : memref<129x64x128xbf16, #tpu.memory_space<vmem>>, vector<1x64x128xbf16>
      %288 = vector.shape_cast %287 : vector<1x64x128xbf16> to vector<64x128xbf16>
      %289 = tpu.concatenate %283, %239 in 1 : vector<8x128xf32>, vector<8x128xf32> -> vector<8x256xf32>
      %290 = arith.truncf %289 : vector<8x256xf32> to vector<8x256xbf16>
      %c0_78 = arith.constant 0 : index
      %c0_79 = arith.constant 0 : index
      %291 = vector.load %arg4[%c0_78, %c0_79] : memref<256x512xbf16, #tpu.memory_space<vmem>>, vector<256x512xbf16>
      %cst_80 = arith.constant dense<0.000000e+00> : vector<8x512xf32>
      %292 = tpu.matmul %290, %291, %cst_80 {dimension_numbers = #tpu.dot_dimension_numbers<[1], [0], [0], [1], [0, 0, 1, 1], [], []>} : vector<8x256xbf16>, vector<256x512xbf16>, vector<8x512xf32> -> vector<8x512xf32>
      %293 = vector.extract_strided_slice %292 {offsets = [0, 0], sizes = [8, 128], strides = [1, 1]} : vector<8x512xf32> to vector<8x128xf32>
      %294 = arith.negf %293 : vector<8x128xf32>
      %295 = math.exp %294 : vector<8x128xf32>
      %cst_81 = arith.constant 1.000000e+00 : f32
      %296 = vector.broadcast %cst_81 : f32 to vector<8x128xf32>
      %297 = arith.addf %296, %295 : vector<8x128xf32>
      %298 = arith.divf %296, %297 : vector<8x128xf32>
      %299 = vector.extract_strided_slice %292 {offsets = [0, 128], sizes = [8, 128], strides = [1, 1]} : vector<8x512xf32> to vector<8x128xf32>
      %300 = arith.negf %299 : vector<8x128xf32>
      %301 = math.exp %300 : vector<8x128xf32>
      %cst_82 = arith.constant 1.000000e+00 : f32
      %302 = vector.broadcast %cst_82 : f32 to vector<8x128xf32>
      %303 = arith.addf %302, %301 : vector<8x128xf32>
      %304 = arith.divf %302, %303 : vector<8x128xf32>
      %305 = vector.extract_strided_slice %292 {offsets = [0, 256], sizes = [8, 128], strides = [1, 1]} : vector<8x512xf32> to vector<8x128xf32>
      %306 = math.tanh %305 : vector<8x128xf32>
      %307 = vector.extract_strided_slice %292 {offsets = [0, 384], sizes = [8, 128], strides = [1, 1]} : vector<8x512xf32> to vector<8x128xf32>
      %308 = arith.negf %307 : vector<8x128xf32>
      %309 = math.exp %308 : vector<8x128xf32>
      %cst_83 = arith.constant 1.000000e+00 : f32
      %310 = vector.broadcast %cst_83 : f32 to vector<8x128xf32>
      %311 = arith.addf %310, %309 : vector<8x128xf32>
      %312 = arith.divf %310, %311 : vector<8x128xf32>
      %313 = arith.mulf %304, %237 : vector<8x128xf32>
      %314 = arith.mulf %298, %306 : vector<8x128xf32>
      %315 = arith.addf %313, %314 : vector<8x128xf32>
      %316 = math.tanh %315 : vector<8x128xf32>
      %317 = arith.mulf %312, %316 : vector<8x128xf32>
      %318 = vector.extract_strided_slice %317 {offsets = [0, 0], sizes = [8, 64], strides = [1, 1]} : vector<8x128xf32> to vector<8x64xf32>
      %319 = arith.truncf %318 : vector<8x64xf32> to vector<8x64xbf16>
      %cst_84 = arith.constant dense<0.000000e+00> : vector<8x128xf32>
      %320 = tpu.matmul %319, %288, %cst_84 {dimension_numbers = #tpu.dot_dimension_numbers<[1], [0], [0], [1], [0, 0, 1, 1], [], []>} : vector<8x64xbf16>, vector<64x128xbf16>, vector<8x128xf32> -> vector<8x128xf32>
      %321 = arith.addf %243, %320 : vector<8x128xf32>
      %c8_i32_85 = arith.constant 8 : i32
      %322 = arith.muli %285, %c8_i32_85 : i32
      %323 = tpu.assume_multiple %322, 8 : i32
      %324 = arith.index_cast %323 : i32 to index
      %c0_86 = arith.constant 0 : index
      %325 = vector.load %arg0[%324, %c0_86] : memref<1024x1xf32, #tpu.memory_space<vmem>>, vector<8x1xf32>
      %326 = arith.index_cast %323 : i32 to index
      %c0_87 = arith.constant 0 : index
      %327 = vector.load %arg1[%326, %c0_87] : memref<1024x1xf32, #tpu.memory_space<vmem>>, vector<8x1xf32>
      %328 = vector.broadcast %325 : vector<8x1xf32> to vector<8x512xf32>
      %329 = arith.mulf %328, %2 : vector<8x512xf32>
      %330 = vector.broadcast %327 : vector<8x1xf32> to vector<8x512xf32>
      %331 = arith.mulf %330, %5 : vector<8x512xf32>
      %332 = arith.addf %329, %331 : vector<8x512xf32>
      %333 = arith.truncf %283 : vector<8x128xf32> to vector<8x128xbf16>
      %c0_88 = arith.constant 0 : index
      %c0_89 = arith.constant 0 : index
      %334 = vector.load %arg3[%c0_88, %c0_89] : memref<128x512xbf16, #tpu.memory_space<vmem>>, vector<128x512xbf16>
      %cst_90 = arith.constant dense<0.000000e+00> : vector<8x512xf32>
      %335 = tpu.matmul %333, %334, %cst_90 {dimension_numbers = #tpu.dot_dimension_numbers<[1], [0], [0], [1], [0, 0, 1, 1], [], []>} : vector<8x128xbf16>, vector<128x512xbf16>, vector<8x512xf32> -> vector<8x512xf32>
      %336 = arith.addf %332, %335 : vector<8x512xf32>
      %337 = vector.extract_strided_slice %336 {offsets = [0, 0], sizes = [8, 128], strides = [1, 1]} : vector<8x512xf32> to vector<8x128xf32>
      %338 = arith.negf %337 : vector<8x128xf32>
      %339 = math.exp %338 : vector<8x128xf32>
      %cst_91 = arith.constant 1.000000e+00 : f32
      %340 = vector.broadcast %cst_91 : f32 to vector<8x128xf32>
      %341 = arith.addf %340, %339 : vector<8x128xf32>
      %342 = arith.divf %340, %341 : vector<8x128xf32>
      %343 = vector.extract_strided_slice %336 {offsets = [0, 128], sizes = [8, 128], strides = [1, 1]} : vector<8x512xf32> to vector<8x128xf32>
      %344 = arith.negf %343 : vector<8x128xf32>
      %345 = math.exp %344 : vector<8x128xf32>
      %cst_92 = arith.constant 1.000000e+00 : f32
      %346 = vector.broadcast %cst_92 : f32 to vector<8x128xf32>
      %347 = arith.addf %346, %345 : vector<8x128xf32>
      %348 = arith.divf %346, %347 : vector<8x128xf32>
      %349 = vector.extract_strided_slice %336 {offsets = [0, 256], sizes = [8, 128], strides = [1, 1]} : vector<8x512xf32> to vector<8x128xf32>
      %350 = math.tanh %349 : vector<8x128xf32>
      %351 = vector.extract_strided_slice %336 {offsets = [0, 384], sizes = [8, 128], strides = [1, 1]} : vector<8x512xf32> to vector<8x128xf32>
      %352 = arith.negf %351 : vector<8x128xf32>
      %353 = math.exp %352 : vector<8x128xf32>
      %cst_93 = arith.constant 1.000000e+00 : f32
      %354 = vector.broadcast %cst_93 : f32 to vector<8x128xf32>
      %355 = arith.addf %354, %353 : vector<8x128xf32>
      %356 = arith.divf %354, %355 : vector<8x128xf32>
      %357 = arith.mulf %348, %281 : vector<8x128xf32>
      %358 = arith.mulf %342, %350 : vector<8x128xf32>
      %359 = arith.addf %357, %358 : vector<8x128xf32>
      %360 = math.tanh %359 : vector<8x128xf32>
      %361 = arith.mulf %356, %360 : vector<8x128xf32>
      scf.yield %361, %359, %317, %315, %321 : vector<8x128xf32>, vector<8x128xf32>, vector<8x128xf32>, vector<8x128xf32>, vector<8x128xf32>
    }
    %c32_i32_4 = arith.constant 32 : i32
    %c128 = arith.constant 128 : index
    %c0_5 = arith.constant 0 : index
    %c0_6 = arith.constant 0 : index
    %11 = vector.load %arg5[%c128, %c0_5, %c0_6] : memref<129x64x128xbf16, #tpu.memory_space<vmem>>, vector<1x64x128xbf16>
    %12 = vector.shape_cast %11 : vector<1x64x128xbf16> to vector<64x128xbf16>
    %13 = tpu.concatenate %10#0, %10#2 in 1 : vector<8x128xf32>, vector<8x128xf32> -> vector<8x256xf32>
    %14 = arith.truncf %13 : vector<8x256xf32> to vector<8x256xbf16>
    %c0_7 = arith.constant 0 : index
    %c0_8 = arith.constant 0 : index
    %15 = vector.load %arg4[%c0_7, %c0_8] : memref<256x512xbf16, #tpu.memory_space<vmem>>, vector<256x512xbf16>
    %cst_9 = arith.constant dense<0.000000e+00> : vector<8x512xf32>
    %16 = tpu.matmul %14, %15, %cst_9 {dimension_numbers = #tpu.dot_dimension_numbers<[1], [0], [0], [1], [0, 0, 1, 1], [], []>} : vector<8x256xbf16>, vector<256x512xbf16>, vector<8x512xf32> -> vector<8x512xf32>
    %17 = vector.extract_strided_slice %16 {offsets = [0, 0], sizes = [8, 128], strides = [1, 1]} : vector<8x512xf32> to vector<8x128xf32>
    %18 = arith.negf %17 : vector<8x128xf32>
    %19 = math.exp %18 : vector<8x128xf32>
    %cst_10 = arith.constant 1.000000e+00 : f32
    %20 = vector.broadcast %cst_10 : f32 to vector<8x128xf32>
    %21 = arith.addf %20, %19 : vector<8x128xf32>
    %22 = arith.divf %20, %21 : vector<8x128xf32>
    %23 = vector.extract_strided_slice %16 {offsets = [0, 128], sizes = [8, 128], strides = [1, 1]} : vector<8x512xf32> to vector<8x128xf32>
    %24 = arith.negf %23 : vector<8x128xf32>
    %25 = math.exp %24 : vector<8x128xf32>
    %cst_11 = arith.constant 1.000000e+00 : f32
    %26 = vector.broadcast %cst_11 : f32 to vector<8x128xf32>
    %27 = arith.addf %26, %25 : vector<8x128xf32>
    %28 = arith.divf %26, %27 : vector<8x128xf32>
    %29 = vector.extract_strided_slice %16 {offsets = [0, 256], sizes = [8, 128], strides = [1, 1]} : vector<8x512xf32> to vector<8x128xf32>
    %30 = math.tanh %29 : vector<8x128xf32>
    %31 = vector.extract_strided_slice %16 {offsets = [0, 384], sizes = [8, 128], strides = [1, 1]} : vector<8x512xf32> to vector<8x128xf32>
    %32 = arith.negf %31 : vector<8x128xf32>
    %33 = math.exp %32 : vector<8x128xf32>
    %cst_12 = arith.constant 1.000000e+00 : f32
    %34 = vector.broadcast %cst_12 : f32 to vector<8x128xf32>
    %35 = arith.addf %34, %33 : vector<8x128xf32>
    %36 = arith.divf %34, %35 : vector<8x128xf32>
    %37 = arith.mulf %28, %10#3 : vector<8x128xf32>
    %38 = arith.mulf %22, %30 : vector<8x128xf32>
    %39 = arith.addf %37, %38 : vector<8x128xf32>
    %40 = math.tanh %39 : vector<8x128xf32>
    %41 = arith.mulf %36, %40 : vector<8x128xf32>
    %42 = vector.extract_strided_slice %41 {offsets = [0, 0], sizes = [8, 64], strides = [1, 1]} : vector<8x128xf32> to vector<8x64xf32>
    %43 = arith.truncf %42 : vector<8x64xf32> to vector<8x64xbf16>
    %cst_13 = arith.constant dense<0.000000e+00> : vector<8x128xf32>
    %44 = tpu.matmul %43, %12, %cst_13 {dimension_numbers = #tpu.dot_dimension_numbers<[1], [0], [0], [1], [0, 0, 1, 1], [], []>} : vector<8x64xbf16>, vector<64x128xbf16>, vector<8x128xf32> -> vector<8x128xf32>
    %45 = arith.addf %10#4, %44 : vector<8x128xf32>
    %c0_14 = arith.constant 0 : index
    %c0_15 = arith.constant 0 : index
    %46 = vector.load %arg6[%c0_14, %c0_15] : memref<1x128xf32, #tpu.memory_space<vmem>>, vector<1x128xf32>
    %47 = vector.broadcast %46 : vector<1x128xf32> to vector<8x128xf32>
    %48 = arith.addf %45, %47 : vector<8x128xf32>
    %c0_16 = arith.constant 0 : index
    %c0_17 = arith.constant 0 : index
    %49 = vector.load %arg7[%c0_16, %c0_17] : memref<8x128xf32, #tpu.memory_space<vmem>>, vector<8x128xf32>
    tpu.vector_store %arg7[%c0_16, %c0_17], %48 {strides = array<i32>} : memref<8x128xf32, #tpu.memory_space<vmem>>, vector<8x128xf32>,
    return
  }
}

</mosaic_0001>

<bundles_post_ra>
// kernel: lstm2_forward.1
= control target key start
LH: loop header
LB: loop body
LE: loop exit
PB: predicated region body
PF: predicated region fallthrough
CT: control target
= control target key end

     0   :  { %12 = vsyncpa [#allocation3], 0  ;;  %s4716_s0 = inlined_call_operand.vmem [shape: f32[1024,1], index: 0, kind: input, shape index: {}]   ;;  %s4717_s1 = inlined_call_operand.vmem [shape: f32[1024,1], index: 1, kind: input, shape index: {}]   ;;  %s4718_s2 = inlined_call_operand.hbm [shape: f32[2,512], index: 2, kind: input, shape index: {}]   ;;  %s4719_s3 = inlined_call_operand.hbm [shape: bf16[128,512], index: 3, kind: input, shape index: {}]   ;;  %s4720_s4 = inlined_call_operand.hbm [shape: bf16[256,512], index: 4, kind: input, shape index: {}]   ;;  %s4721_s5 = inlined_call_operand.hbm [shape: bf16[129,64,128], index: 5, kind: input, shape index: {}]   ;;  %s4722_s6 = inlined_call_operand.hbm [shape: f32[1,128], index: 6, kind: input, shape index: {}]   ;;  %s4723_s7 = inlined_call_operand.vmem [shape: f32[8,128], index: 7, kind: output, shape index: {}]  }
   0x1   :  { %13 = vsyncpa [#allocation5], 0 }
   0x2   :  { %14 = vsyncpa [#allocation8], 0  ;;  %s3773_s24 = smov [#allocation4]   ;;  %s3609_s28 = scalar_lea.hbm %s4719_s3, 4096 }
   0x3   :  { %s34_s25 = sshll.u32 %s3773_s24, 4  ;;  %p3610_p0 = scmp.ne.s32.totalorder %s4719_s3, %s3609_s28  ;;  %s35_s25 = int_to_ptr.vmem [resolvable:$true] %s34_s25 }
   0x4   :  { %p3613_p1 = scmp.lt.u32.totalorder %s3609_s28, %s4719_s3 }
   0x6   :  { %p3615_p2 = pnand %p3613_p1, %p3610_p0 }
   0x8   :  { %3618 = shalt.err (!%p3615_p2)
}
   0x9   :  { %s3619_s10 = scalar_lea.vmem %s35_s25, 4096  ;;  %p3624_p4 = scmp.lt.s32.totalorder %s35_s25, %s35_s25 }
   0xa   :  { %p3620_p3 = scmp.ne.s32.totalorder %s35_s25, %s3619_s10  ;;  %p3625_p5 = scmp.lt.s32.totalorder %s3619_s10, %s3619_s10 }
   0xc   :  { %p3626_p6 = por %p3625_p5, %p3624_p4 }
   0xe   :  { %p3627_p7 = pnand %p3626_p6, %p3620_p3 }
  0x10   :  { %3630 = shalt.err (!%p3627_p7)
}
  0x11   :  { %s3774_s11 = smov 256   ;;  %s3775_s12 = smov 16  }
  0x12   :  { %40 = dma.hbm_to_vmem [thread:$0]  %s4719_s3, 4096, %s35_s25, [#allocation5], %s3774_s11, %s3774_s11, %s3775_s12  }
  0x13   :  { %s3776_s15 = smov [#allocation7]   ;;  %s3631_s19 = scalar_lea.hbm %s4721_s5, 66048 }
  0x14   :  { %s58_s16 = sshll.u32 %s3776_s15, 4  ;;  %p3632_p8 = scmp.ne.s32.totalorder %s4721_s5, %s3631_s19  ;;  %s59_s16 = int_to_ptr.vmem [resolvable:$true] %s58_s16 }
  0x15   :  { %p3635_p9 = scmp.lt.u32.totalorder %s3631_s19, %s4721_s5 }
  0x17   :  { %p3637_p10 = pnand %p3635_p9, %p3632_p8 }
  0x19   :  { %3640 = shalt.err (!%p3637_p10)
}
  0x1a   :  { %s3641_s24 = scalar_lea.vmem %s59_s16, 66048  ;;  %p3646_p12 = scmp.lt.s32.totalorder %s59_s16, %s59_s16 }
  0x1b   :  { %p3642_p11 = scmp.ne.s32.totalorder %s59_s16, %s3641_s24  ;;  %p3647_p13 = scmp.lt.s32.totalorder %s3641_s24, %s3641_s24 }
  0x1d   :  { %p3648_p0 = por %p3647_p13, %p3646_p12 }
  0x1f   :  { %p3649_p1 = pnand %p3648_p0, %p3642_p11 }
  0x21   :  { %3652 = shalt.err (!%p3649_p1)
}
  0x22   :  { %s3777_s3 = smov 64   ;;  %s3778_s25 = smov 4  }
  0x23   :  { %64 = dma.hbm_to_vmem [thread:$0]  %s4721_s5, 66048, %s59_s16, [#allocation8], %s3777_s3, %s3777_s3, %s3778_s25  }
  0x24   :  { %s3779_s28 = smov [#allocation2]   ;;  %s3780_s30 = smov [#allocation6]  }
  0x25   :  { %s25_s29 = sshll.u32 %s3779_s28, 4  ;;  %s46_s8 = sshll.u32 %s3780_s30, 4  ;;  %s26_s29 = int_to_ptr.vmem [resolvable:$true] %s25_s29  ;;  %s3854_s8 = int_to_ptr.vmem [resolvable:$true] %s46_s8 }
  0x26   :  { %s3653_s13 = scalar_lea.hbm %s4718_s2, 128 }
  0x27   :  { %p3654_p2 = scmp.ne.s32.totalorder %s4718_s2, %s3653_s13  ;;  %p3657_p3 = scmp.lt.u32.totalorder %s3653_s13, %s4718_s2 }
  0x29   :  { %p3659_p4 = pnand %p3657_p3, %p3654_p2 }
  0x2b   :  { %3662 = shalt.err (!%p3659_p4)
}
  0x2c   :  { %s3663_s5 = scalar_lea.vmem %s26_s29, 128  ;;  %p3668_p6 = scmp.lt.s32.totalorder %s26_s29, %s26_s29 }
  0x2d   :  { %p3664_p5 = scmp.ne.s32.totalorder %s26_s29, %s3663_s5  ;;  %p3669_p7 = scmp.lt.s32.totalorder %s3663_s5, %s3663_s5 }
  0x2f   :  { %p3670_p8 = por %p3669_p7, %p3668_p6 }
  0x31   :  { %p3671_p9 = pnand %p3670_p8, %p3664_p5 }
  0x33   :  { %3674 = shalt.err (!%p3671_p9)
}
  0x34   :  { %28 = dma.hbm_to_vmem [thread:$0]  %s4718_s2, 128, %s26_s29, [#allocation3]  }
  0x35   :  { %s3675_s22 = scalar_lea.hbm %s4720_s4, 8192 }
  0x36   :  { %p3676_p10 = scmp.ne.s32.totalorder %s4720_s4, %s3675_s22  ;;  %p3679_p11 = scmp.lt.u32.totalorder %s3675_s22, %s4720_s4 }
  0x38   :  { %p3681_p12 = pnand %p3679_p11, %p3676_p10 }
  0x3a   :  { %3684 = shalt.err (!%p3681_p12)
}
  0x3b   :  { %s3685_s26 = scalar_lea.vmem %s3854_s8, 8192  ;;  %p3690_p0 = scmp.lt.s32.totalorder %s3854_s8, %s3854_s8 }
  0x3c   :  { %p3686_p13 = scmp.ne.s32.totalorder %s3854_s8, %s3685_s26  ;;  %p3691_p1 = scmp.lt.s32.totalorder %s3685_s26, %s3685_s26 }
  0x3e   :  { %p3692_p2 = por %p3691_p1, %p3690_p0 }
  0x40   :  { %p3693_p3 = pnand %p3692_p2, %p3686_p13 }
  0x42   :  { %3696 = shalt.err (!%p3693_p3)
}
  0x43   :  { %52 = dma.hbm_to_vmem [thread:$0]  %s4720_s4, 8192, %s3854_s8, [#allocation5], %s3774_s11, %s3774_s11, %s3775_s12  }
  0x44   :  { %s3781_s28 = smov [#allocation9]   ;;  %s3697_s10 = scalar_lea.hbm %s4722_s6, 16 }
  0x45   :  { %s71_s29 = sshll.u32 %s3781_s28, 4  ;;  %p3698_p4 = scmp.ne.s32.totalorder %s4722_s6, %s3697_s10  ;;  %s72_s29 = int_to_ptr.vmem [resolvable:$true] %s71_s29 }
  0x46   :  { %p3701_p5 = scmp.lt.u32.totalorder %s3697_s10, %s4722_s6 }
  0x48   :  { %p3703_p6 = pnand %p3701_p5, %p3698_p4 }
  0x4a   :  { %3706 = shalt.err (!%p3703_p6)
}
  0x4b   :  { %s3707_s18 = scalar_lea.vmem %s72_s29, 16  ;;  %s3711_s4 = scalar_lea.vmem %s72_s29, 32 }
  0x4c   :  { %p3708_p7 = scmp.ne.s32.totalorder %s72_s29, %s3707_s18  ;;  %p3712_p8 = scmp.lt.s32.totalorder %s72_s29, %s72_s29 }
  0x4d   :  { %p3713_p9 = scmp.lt.s32.totalorder %s3711_s4, %s3707_s18 }
  0x4f   :  { %p3714_p10 = por %p3713_p9, %p3712_p8 }
  0x51   :  { %p3715_p11 = pnand %p3714_p10, %p3708_p7 }
  0x53   :  { %3718 = shalt.err (!%p3715_p11)
}
  0x54   :  { %74 = dma.hbm_to_vmem [thread:$0]  %s4722_s6, 16, %s72_s29, [#allocation8]  }
  0x55   :  { %3743 = dma.done.wait [#allocation3], 128  }
  0x56   :  { %3744 = vsyncadd [#allocation3], 4294967168 }
  0x57   :  { %3745 = dma.done.wait [#allocation5], 12288  }
  0x58   :  { %3746 = vsyncadd [#allocation5], 4294955008 }
  0x59   :  { %3747 = dma.done.wait [#allocation8], 66064  }
  0x5a   :  { %3748 = vsyncadd [#allocation8], 4294901232  ;;  %v93_v0 = vlaneseq  ;;  %v91_v6 = vld [vmem:[#allocation2] ss:$2 sm:$0xf]  ;;  %v3916_v16 = vmov 0.0  }
  0x5b   :  { %v114_v7 = vld [vmem:[#allocation2 + $0x1] ss:$2 sm:$0xf]  ;;  %v3918_v17 = vmov 0.0   ;;  %v3920_v18 = vmov 0.0   ;;  %v3922_v19 = vmov 0.0  }
  0x5c   :  { %v94_v1 = vshrl.u32 %v93_v0, 7  ;;  %v3924_v20 = vmov 0.0   ;;  %s3926_s6 = smov 0  }
  0x5e   :  { %v95_v2 = vsub.s32 0, %v94_v1  ;;  %v99_v3 = vsub.s32 1, %v94_v1  ;;  %v103_v4 = vsub.s32 2, %v94_v1  ;;  %v107_v5 = vsub.s32 3, %v94_v1 }
  0x60   :  { %v3900_v8 = vrot.slane %v91_v6, %v95_v2  ;;  %v3902_v9 = vrot.slane %v91_v6, %v99_v3  ;;  %v3904_v10 = vrot.slane %v91_v6, %v103_v4  ;;  %v3906_v11 = vrot.slane %v91_v6, %v107_v5 }
  0x61   :  { %v3908_v12 = vrot.slane %v114_v7, %v95_v2  ;;  %v3910_v13 = vrot.slane %v114_v7, %v99_v3  ;;  %v3912_v14 = vrot.slane %v114_v7, %v103_v4  ;;  %v3914_v15 = vrot.slane %v114_v7, %v107_v5 }
  0x62   :  { %4825 = vst [vmem:[#allocation13_spill] sm:$0xff] %v3900_v8  ;;  %4826 = vst [vmem:[#allocation14_spill] sm:$0xff] %v3902_v9 }
  0x63   :  { %4827 = vst [vmem:[#allocation15_spill] sm:$0xff] %v3904_v10  ;;  %4828 = vst [vmem:[#allocation16_spill] sm:$0xff] %v3906_v11 }
  0x64   :  { %4829 = vst [vmem:[#allocation17_spill] sm:$0xff] %v3908_v12  ;;  %4830 = vst [vmem:[#allocation18_spill] sm:$0xff] %v3910_v13 }
  0x65   :  { %4831 = vst [vmem:[#allocation19_spill] sm:$0xff] %v3912_v14  ;;  %4832 = vst [vmem:[#allocation20_spill] sm:$0xff] %v3914_v15 }
  0x66 LB: > { %4833 = vst [vmem:[#allocation21_spill] sm:$0xff] %v3751_v16  ;;  %4834 = vst [vmem:[#allocation22_spill] sm:$0xff] %v3763_v19  ;;  %v3944_v21 = vld [vmem:[#allocation6 + $0x4] ss:$16 sps:$4 sm:$0xff]   ;;  %v3946_v22 = vld [vmem:[#allocation6] ss:$16 sps:$4 sm:$0xff]   ;;  %v160_v24 = vpack.c.bf16 %v3759_v18, %v3759_v18  ;;  %s3771_s6 = sphi %s3926_s6, %s141_s6   ;;  %v3767_v20 = vphi %v3924_v20, %v4992_v20   ;;  %v3763_v19 = vphi %v3922_v19, %v2019_v19   ;;  %v3759_v18 = vphi %v3920_v18, %v4663_v18   ;;  %v3755_v17 = vphi %v3918_v17, %v4991_v17   ;;  %v3751_v16 = vphi %v3916_v16, %v4990_v16  }
  0x67   : > { %545 = vmatprep.subr.bf16.mxu0 %v3944_v21  ;;  %v3949_v23 = vld [vmem:[#allocation6 + $0x24] ss:$16 sps:$4 sm:$0xff]   ;;  %v3952_v25 = vld [vmem:[#allocation6 + $0x20] ss:$16 sps:$4 sm:$0xff]   ;;  %v3957_v27 = vld [vmem:[#allocation6 + $0xc] ss:$16 sps:$4 sm:$0xff]  }
  0x68   : > { %546 = vmatpush1.bf16.msra.mxu0 %v3946_v22  ;;  %v3955_v26 = vld [vmem:[#allocation6 + $0x44] ss:$16 sps:$4 sm:$0xff]   ;;  %577 = vmatprep.mubr.bf16.mxu0 %v160_v24  ;;  %v3959_v28 = vld [vmem:[#allocation6 + $0x8] ss:$16 sps:$4 sm:$0xff]   ;;  %v3962_v29 = vld [vmem:[#allocation6 + $0x40] ss:$16 sps:$4 sm:$0xff]  }
  0x69   : > { %547 = vmatprep.subr.bf16.mxu0 %v3949_v23  ;;  %618 = vmatprep.mubr.bf16.mxu1 %v160_v24  ;;  %v3966_v30 = vld [vmem:[#allocation6 + $0x64] ss:$16 sps:$4 sm:$0xff]   ;;  %v3969_v31 = vld [vmem:[#allocation6 + $0x2c] ss:$16 sps:$4 sm:$0xff]   ;;  %v3971_v32 = vld [vmem:[#allocation6 + $0x28] ss:$16 sps:$4 sm:$0xff]  }
  0x6a   : > { %586 = vmatprep.subr.bf16.mxu1 %v3957_v27  ;;  %v3975_v33 = vld [vmem:[#allocation6 + $0x60] ss:$16 sps:$4 sm:$0xff]   ;;  %v3977_v34 = vld [vmem:[#allocation6 + $0x84] ss:$16 sps:$4 sm:$0xff]   ;;  %v3979_v35 = vld [vmem:[#allocation6 + $0x4c] ss:$16 sps:$4 sm:$0xff]  }
  0x6b   : > { %587 = vmatpush1.bf16.msra.mxu1 %v3959_v28  ;;  %v3983_v36 = vld [vmem:[#allocation6 + $0x48] ss:$16 sps:$4 sm:$0xff]   ;;  %v3986_v37 = vld [vmem:[#allocation6 + $0x6c] ss:$16 sps:$4 sm:$0xff]   ;;  %v3989_v38 = vld [vmem:[#allocation6 + $0x80] ss:$16 sps:$4 sm:$0xff]  }
  0x6c   : > { %548 = vmatpush1.bf16.msra.mxu0 %v3952_v25  ;;  %588 = vmatprep.subr.bf16.mxu1 %v3969_v31  ;;  %v3992_v39 = vld [vmem:[#allocation6 + $0xa4] ss:$16 sps:$4 sm:$0xff]   ;;  %v3995_v40 = vld [vmem:[#allocation6 + $0x68] ss:$16 sps:$4 sm:$0xff]   ;;  %v3998_v41 = vld [vmem:[#allocation6 + $0x8c] ss:$16 sps:$4 sm:$0xff]  }
  0x6d   : > { %549 = vmatprep.subr.bf16.mxu0 %v3955_v26  ;;  %v4001_v42 = vld [vmem:[#allocation6 + $0xa0] ss:$16 sps:$4 sm:$0xff]   ;;  %v4003_v43 = vld [vmem:[#allocation6 + $0xc4] ss:$16 sps:$4 sm:$0xff]   ;;  %v4007_v44 = vld [vmem:[#allocation6 + $0x88] ss:$16 sps:$4 sm:$0xff]  }
  0x6e   : > { %v4010_v45 = vld [vmem:[#allocation6 + $0xac] ss:$16 sps:$4 sm:$0xff]   ;;  %v4013_v46 = vld [vmem:[#allocation6 + $0xc0] ss:$16 sps:$4 sm:$0xff]   ;;  %v4016_v47 = vld [vmem:[#allocation6 + $0xe4] ss:$16 sps:$4 sm:$0xff]  }
  0x6f   : > { %589 = vmatpush1.bf16.msra.mxu1 %v3971_v32  ;;  %v4019_v48 = vld [vmem:[#allocation6 + $0xa8] ss:$16 sps:$4 sm:$0xff]   ;;  %v4022_v49 = vld [vmem:[#allocation6 + $0xcc] ss:$16 sps:$4 sm:$0xff]   ;;  %v4025_v50 = vld [vmem:[#allocation6 + $0xe0] ss:$16 sps:$4 sm:$0xff]  }
  0x70   : > { %550 = vmatpush1.bf16.msra.mxu0 %v3962_v29  ;;  %590 = vmatprep.subr.bf16.mxu1 %v3979_v35  ;;  %v4027_v51 = vld [vmem:[#allocation6 + $0x104] ss:$16 sps:$4 sm:$0xff]   ;;  %v4031_v52 = vld [vmem:[#allocation6 + $0xc8] ss:$16 sps:$4 sm:$0xff]   ;;  %v4034_v53 = vld [vmem:[#allocation6 + $0xec] ss:$16 sps:$4 sm:$0xff]  }
  0x71   : > { %551 = vmatprep.subr.bf16.mxu0 %v3966_v30  ;;  %v4037_v54 = vld [vmem:[#allocation6 + $0x100] ss:$16 sps:$4 sm:$0xff]   ;;  %v4040_v55 = vld [vmem:[#allocation6 + $0x124] ss:$16 sps:$4 sm:$0xff]   ;;  %v4043_v56 = vld [vmem:[#allocation6 + $0xe8] ss:$16 sps:$4 sm:$0xff]  }
  0x72   : > { %v4046_v57 = vld [vmem:[#allocation6 + $0x10c] ss:$16 sps:$4 sm:$0xff]   ;;  %v4049_v58 = vld [vmem:[#allocation6 + $0x120] ss:$16 sps:$4 sm:$0xff]   ;;  %v4051_v59 = vld [vmem:[#allocation6 + $0x144] ss:$16 sps:$4 sm:$0xff]  }
  0x73   : > { %591 = vmatpush1.bf16.msra.mxu1 %v3983_v36  ;;  %v4055_v60 = vld [vmem:[#allocation6 + $0x108] ss:$16 sps:$4 sm:$0xff]   ;;  %v4058_v61 = vld [vmem:[#allocation6 + $0x12c] ss:$16 sps:$4 sm:$0xff]   ;;  %v4061_v62 = vld [vmem:[#allocation6 + $0x140] ss:$16 sps:$4 sm:$0xff]  }
  0x74   : > { %552 = vmatpush1.bf16.msra.mxu0 %v3975_v33  ;;  %592 = vmatprep.subr.bf16.mxu1 %v3986_v37  ;;  %4835 = vst [vmem:[#allocation23_spill] sm:$0xff] %v4058_v61  ;;  %v4063_v63 = vld [vmem:[#allocation6 + $0x164] ss:$16 sps:$4 sm:$0xff]   ;;  %v4067_v0 = vld [vmem:[#allocation6 + $0x128] ss:$16 sps:$4 sm:$0xff]   ;;  %s2937_s8 = sshll.u32 %s3771_s6, 7 }
  0x75   : > { %553 = vmatprep.subr.bf16.mxu0 %v3977_v34  ;;  %4836 = vst [vmem:[#allocation24_spill] sm:$0xff] %v4067_v0  ;;  %v4069_v1 = vld [vmem:[#allocation6 + $0x160] ss:$16 sps:$4 sm:$0xff]   ;;  %v4072_v2 = vld [vmem:[#allocation6 + $0x14c] ss:$16 sps:$4 sm:$0xff]   ;;  %s4169_s5 = scalar_lea.vmem [#allocation7], %s2937_s8 }
  0x76   : > { %4837 = vst [vmem:[#allocation25_spill] sm:$0xff] %v4072_v2  ;;  %v4074_v3 = vld [vmem:[#allocation6 + $0x184] ss:$16 sps:$4 sm:$0xff]   ;;  %v4076_v4 = vld [vmem:[#allocation6 + $0x148] ss:$16 sps:$4 sm:$0xff]   ;;  %vm3784_vm0 = vmmov 0  }
  0x77   : > { %593 = vmatpush1.bf16.msra.mxu1 %v3995_v40  ;;  %4838 = vst [vmem:[#allocation26_spill] sm:$0xff] %v4076_v4  ;;  %v4079_v5 = vld [vmem:[#allocation6 + $0x16c] ss:$16 sps:$4 sm:$0xff]   ;;  %v4083_v6 = vld [vmem:[#allocation6 + $0x180] ss:$16 sps:$4 sm:$0xff]   ;;  %s2746_s16 = sshll.u32 %s3771_s6, 5 }
  0x78   : > { %554 = vmatpush1.bf16.msra.mxu0 %v3989_v38  ;;  %594 = vmatprep.subr.bf16.mxu1 %v3998_v41  ;;  %4839 = vst [vmem:[#allocation27_spill] sm:$0xff] %v4079_v5  ;;  %v4086_v7 = vld [vmem:[#allocation6 + $0x1a4] ss:$16 sps:$4 sm:$0xff]   ;;  %v4088_v18 = vld [vmem:[#allocation6 + $0x168] ss:$16 sps:$4 sm:$0xff]   ;;  %s722_s21 = scalar_lea.vmem %s4716_s0, %s2746_s16  ;;  %s724_s24 = scalar_lea.vmem %s4717_s1, %s2746_s16  ;;  %vm676_vm1 = vcmask 523264  }
  0x79   : > { %555 = vmatprep.subr.bf16.mxu0 %v3992_v39  ;;  %4840 = vst [vmem:[#allocation28_spill] sm:$0xff] %v4088_v18  ;;  %v4091_v24 = vld [vmem:[#allocation6 + $0x18c] ss:$16 sps:$4 sm:$0xff]   ;;  %v4095_v16 = vld [vmem:[#allocation6 + $0x1a0] ss:$16 sps:$4 sm:$0xff]   ;;  %s141_s6 = sadd.s32 1, %s3771_s6  }
  0x7a   : > { %4841 = vst [vmem:[#allocation29_spill] sm:$0xff] %v4091_v24  ;;  %v4098_v19 = vld [vmem:[#allocation6 + $0x1c4] ss:$16 sps:$4 sm:$0xff]   ;;  %v4100_v15 = vld [vmem:[#allocation6 + $0x188] ss:$16 sps:$4 sm:$0xff]   ;;  %p138_p12 = scmp.ge.s32.totalorder %s141_s6, 32  }
  0x7b   : > { %595 = vmatpush1.bf16.msra.mxu1 %v4007_v44  ;;  %4842 = vst [vmem:[#allocation30_spill] sm:$0xff] %v4100_v15  ;;  %v4106_v11 = vld [vmem:[#allocation6 + $0x1ac] ss:$16 sps:$4 sm:$0xff]   ;;  %v4109_v14 = vld [vmem:[#allocation6 + $0x1c0] ss:$16 sps:$4 sm:$0xff]   ;;  %vm3786_vm2 = vmmov (%p138_p12), 0  }
  0x7c   : > { %556 = vmatpush1.bf16.msra.mxu0 %v4001_v42  ;;  %596 = vmatprep.subr.bf16.mxu1 %v4010_v45  ;;  %4843 = vst [vmem:[#allocation31_spill] sm:$0xff] %v4106_v11  ;;  %v4112_v10 = vld [vmem:[#allocation6 + $0x1e4] ss:$16 sps:$4 sm:$0xff]   ;;  %v4115_v12 = vld [vmem:[#allocation6 + $0x1a8] ss:$16 sps:$4 sm:$0xff]  }
  0x7d   : > { %557 = vmatprep.subr.bf16.mxu0 %v4003_v43  ;;  %4844 = vst [vmem:[#allocation32_spill] sm:$0xff] %v4115_v12  ;;  %v4118_v8 = vld [vmem:[#allocation6 + $0x1cc] ss:$16 sps:$4 sm:$0xff]   ;;  %v4121_v13 = vld [vmem:[#allocation6 + $0x1e0] ss:$16 sps:$4 sm:$0xff]  }
  0x7e   : > { %4845 = vst [vmem:[#allocation33_spill] sm:$0xff] %v4118_v8  ;;  %4846 = vst [vmem:[#allocation34_spill] sm:$0xff] %v4121_v13  ;;  %v4125_v9 = vld [vmem:[#allocation6 + $0x1c8] ss:$16 sps:$4 sm:$0xff]  }
  0x7f   : > { %597 = vmatpush1.bf16.msra.mxu1 %v4019_v48  ;;  %4847 = vst [vmem:[#allocation35_spill] sm:$0xff] %v4125_v9 }
  0x80   : > { %558 = vmatpush1.bf16.msra.mxu0 %v4013_v46  ;;  %598 = vmatprep.subr.bf16.mxu1 %v4022_v49 }
  0x81   : > { %559 = vmatprep.subr.bf16.mxu0 %v4016_v47 }
  0x83   : > { %599 = vmatpush1.bf16.msra.mxu1 %v4031_v52 }
  0x84   : > { %560 = vmatpush1.bf16.msra.mxu0 %v4025_v50  ;;  %600 = vmatprep.subr.bf16.mxu1 %v4034_v53 }
  0x85   : > { %561 = vmatprep.subr.bf16.mxu0 %v4027_v51 }
  0x87   : > { %601 = vmatpush1.bf16.msra.mxu1 %v4043_v56 }
  0x88   : > { %562 = vmatpush1.bf16.msra.mxu0 %v4037_v54  ;;  %602 = vmatprep.subr.bf16.mxu1 %v4046_v57 }
  0x89   : > { %563 = vmatprep.subr.bf16.mxu0 %v4040_v55 }
  0x8b   : > { %603 = vmatpush1.bf16.msra.mxu1 %v4055_v60 }
  0x8c   : > { %564 = vmatpush1.bf16.msra.mxu0 %v4049_v58  ;;  %604 = vmatprep.subr.bf16.mxu1 %v4058_v61  ;;  %v4202_v61 = vld [vmem:[#allocation4 + $0xc] ss:$16 sps:$4 sm:$0xff]  }
  0x8d   : > { %565 = vmatprep.subr.bf16.mxu0 %v4051_v59  ;;  %4861 = vst [vmem:[#allocation49_spill] sm:$0xff] %v4202_v61 }
  0x8f   : > { %605 = vmatpush1.bf16.msra.mxu1 %v4067_v0  ;;  %v3231_v0 = vld [vmem:[%s4169_s5 + $0x18] sm:$0xff]  }
  0x90   : > { %566 = vmatpush1.bf16.msra.mxu0 %v4061_v62  ;;  %606 = vmatprep.subr.bf16.mxu1 %v4072_v2  ;;  %v4777_v2 = vmov 0  }
  0x91   : > { %567 = vmatprep.subr.bf16.mxu0 %v4063_v63  ;;  %3108 = vset.pattern.permute.xlu1 %v4777_v2 }
  0x92   : > { %3107 = vset.pattern.permute.xlu0 %v4777_v2 }
  0x93   : > { %607 = vmatpush1.bf16.msra.mxu1 %v4076_v4  ;;  %v4183_v4 = vld [vmem:[#allocation4 + $0xc4] ss:$16 sps:$4 sm:$0xff]  }
  0x94   : > { %568 = vmatpush1.bf16.msra.mxu0 %v4069_v1  ;;  %608 = vmatprep.subr.bf16.mxu1 %v4079_v5  ;;  %v4162_v5 = vld [vmem:[#allocation4 + $0x60] ss:$16 sps:$4 sm:$0xff]  }
  0x95   : > { %569 = vmatprep.subr.bf16.mxu0 %v4074_v3  ;;  %4857 = vst [vmem:[#allocation45_spill] sm:$0xff] %v4162_v5 }
  0x97   : > { %609 = vmatpush1.bf16.msra.mxu1 %v4088_v18  ;;  %v4160_v18 = vld [vmem:[#allocation4 + $0x64] ss:$16 sps:$4 sm:$0xff]  }
  0x98   : > { %570 = vmatpush1.bf16.msra.mxu0 %v4083_v6  ;;  %610 = vmatprep.subr.bf16.mxu1 %v4091_v24  ;;  %v4128_v24 = vld [vmem:[#allocation6 + $0x1ec] ss:$16 sps:$4 sm:$0xff]   ;;  %4856 = vst [vmem:[#allocation44_spill] sm:$0xff] %v4160_v18 }
  0x99   : > { %571 = vmatprep.subr.bf16.mxu0 %v4086_v7  ;;  %4848 = vst [vmem:[#allocation36_spill] sm:$0xff] %v4128_v24 }
  0x9b   : > { %611 = vmatpush1.bf16.msra.mxu1 %v4100_v15  ;;  %v4132_v15 = vpack.c.bf16 %v3767_v20, %v3767_v20  ;;  %v4148_v20 = vld [vmem:[#allocation4 + $0x24] ss:$16 sps:$4 sm:$0xff]  }
  0x9c   : > { %572 = vmatpush1.bf16.msra.mxu0 %v4095_v16  ;;  %612 = vmatprep.subr.bf16.mxu1 %v4106_v11  ;;  %v4136_v11 = vld [vmem:[#allocation6 + $0x1e8] ss:$16 sps:$4 sm:$0xff]   ;;  %4852 = vst [vmem:[#allocation40_spill] sm:$0xff] %v4148_v20 }
  0x9d   : > { %573 = vmatprep.subr.bf16.mxu0 %v4098_v19  ;;  %4849 = vst [vmem:[#allocation37_spill] sm:$0xff] %v4136_v11 }
  0x9f   : > { %613 = vmatpush1.bf16.msra.mxu1 %v4115_v12  ;;  %v4144_v12 = vld [vmem:[#allocation4] ss:$16 sps:$4 sm:$0xff]  }
  0xa0   : > { %574 = vmatpush1.bf16.msra.mxu0 %v4109_v14  ;;  %614 = vmatprep.subr.bf16.mxu1 %v4118_v8  ;;  %v4142_v8 = vld [vmem:[#allocation4 + $0x4] ss:$16 sps:$4 sm:$0xff]   ;;  %4851 = vst [vmem:[#allocation39_spill] sm:$0xff] %v4144_v12 }
  0xa1   : > { %575 = vmatprep.subr.bf16.mxu0 %v4112_v10  ;;  %4850 = vst [vmem:[#allocation38_spill] sm:$0xff] %v4142_v8 }
  0xa3   : > { %615 = vmatpush1.bf16.msra.mxu1 %v4125_v9  ;;  %v4150_v9 = vld [vmem:[#allocation4 + $0x20] ss:$16 sps:$4 sm:$0xff]  }
  0xa4   : > { %576 = vmatpush1.bf16.msra.mxu0 %v4121_v13  ;;  %616 = vmatprep.subr.bf16.mxu1 %v4128_v24  ;;  %4853 = vst [vmem:[#allocation41_spill] sm:$0xff] %v4150_v9  ;;  %v4156_v24 = vld [vmem:[#allocation4 + $0x40] ss:$16 sps:$4 sm:$0xff]  }
  0xa5   : > { %4855 = vst [vmem:[#allocation43_spill] sm:$0xff] %v4156_v24 }
  0xa7   : > { %578 = vmatmul.mubr.bf16.vlgmr.msra.gmra.mrb[0].mxu0 %v4132_v15  ;;  %617 = vmatpush1.bf16.msra.mxu1 %v4136_v11  ;;  %v4154_v11 = vld [vmem:[#allocation4 + $0x44] ss:$16 sps:$4 sm:$0xff]  }
  0xa8   : > { %940 = vmatprep.subr.bf16.mxu1 %v4142_v8  ;;  %4854 = vst [vmem:[#allocation42_spill] sm:$0xff] %v4154_v11 }
  0xaa   : > { %619 = vmatmul.mubr.bf16.vlgmr.msra.gmra.mrb[0].mxu1 %v4132_v15 }
  0xab   : > { %941 = vmatpush1.bf16.msra.mxu1 %v4144_v12  ;;  %v4181_v12 = vld [vmem:[#allocation4 + $0xa0] ss:$16 sps:$4 sm:$0xff]   ;;  %972 = vmatprep.mubr.bf16.mxu1 %v4777_v2 }
  0xac   : > { %942 = vmatprep.subr.bf16.mxu1 %v4148_v20  ;;  %v4167_v20 = vld [vmem:[#allocation4 + $0x84] ss:$16 sps:$4 sm:$0xff]  }
  0xad   : > { %4858 = vst [vmem:[#allocation46_spill] sm:$0xff] %v4167_v20 }
  0xaf   : > { %943 = vmatpush1.bf16.msra.mxu1 %v4150_v9  ;;  %v3219_v9 = vld [vmem:[%s4169_s5] sm:$0xff]  }
  0xb0   : > { %944 = vmatprep.subr.bf16.mxu1 %v4154_v11  ;;  %v4775_v11 = vmov 0.0  }
  0xb1   : > { %2972 = vmatprep.subr.bf16.mxu0 %v4775_v11  ;;  %2980 = vmatprep.mubr.msk.bf16.mxu0 %vm3784_vm0, %v4775_v11 }
  0xb2   : > { %2973 = vmatpush3.bf16.msra.mxu0 %v3219_v9  ;;  %v3227_v9 = vld [vmem:[%s4169_s5 + $0x10] sm:$0xff]  }
  0xb3   : > { %945 = vmatpush1.bf16.msra.mxu1 %v4156_v24  ;;  %v4174_v24 = vld [vmem:[#allocation4 + $0x80] ss:$16 sps:$4 sm:$0xff]   ;;  %2974 = vmatprep.subr.bf16.mxu0 %v4775_v11 }
  0xb4   : > { %946 = vmatprep.subr.bf16.mxu1 %v4160_v18  ;;  %4859 = vst [vmem:[#allocation47_spill] sm:$0xff] %v4174_v24  ;;  %v3223_v18 = vld [vmem:[%s4169_s5 + $0x8] sm:$0xff]  }
  0xb6   : > { %2975 = vmatpush3.bf16.msra.mxu0 %v3223_v18 }
  0xb7   : > { %947 = vmatpush1.bf16.msra.mxu1 %v4162_v5  ;;  %v4178_v5 = vld [vmem:[#allocation4 + $0xa4] ss:$16 sps:$4 sm:$0xff]   ;;  %2976 = vmatprep.subr.bf16.mxu0 %v4775_v11 }
  0xb8   : > { %948 = vmatprep.subr.bf16.mxu1 %v4167_v20  ;;  %4860 = vst [vmem:[#allocation48_spill] sm:$0xff] %v4178_v5  ;;  %v4193_v20 = vld [vmem:[#allocation4 + $0xe4] ss:$16 sps:$4 sm:$0xff]  }
  0xba   : > { %2977 = vmatpush3.bf16.msra.mxu0 %v3227_v9 }
  0xbb   : > { %949 = vmatpush1.bf16.msra.mxu1 %v4174_v24  ;;  %v4191_v24 = vld [vmem:[#allocation4 + $0xc0] ss:$16 sps:$4 sm:$0xff]   ;;  %2978 = vmatprep.subr.bf16.mxu0 %v4775_v11 }
  0xbc   : > { %950 = vmatprep.subr.bf16.mxu1 %v4178_v5  ;;  %v4200_v5 = vld [vmem:[#allocation4 + $0xe0] ss:$16 sps:$4 sm:$0xff]  }
  0xbe   : > { %2979 = vmatpush3.bf16.msra.mxu0 %v3231_v0 }
  0xbf   : > { %951 = vmatpush1.bf16.msra.mxu1 %v4181_v12  ;;  %981 = vmatprep.subr.bf16.mxu0 %v4202_v61 }
  0xc0   : > { %952 = vmatprep.subr.bf16.mxu1 %v4183_v4 }
  0xc3   : > { %953 = vmatpush1.bf16.msra.mxu1 %v4191_v24 }
  0xc4   : > { %954 = vmatprep.subr.bf16.mxu1 %v4193_v20 }
  0xc7   : > { %955 = vmatpush1.bf16.msra.mxu1 %v4200_v5 }
  0xc8   : > { %1063 = vmatprep.subr.bf16.mxu1 %v3944_v21  ;;  %v2802_v21 = vld [vmem:[%s722_s21 + $0x8] sm:$0xff] }
  0xc9   : > { %1244 = vperm.xlu1 %3108, %v2802_v21  }
  0xca   : > { %973 = vmatmul.mubr.bf16.vlgmr.msra.gmra.mrb[4].mxu1 %v4132_v15 }
  0xcb   : > { %1064 = vmatpush1.bf16.msra.mxu1 %v3946_v22  ;;  %v723_v22 = vld [vmem:[%s722_s21] sm:$0xff] }
  0xcc   : > { %1065 = vmatprep.subr.bf16.mxu1 %v3949_v23  ;;  %728 = vperm.xlu0 %3107, %v723_v22   ;;  %v2805_v23 = vld [vmem:[%s724_s24 + $0x8] sm:$0xff] }
  0xcd   : > { %1253 = vperm.xlu1 %3108, %v2805_v23  }
  0xcf   : > { %1066 = vmatpush1.bf16.msra.mxu1 %v3952_v25  ;;  %v725_v25 = vld [vmem:[%s724_s24] sm:$0xff] }
  0xd0   : > { %1067 = vmatprep.subr.bf16.mxu1 %v3955_v26  ;;  %737 = vperm.xlu0 %3107, %v725_v25   ;;  %v2832_v26 = vld [vmem:[%s724_s24 + $0x10] sm:$0xff] }
  0xd1   : > { %1577 = vperm.xlu1 %3108, %v2832_v26  }
  0xd3   : > { %1068 = vmatpush1.bf16.msra.mxu1 %v3962_v29  ;;  %v2829_v29 = vld [vmem:[%s722_s21 + $0x10] sm:$0xff] }
  0xd4   : > { %1069 = vmatprep.subr.bf16.mxu1 %v3966_v30  ;;  %1568 = vperm.xlu0 %3107, %v2829_v29   ;;  %v2859_v30 = vld [vmem:[%s724_s24 + $0x18] sm:$0xff] }
  0xd5   : > { %1901 = vperm.xlu1 %3108, %v2859_v30  }
  0xd7   : > { %1070 = vmatpush1.bf16.msra.mxu1 %v3975_v33  ;;  %v2856_v33 = vld [vmem:[%s722_s21 + $0x18] sm:$0xff] }
  0xd8   : > { %1071 = vmatprep.subr.bf16.mxu1 %v3977_v34  ;;  %1892 = vperm.xlu0 %3107, %v2856_v33  }
  0xdb   : > { %1072 = vmatpush1.bf16.msra.mxu1 %v3989_v38 }
  0xdc   : > { %1073 = vmatprep.subr.bf16.mxu1 %v3992_v39 }
  0xdf   : > { %1074 = vmatpush1.bf16.msra.mxu1 %v4001_v42 }
  0xe0   : > { %1075 = vmatprep.subr.bf16.mxu1 %v4003_v43 }
  0xe3   : > { %1076 = vmatpush1.bf16.msra.mxu1 %v4013_v46 }
  0xe4   : > { %1077 = vmatprep.subr.bf16.mxu1 %v4016_v47 }
  0xe7   : > { %1078 = vmatpush1.bf16.msra.mxu1 %v4025_v50 }
  0xe8   : > { %1079 = vmatprep.subr.bf16.mxu1 %v4027_v51 }
  0xeb   : > { %1080 = vmatpush1.bf16.msra.mxu1 %v4037_v54 }
  0xec   : > { %1081 = vmatprep.subr.bf16.mxu1 %v4040_v55 }
  0xef   : > { %1082 = vmatpush1.bf16.msra.mxu1 %v4049_v58 }
  0xf0   : > { %1083 = vmatprep.subr.bf16.mxu1 %v4051_v59 }
  0xf3   : > { %1084 = vmatpush1.bf16.msra.mxu1 %v4061_v62 }
  0xf4   : > { %1085 = vmatprep.subr.bf16.mxu1 %v4063_v63 }
  0xf7   : > { %1086 = vmatpush1.bf16.msra.mxu1 %v4069_v1 }
  0xf8   : > { %1087 = vmatprep.subr.bf16.mxu1 %v4074_v3 }
  0xfb   : > { %1088 = vmatpush1.bf16.msra.mxu1 %v4083_v6 }
  0xfc   : > { %1089 = vmatprep.subr.bf16.mxu1 %v4086_v7 }
  0xff   : > { %1090 = vmatpush1.bf16.msra.mxu1 %v4095_v16 }
 0x100   : > { %1091 = vmatprep.subr.bf16.mxu1 %v4098_v19 }
 0x103   : > { %1092 = vmatpush1.bf16.msra.mxu1 %v4109_v14 }
 0x104   : > { %1093 = vmatprep.subr.bf16.mxu1 %v4112_v10 }
 0x107   : > { %1094 = vmatpush1.bf16.msra.mxu1 %v4121_v13 }
 0x108   : > { %1264 = vmatprep.subr.bf16.mxu1 %v4142_v8 }
 0x17a   : > { %v579_v34 = vpop.f32.mrb[0].mxu0 }
 0x17b   : > { %v2738_v0 = vmul.f32 -1.442695, %v579_v34  ;;  %v581_v18 = vpop.f32.mrb[1].mxu0 }
 0x17c   : > { %v2739_v9 = vmul.f32 -1.442695, %v581_v18  ;;  %v583_v21 = vpop.f32.mrb[2].mxu0 }
 0x17d   : > { %3269 = vpow2.f32 %v2738_v0  ;;  %v584_v22 = vpop.f32.mrb[3].mxu0  ;;  %v620_v23 = vpop.f32.mrb[0].mxu1 }
 0x17e   : > { %3271 = vpow2.f32 %v2739_v9  ;;  %v622_v25 = vpop.f32.mrb[1].mxu1 }
 0x17f   : > { %v624_v26 = vpop.f32.mrb[2].mxu1  ;;  %v2740_v30 = vmul.f32 -1.442695, %v622_v25 }
 0x180   : > { %v625_v29 = vpop.f32.mrb[3].mxu1 }
 0x181   : > { %3273 = vpow2.f32 %v2740_v30  ;;  %v4267_v30 = vld [vmem:[#allocation4 + $0x48] ss:$16 sps:$4 sm:$0xff]  }
 0x182   : > { %3275 = vtanh.f32 %v620_v23  ;;  %v4264_v23 = vld [vmem:[#allocation4 + $0x4c] ss:$16 sps:$4 sm:$0xff]  }
 0x187   : > { %v3270_v33 = vpop.eup %3269 }
 0x188   : > { %v3272_v11 = vpop.eup %3271  ;;  %v630_v2 = vadd.f32 1.0, %v3270_v33  ;;  %v4270_v33 = vld [vmem:[#allocation4 + $0x6c] ss:$16 sps:$4 sm:$0xff]  }
 0x189   : > { %v636_v61 = vadd.f32 1.0, %v3272_v11  ;;  %v4254_v11 = vld [vmem:[#allocation4 + $0x8] ss:$16 sps:$4 sm:$0xff]  }
 0x18a   : > { %3277 = vrcp.f32 %v630_v2  ;;  %v4256_v2 = vld [vmem:[#allocation4 + $0x2c] ss:$16 sps:$4 sm:$0xff]  }
 0x18b   : > { %3279 = vrcp.f32 %v636_v61  ;;  %v3274_v34 = vpop.eup %3273 }
 0x18c   : > { %v3276_v8 = vpop.eup %3275  ;;  %v643_v21 = vadd.f32 1.0, %v3274_v34  ;;  %v4273_v34 = vld [vmem:[#allocation4 + $0x68] ss:$16 sps:$4 sm:$0xff]  }
 0x18e   : > { %3281 = vrcp.f32 %v643_v21  ;;  %v4279_v21 = vld [vmem:[#allocation4 + $0x88] ss:$16 sps:$4 sm:$0xff]  }
 0x18f   : > { %4863 = vst [vmem:[#allocation50_spill] sm:$0xff] %v4279_v21 }
 0x194   : > { %v3278_v18 = vpop.eup %3277 }
 0x195   : > { %v3280_v0 = vpop.eup %3279  ;;  %v647_v22 = vmul.f32 %v3278_v18, %v3276_v8  ;;  %v4260_v8 = vld [vmem:[#allocation4 + $0x28] ss:$16 sps:$4 sm:$0xff]   ;;  %v4276_v18 = vld [vmem:[#allocation4 + $0x8c] ss:$16 sps:$4 sm:$0xff]  }
 0x196   : > { %v646_v9 = vmul.f32 %v3755_v17, %v3280_v0  ;;  %v4862_v17 = vmov 0   ;;  %v4282_v0 = vld [vmem:[#allocation4 + $0xac] ss:$16 sps:$4 sm:$0xff]  }
 0x197   : > { %4864 = vst [vmem:[#allocation51_spill] sm:$0xff] %v4282_v0 }
 0x198   : > { %v4251_v13 = vadd.f32 %v647_v22, %v646_v9  ;;  %v3282_v25 = vpop.eup %3281  ;;  %v4285_v22 = vld [vmem:[#allocation4 + $0xa8] ss:$16 sps:$4 sm:$0xff]   ;;  %v4288_v9 = vld [vmem:[#allocation4 + $0xcc] ss:$16 sps:$4 sm:$0xff]  }
 0x199   : > { %4865 = vst [vmem:[#allocation52_spill] sm:$0xff] %v4285_v22  ;;  %4866 = vst [vmem:[#allocation53_spill] sm:$0xff] %v4288_v9 }
 0x19a   : > { %3283 = vtanh.f32 %v4251_v13 }
 0x1a4   : > { %v3284_v26 = vpop.eup %3283 }
 0x1a5   : > { %v650_v29 = vmul.f32 %v3284_v26, %v3282_v25  ;;  %v4291_v25 = vld [vmem:[#allocation4 + $0xc8] ss:$16 sps:$4 sm:$0xff]   ;;  %v4294_v26 = vld [vmem:[#allocation4 + $0xec] ss:$16 sps:$4 sm:$0xff]  }
 0x1a6   : > { %4867 = vst [vmem:[#allocation54_spill] sm:$0xff] %v4291_v25  ;;  %4868 = vst [vmem:[#allocation55_spill] sm:$0xff] %v4294_v26 }
 0x1a7   : > { %v651_v61 = vpack.c.bf16 %v650_v29, %v650_v29  ;;  %v4297_v29 = vld [vmem:[#allocation4 + $0xe8] ss:$16 sps:$4 sm:$0xff]  }
 0x1a8   : > { %4869 = vst [vmem:[#allocation56_spill] sm:$0xff] %v4297_v29 }
 0x1a9   : > { %2981 = vmatmul.mubr.msk.bf16.vlgmr.msra.gmra.mrb[4].mxu0 %vm676_vm1, %v651_v61  ;;  %1095 = vmatprep.mubr.bf16.mxu1 %v651_v61 }
 0x1aa   : > { %982 = vmatpush1.bf16.msra.mxu0 %v4254_v11  ;;  %1013 = vmatprep.mubr.bf16.mxu0 %v4862_v17 }
 0x1ab   : > { %983 = vmatprep.subr.bf16.mxu0 %v4256_v2 }
 0x1ae   : > { %984 = vmatpush1.bf16.msra.mxu0 %v4260_v8 }
 0x1af   : > { %985 = vmatprep.subr.bf16.mxu0 %v4264_v23 }
 0x1b2   : > { %986 = vmatpush1.bf16.msra.mxu0 %v4267_v30 }
 0x1b3   : > { %987 = vmatprep.subr.bf16.mxu0 %v4270_v33 }
 0x1b6   : > { %988 = vmatpush1.bf16.msra.mxu0 %v4273_v34 }
 0x1b7   : > { %989 = vmatprep.subr.bf16.mxu0 %v4276_v18 }
 0x1ba   : > { %990 = vmatpush1.bf16.msra.mxu0 %v4279_v21 }
 0x1bb   : > { %991 = vmatprep.subr.bf16.mxu0 %v4282_v0  ;;  %v4892_v0 = vld [vmem:[#allocation20_spill] sm:$0xff] }
 0x1be   : > { %992 = vmatpush1.bf16.msra.mxu0 %v4285_v22  ;;  %v4891_v22 = vld [vmem:[#allocation16_spill] sm:$0xff] }
 0x1bf   : > { %993 = vmatprep.subr.bf16.mxu0 %v4288_v9  ;;  %v4890_v9 = vld [vmem:[#allocation19_spill] sm:$0xff] }
 0x1c2   : > { %994 = vmatpush1.bf16.msra.mxu0 %v4291_v25 }
 0x1c3   : > { %995 = vmatprep.subr.bf16.mxu0 %v4294_v26  ;;  %v4889_v26 = vld [vmem:[#allocation15_spill] sm:$0xff] }
 0x1c6   : > { %996 = vmatpush1.bf16.msra.mxu0 %v4297_v29 }
 0x1c7   : > { %1104 = vmatprep.subr.bf16.mxu0 %v3957_v27  ;;  %v4871_v27 = vld [vmem:[#allocation24_spill] sm:$0xff] }
 0x1c9   : > { %1014 = vmatmul.mubr.bf16.vlgmr.msra.gmra.mrb[8].mxu0 %v4132_v15  ;;  %v4870_v15 = vld [vmem:[#allocation23_spill] sm:$0xff] }
 0x1ca   : > { %1136 = vmatprep.mubr.bf16.mxu0 %v651_v61  ;;  %1105 = vmatpush1.bf16.msra.mxu0 %v3959_v28  ;;  %v4872_v28 = vld [vmem:[#allocation25_spill] sm:$0xff]  ;;  %v729_v61 = vpop.permute.xlu0 %728 }
 0x1cb   : > { %1106 = vmatprep.subr.bf16.mxu0 %v3969_v31  ;;  %v4873_v31 = vld [vmem:[#allocation26_spill] sm:$0xff]  ;;  %v733_v25 = vmul.f32 %v729_v61, %v4889_v26 }
 0x1ce   : > { %1107 = vmatpush1.bf16.msra.mxu0 %v3971_v32  ;;  %v4874_v32 = vld [vmem:[#allocation27_spill] sm:$0xff] }
 0x1cf   : > { %1108 = vmatprep.subr.bf16.mxu0 %v3979_v35  ;;  %v4875_v35 = vld [vmem:[#allocation28_spill] sm:$0xff] }
 0x1d2   : > { %1109 = vmatpush1.bf16.msra.mxu0 %v3983_v36  ;;  %v4876_v36 = vld [vmem:[#allocation29_spill] sm:$0xff] }
 0x1d3   : > { %1110 = vmatprep.subr.bf16.mxu0 %v3986_v37  ;;  %v4877_v37 = vld [vmem:[#allocation30_spill] sm:$0xff] }
 0x1d6   : > { %1111 = vmatpush1.bf16.msra.mxu0 %v3995_v40  ;;  %v4878_v40 = vld [vmem:[#allocation31_spill] sm:$0xff] }
 0x1d7   : > { %1112 = vmatprep.subr.bf16.mxu0 %v3998_v41  ;;  %v974_v41 = vpop.f32.mrb[4].mxu1 }
 0x1da   : > { %1113 = vmatpush1.bf16.msra.mxu0 %v4007_v44  ;;  %v976_v44 = vpop.f32.mrb[5].mxu1 }
 0x1db   : > { %1114 = vmatprep.subr.bf16.mxu0 %v4010_v45  ;;  %v978_v45 = vpop.f32.mrb[6].mxu1 }
 0x1dc   : > { %v4887_v45 = vld [vmem:[#allocation13_spill] sm:$0xff] }
 0x1de   : > { %1115 = vmatpush1.bf16.msra.mxu0 %v4019_v48  ;;  %v4879_v48 = vld [vmem:[#allocation32_spill] sm:$0xff] }
 0x1df   : > { %1116 = vmatprep.subr.bf16.mxu0 %v4022_v49  ;;  %v979_v49 = vpop.f32.mrb[7].mxu1 }
 0x1e2   : > { %1117 = vmatpush1.bf16.msra.mxu0 %v4031_v52  ;;  %v4880_v52 = vld [vmem:[#allocation33_spill] sm:$0xff] }
 0x1e3   : > { %1118 = vmatprep.subr.bf16.mxu0 %v4034_v53  ;;  %v4881_v53 = vld [vmem:[#allocation35_spill] sm:$0xff] }
 0x1e6   : > { %1119 = vmatpush1.bf16.msra.mxu0 %v4043_v56  ;;  %v4882_v56 = vld [vmem:[#allocation36_spill] sm:$0xff] }
 0x1e7   : > { %1120 = vmatprep.subr.bf16.mxu0 %v4046_v57  ;;  %v4883_v57 = vld [vmem:[#allocation37_spill] sm:$0xff] }
 0x1ea   : > { %1121 = vmatpush1.bf16.msra.mxu0 %v4055_v60  ;;  %v4884_v60 = vmov 0.0  }
 0x1eb   : > { %1122 = vmatprep.subr.bf16.mxu0 %v4870_v15  ;;  %v738_v15 = vpop.permute.xlu0 %737 }
 0x1ee   : > { %1123 = vmatpush1.bf16.msra.mxu0 %v4871_v27  ;;  %v4885_v27 = vld [vmem:[#allocation14_spill] sm:$0xff] }
 0x1ef   : > { %1124 = vmatprep.subr.bf16.mxu0 %v4872_v28  ;;  %v732_v28 = vmul.f32 %v729_v61, %v4885_v27  ;;  %v742_v27 = vmul.f32 %v738_v15, %v4890_v9 }
 0x1f2   : > { %1125 = vmatpush1.bf16.msra.mxu0 %v4873_v31  ;;  %v4886_v31 = vld [vmem:[#allocation18_spill] sm:$0xff] }
 0x1f3   : > { %1126 = vmatprep.subr.bf16.mxu0 %v4874_v32  ;;  %v741_v32 = vmul.f32 %v738_v15, %v4886_v31  ;;  %v734_v31 = vmul.f32 %v729_v61, %v4891_v22 }
 0x1f6   : > { %1127 = vmatpush1.bf16.msra.mxu0 %v4875_v35 }
 0x1f7   : > { %1128 = vmatprep.subr.bf16.mxu0 %v4876_v36 }
 0x1fa   : > { %1129 = vmatpush1.bf16.msra.mxu0 %v4877_v37  ;;  %v745_v37 = vadd.f32 %v741_v32, %v732_v28  ;;  %v746_v28 = vadd.f32 %v742_v27, %v733_v25 }
 0x1fb   : > { %1130 = vmatprep.subr.bf16.mxu0 %v4878_v40  ;;  %v731_v40 = vmul.f32 %v729_v61, %v4887_v45  ;;  %v743_v45 = vmul.f32 %v738_v15, %v4892_v0 }
 0x1fc   : > { %v1023_v36 = vadd.f32 %v976_v44, %v745_v37 }
 0x1fd   : > { %v747_v37 = vadd.f32 %v743_v45, %v734_v31 }
 0x1fe   : > { %1131 = vmatpush1.bf16.msra.mxu0 %v4879_v48  ;;  %v4888_v48 = vld [vmem:[#allocation17_spill] sm:$0xff]  ;;  %v2780_v35 = vmul.f32 -1.442695, %v1023_v36 }
 0x1ff   : > { %1132 = vmatprep.subr.bf16.mxu0 %v4880_v52  ;;  %v740_v49 = vmul.f32 %v738_v15, %v4888_v48 }
 0x200   : > { %3285 = vpow2.f32 %v2780_v35 }
 0x201   : > { %v744_v52 = vadd.f32 %v740_v49, %v731_v40  ;;  %v4893_v49 = vld [vmem:[#allocation22_spill] sm:$0xff] }
 0x202   : > { %1133 = vmatpush1.bf16.msra.mxu0 %v4881_v53 }
 0x203   : > { %1134 = vmatprep.subr.bf16.mxu0 %v4882_v56  ;;  %v1022_v53 = vadd.f32 %v974_v41, %v744_v52 }
 0x205   : > { %v2779_v56 = vmul.f32 -1.442695, %v1022_v53 }
 0x206   : > { %1135 = vmatpush1.bf16.msra.mxu0 %v4883_v57 }
 0x207   : > { %2984 = vmatprep.subr.bf16.mxu0 %v4884_v60  ;;  %3287 = vpow2.f32 %v2779_v56 }
 0x20a   : > { %v3286_v57 = vpop.eup %3285 }
 0x20b   : > { %v1035_v21 = vadd.f32 1.0, %v3286_v57 }
 0x20d   : > { %3289 = vrcp.f32 %v1035_v21 }
 0x211   : > { %v3288_v29 = vpop.eup %3287 }
 0x212   : > { %v1029_v48 = vadd.f32 1.0, %v3288_v29 }
 0x214   : > { %3291 = vrcp.f32 %v1029_v48 }
 0x217   : > { %v3290_v56 = vpop.eup %3289 }
 0x218   : > { %v1045_v15 = vmul.f32 %v4893_v49, %v3290_v56  ;;  %v4903_v56 = vld [vmem:[#allocation48_spill] sm:$0xff]  ;;  %v4376_v49 = vld [vmem:[#allocation6 + $0x24] ss:$16 sps:$4 sm:$0xff]  }
 0x219   : > { %4906 = vst [vmem:[#allocation25_spill] sm:$0xff] %v4376_v49 }
 0x21e   : > { %v3292_v32 = vpop.eup %3291 }
 0x29c   : > { %v1015_v40 = vpop.f32.mrb[8].mxu0 }
 0x29d   : > { %v1024_v36 = vadd.f32 %v1015_v40, %v746_v28  ;;  %v1017_v41 = vpop.f32.mrb[9].mxu0  ;;  %v4894_v28 = vld [vmem:[#allocation39_spill] sm:$0xff]  ;;  %v4895_v40 = vld [vmem:[#allocation40_spill] sm:$0xff] }
 0x29e   : > { %v1025_v35 = vadd.f32 %v1017_v41, %v747_v37  ;;  %v1019_v44 = vpop.f32.mrb[10].mxu0  ;;  %v4896_v37 = vld [vmem:[#allocation41_spill] sm:$0xff]  ;;  %v4898_v41 = vld [vmem:[#allocation43_spill] sm:$0xff] }
 0x29f   : > { %3293 = vtanh.f32 %v1024_v36  ;;  %v1020_v52 = vpop.f32.mrb[11].mxu0  ;;  %v4897_v36 = vld [vmem:[#allocation42_spill] sm:$0xff]  ;;  %v4900_v44 = vld [vmem:[#allocation45_spill] sm:$0xff] }
 0x2a0   : > { %v2781_v53 = vmul.f32 -1.442695, %v1025_v35  ;;  %v4899_v35 = vld [vmem:[#allocation44_spill] sm:$0xff]  ;;  %v4901_v52 = vld [vmem:[#allocation46_spill] sm:$0xff] }
 0x2a2   : > { %3295 = vpow2.f32 %v2781_v53  ;;  %v4902_v53 = vld [vmem:[#allocation47_spill] sm:$0xff] }
 0x2a9   : > { %v3294_v61 = vpop.eup %3293 }
 0x2aa   : > { %v1046_v57 = vmul.f32 %v3294_v61, %v3292_v32  ;;  %v4369_v32 = vld [vmem:[#allocation6 + $0x4] ss:$16 sps:$4 sm:$0xff]   ;;  %v4373_v61 = vld [vmem:[#allocation6] ss:$16 sps:$4 sm:$0xff]  }
 0x2ab   : > { %4904 = vst [vmem:[#allocation23_spill] sm:$0xff] %v4369_v32  ;;  %4905 = vst [vmem:[#allocation24_spill] sm:$0xff] %v4373_v61 }
 0x2ac   : > { %v3296_v29 = vpop.eup %3295  ;;  %v4344_v25 = vadd.f32 %v1046_v57, %v1045_v15  ;;  %v4379_v15 = vld [vmem:[#allocation6 + $0x20] ss:$16 sps:$4 sm:$0xff]   ;;  %v4382_v57 = vld [vmem:[#allocation6 + $0x44] ss:$16 sps:$4 sm:$0xff]  }
 0x2ad   : > { %v1042_v27 = vadd.f32 1.0, %v3296_v29  ;;  %4907 = vst [vmem:[#allocation26_spill] sm:$0xff] %v4379_v15  ;;  %4908 = vst [vmem:[#allocation27_spill] sm:$0xff] %v4382_v57  ;;  %v4385_v29 = vld [vmem:[#allocation6 + $0x40] ss:$16 sps:$4 sm:$0xff]  }
 0x2ae   : > { %3297 = vtanh.f32 %v4344_v25  ;;  %4909 = vst [vmem:[#allocation22_spill] sm:$0xff] %v4385_v29 }
 0x2af   : > { %3299 = vrcp.f32 %v1042_v27  ;;  %v4388_v27 = vld [vmem:[#allocation6 + $0x64] ss:$16 sps:$4 sm:$0xff]  }
 0x2b0   : > { %4910 = vst [vmem:[#allocation39_spill] sm:$0xff] %v4388_v27 }
 0x2b8   : > { %v3298_v21 = vpop.eup %3297 }
 0x2b9   : > { %v3300_v48 = vpop.eup %3299 }
 0x2ba   : > { %v1049_v31 = vmul.f32 %v3300_v48, %v3298_v21  ;;  %v4391_v21 = vld [vmem:[#allocation6 + $0x60] ss:$16 sps:$4 sm:$0xff]   ;;  %v4394_v48 = vld [vmem:[#allocation6 + $0x84] ss:$16 sps:$4 sm:$0xff]  }
 0x2bb   : > { %4911 = vst [vmem:[#allocation40_spill] sm:$0xff] %v4391_v21  ;;  %4912 = vst [vmem:[#allocation41_spill] sm:$0xff] %v4394_v48 }
 0x2bc   : > { %v4347_v45 = vpack.c.bf16 %v1049_v31, %v1049_v31 }
 0x2be   : > { %1096 = vmatmul.mubr.bf16.vlgmr.msra.gmra.mrb[8].mxu1 %v4347_v45  ;;  %1137 = vmatmul.mubr.bf16.vlgmr.msra.gmra.mrb[12].mxu0 %v4347_v45 }
 0x2bf   : > { %1265 = vmatpush1.bf16.msra.mxu1 %v4894_v28  ;;  %1296 = vmatprep.mubr.bf16.mxu1 %v4862_v17 }
 0x2c0   : > { %1266 = vmatprep.subr.bf16.mxu1 %v4895_v40  ;;  %2992 = vmatprep.mubr.msk.bf16.mxu0 %vm3784_vm0, %v4884_v60 }
 0x2c3   : > { %1267 = vmatpush1.bf16.msra.mxu1 %v4896_v37 }
 0x2c4   : > { %1268 = vmatprep.subr.bf16.mxu1 %v4897_v36 }
 0x2c7   : > { %1269 = vmatpush1.bf16.msra.mxu1 %v4898_v41 }
 0x2c8   : > { %1270 = vmatprep.subr.bf16.mxu1 %v4899_v35 }
 0x2cb   : > { %1271 = vmatpush1.bf16.msra.mxu1 %v4900_v44 }
 0x2cc   : > { %1272 = vmatprep.subr.bf16.mxu1 %v4901_v52 }
 0x2cf   : > { %1273 = vmatpush1.bf16.msra.mxu1 %v4902_v53 }
 0x2d0   : > { %1274 = vmatprep.subr.bf16.mxu1 %v4903_v56 }
 0x2d3   : > { %1275 = vmatpush1.bf16.msra.mxu1 %v4181_v12 }
 0x2d4   : > { %1276 = vmatprep.subr.bf16.mxu1 %v4183_v4 }
 0x2d7   : > { %1277 = vmatpush1.bf16.msra.mxu1 %v4191_v24 }
 0x2d8   : > { %1278 = vmatprep.subr.bf16.mxu1 %v4193_v20 }
 0x2db   : > { %1279 = vmatpush1.bf16.msra.mxu1 %v4200_v5 }
 0x2dc   : > { %1387 = vmatprep.subr.bf16.mxu1 %v4369_v32  ;;  %v4941_v32 = vld [vmem:[#allocation28_spill] sm:$0xff] }
 0x2de   : > { %1297 = vmatmul.mubr.bf16.vlgmr.msra.gmra.mrb[12].mxu1 %v4347_v45 }
 0x2df   : > { %1388 = vmatpush1.bf16.msra.mxu1 %v4373_v61  ;;  %v4518_v61 = vld [vmem:[#allocation6 + $0x148] ss:$16 sps:$4 sm:$0xff]  }
 0x2e0   : > { %1389 = vmatprep.subr.bf16.mxu1 %v4376_v49  ;;  %v4515_v49 = vld [vmem:[#allocation6 + $0x14c] ss:$16 sps:$4 sm:$0xff]  }
 0x2e3   : > { %1390 = vmatpush1.bf16.msra.mxu1 %v4379_v15  ;;  %v4512_v15 = vld [vmem:[#allocation6 + $0x128] ss:$16 sps:$4 sm:$0xff]  }
 0x2e4   : > { %1391 = vmatprep.subr.bf16.mxu1 %v4382_v57  ;;  %v4509_v57 = vld [vmem:[#allocation6 + $0x12c] ss:$16 sps:$4 sm:$0xff]  }
 0x2e7   : > { %1392 = vmatpush1.bf16.msra.mxu1 %v4385_v29  ;;  %v4506_v29 = vld [vmem:[#allocation6 + $0x108] ss:$16 sps:$4 sm:$0xff]  }
 0x2e8   : > { %1393 = vmatprep.subr.bf16.mxu1 %v4388_v27  ;;  %v4503_v27 = vld [vmem:[#allocation6 + $0x10c] ss:$16 sps:$4 sm:$0xff]  }
 0x2eb   : > { %1394 = vmatpush1.bf16.msra.mxu1 %v4391_v21  ;;  %v4500_v21 = vld [vmem:[#allocation6 + $0xe8] ss:$16 sps:$4 sm:$0xff]  }
 0x2ec   : > { %1395 = vmatprep.subr.bf16.mxu1 %v4394_v48  ;;  %v4497_v48 = vld [vmem:[#allocation6 + $0xec] ss:$16 sps:$4 sm:$0xff]  }
 0x2ef   : > { %1396 = vmatpush1.bf16.msra.mxu1 %v3989_v38  ;;  %v4913_v38 = vld [vmem:[#allocation34_spill] sm:$0xff] }
 0x2f0   : > { %1397 = vmatprep.subr.bf16.mxu1 %v3992_v39  ;;  %v4914_v39 = vld [vmem:[#allocation38_spill] sm:$0xff] }
 0x2f3   : > { %1398 = vmatpush1.bf16.msra.mxu1 %v4001_v42  ;;  %v3257_v42 = vld [vmem:[%s4169_s5 + $0x20] sm:$0xff]  }
 0x2f4   : > { %1399 = vmatprep.subr.bf16.mxu1 %v4003_v43  ;;  %2985 = vmatpush3.bf16.msra.mxu0 %v3257_v42  ;;  %v3258_v43 = vld [vmem:[%s4169_s5 + $0x28] sm:$0xff]  }
 0x2f5   : > { %2986 = vmatprep.subr.bf16.mxu0 %v4884_v60 }
 0x2f7   : > { %1400 = vmatpush1.bf16.msra.mxu1 %v4013_v46  ;;  %v3259_v46 = vld [vmem:[%s4169_s5 + $0x30] sm:$0xff]  }
 0x2f8   : > { %1401 = vmatprep.subr.bf16.mxu1 %v4016_v47  ;;  %2987 = vmatpush3.bf16.msra.mxu0 %v3258_v43 }
 0x2f9   : > { %2988 = vmatprep.subr.bf16.mxu0 %v4884_v60 }
 0x2fb   : > { %1402 = vmatpush1.bf16.msra.mxu1 %v4025_v50 }
 0x2fc   : > { %1403 = vmatprep.subr.bf16.mxu1 %v4027_v51  ;;  %2989 = vmatpush3.bf16.msra.mxu0 %v3259_v46 }
 0x2fd   : > { %2990 = vmatprep.subr.bf16.mxu0 %v4884_v60 }
 0x2ff   : > { %1404 = vmatpush1.bf16.msra.mxu1 %v4037_v54 }
 0x300   : > { %1405 = vmatprep.subr.bf16.mxu1 %v4040_v55 }
 0x303   : > { %1406 = vmatpush1.bf16.msra.mxu1 %v4049_v58 }
 0x304   : > { %1407 = vmatprep.subr.bf16.mxu1 %v4051_v59 }
 0x307   : > { %1408 = vmatpush1.bf16.msra.mxu1 %v4061_v62 }
 0x308   : > { %1409 = vmatprep.subr.bf16.mxu1 %v4063_v63 }
 0x30b   : > { %1410 = vmatpush1.bf16.msra.mxu1 %v4069_v1 }
 0x30c   : > { %1411 = vmatprep.subr.bf16.mxu1 %v4074_v3 }
 0x30f   : > { %1412 = vmatpush1.bf16.msra.mxu1 %v4083_v6 }
 0x310   : > { %1413 = vmatprep.subr.bf16.mxu1 %v4086_v7 }
 0x313   : > { %1414 = vmatpush1.bf16.msra.mxu1 %v4095_v16  ;;  %v3260_v16 = vld [vmem:[%s4169_s5 + $0x38] sm:$0xff]  }
 0x314   : > { %1415 = vmatprep.subr.bf16.mxu1 %v4098_v19  ;;  %2991 = vmatpush3.bf16.msra.mxu0 %v3260_v16 }
 0x317   : > { %1416 = vmatpush1.bf16.msra.mxu1 %v4109_v14  ;;  %v4915_v14 = vld [vmem:[#allocation49_spill] sm:$0xff] }
 0x318   : > { %1417 = vmatprep.subr.bf16.mxu1 %v4112_v10  ;;  %1305 = vmatprep.subr.bf16.mxu0 %v4915_v14  ;;  %4932 = vst [vmem:[#allocation49_spill] sm:$0xff] %v4497_v48 }
 0x31b   : > { %1418 = vmatpush1.bf16.msra.mxu1 %v4913_v38 }
 0x31c   : > { %1588 = vmatprep.subr.bf16.mxu1 %v4914_v39 }
 0x391   : > { %v1097_v10 = vpop.f32.mrb[8].mxu1  ;;  %v1138_v19 = vpop.f32.mrb[12].mxu0 }
 0x392   : > { %v2792_v47 = vmul.f32 -1.442695, %v1097_v10  ;;  %v1099_v50 = vpop.f32.mrb[9].mxu1  ;;  %v1140_v51 = vpop.f32.mrb[13].mxu0 }
 0x393   : > { %v2793_v54 = vmul.f32 -1.442695, %v1099_v50  ;;  %v1101_v55 = vpop.f32.mrb[10].mxu1  ;;  %v1142_v58 = vpop.f32.mrb[14].mxu0  ;;  %v2794_v63 = vmul.f32 -1.442695, %v1140_v51 }
 0x394   : > { %3301 = vpow2.f32 %v2792_v47  ;;  %v1102_v59 = vpop.f32.mrb[11].mxu1  ;;  %v1143_v62 = vpop.f32.mrb[15].mxu0 }
 0x395   : > { %3303 = vpow2.f32 %v2793_v54  ;;  %v4918_v62 = vld [vmem:[#allocation51_spill] sm:$0xff] }
 0x396   : > { %3305 = vpow2.f32 %v2794_v63  ;;  %v4919_v63 = vld [vmem:[#allocation52_spill] sm:$0xff]  ;;  %4934 = vst [vmem:[#allocation51_spill] sm:$0xff] %v4503_v27 }
 0x397   : > { %3307 = vtanh.f32 %v1138_v19  ;;  %4935 = vst [vmem:[#allocation52_spill] sm:$0xff] %v4506_v29 }
 0x39e   : > { %v3302_v1 = vpop.eup %3301 }
 0x39f   : > { %v3304_v3 = vpop.eup %3303  ;;  %v1148_v6 = vadd.f32 1.0, %v3302_v1  ;;  %v4920_v1 = vld [vmem:[#allocation53_spill] sm:$0xff] }
 0x3a0   : > { %v1154_v7 = vadd.f32 1.0, %v3304_v3  ;;  %v3306_v31 = vpop.eup %3305  ;;  %v4921_v3 = vld [vmem:[#allocation54_spill] sm:$0xff]  ;;  %4936 = vst [vmem:[#allocation53_spill] sm:$0xff] %v4509_v57 }
 0x3a1   : > { %3309 = vrcp.f32 %v1148_v6  ;;  %v3308_v38 = vpop.eup %3307  ;;  %v1161_v46 = vadd.f32 1.0, %v3306_v31  ;;  %v4922_v6 = vld [vmem:[#allocation55_spill] sm:$0xff]  ;;  %v4454_v31 = vld [vmem:[#allocation6 + $0xc] ss:$16 sps:$4 sm:$0xff]   ;;  %4937 = vst [vmem:[#allocation54_spill] sm:$0xff] %v4512_v15 }
 0x3a2   : > { %3311 = vrcp.f32 %v1154_v7  ;;  %v4923_v7 = vld [vmem:[#allocation56_spill] sm:$0xff]  ;;  %4938 = vst [vmem:[#allocation55_spill] sm:$0xff] %v4515_v49 }
 0x3a3   : > { %3313 = vrcp.f32 %v1161_v46  ;;  %v4470_v46 = vld [vmem:[#allocation6 + $0x48] ss:$16 sps:$4 sm:$0xff]   ;;  %4939 = vst [vmem:[#allocation56_spill] sm:$0xff] %v4518_v61 }
 0x3ab   : > { %v3310_v39 = vpop.eup %3309 }
 0x3ac   : > { %v3312_v42 = vpop.eup %3311  ;;  %v1165_v43 = vmul.f32 %v3310_v39, %v3308_v38  ;;  %v4458_v38 = vld [vmem:[#allocation6 + $0x8] ss:$16 sps:$4 sm:$0xff]   ;;  %v4461_v39 = vld [vmem:[#allocation6 + $0x2c] ss:$16 sps:$4 sm:$0xff]  }
 0x3ad   : > { %v1164_v16 = vmul.f32 %v3312_v42, %v4251_v13  ;;  %v3314_v54 = vpop.eup %3313  ;;  %v4917_v13 = vld [vmem:[#allocation50_spill] sm:$0xff] }
 0x3ae   : > { %v4464_v42 = vld [vmem:[#allocation6 + $0x28] ss:$16 sps:$4 sm:$0xff]   ;;  %4933 = vst [vmem:[#allocation50_spill] sm:$0xff] %v4500_v21 }
 0x3af   : > { %v4430_v10 = vadd.f32 %v1165_v43, %v1164_v16  ;;  %v4467_v43 = vld [vmem:[#allocation6 + $0x4c] ss:$16 sps:$4 sm:$0xff]   ;;  %v4476_v16 = vld [vmem:[#allocation6 + $0x68] ss:$16 sps:$4 sm:$0xff]  }
 0x3b0   : > { %4925 = vst [vmem:[#allocation44_spill] sm:$0xff] %v4476_v16 }
 0x3b1   : > { %4916 = vst [vmem:[#allocation42_spill] sm:$0xff] %v4430_v10  ;;  %3315 = vtanh.f32 %v4430_v10  ;;  %v4433_v47 = vpop.f32.mrb[12].mxu1  ;;  %v4521_v10 = vld [vmem:[#allocation6 + $0x16c] ss:$16 sps:$4 sm:$0xff]  }
 0x3b2   : > { %v4435_v50 = vpop.f32.mrb[13].mxu1  ;;  %4940 = vst [vmem:[#allocation57_spill] sm:$0xff] %v4521_v10 }
 0x3b3   : > { %v1302_v19 = vpop.f32.mrb[14].mxu1 }
 0x3b4   : > { %v1303_v51 = vpop.f32.mrb[15].mxu1  ;;  %v4479_v19 = vld [vmem:[#allocation6 + $0x8c] ss:$16 sps:$4 sm:$0xff]  }
 0x3b5   : > { %4926 = vst [vmem:[#allocation45_spill] sm:$0xff] %v4479_v19  ;;  %v4482_v51 = vld [vmem:[#allocation6 + $0x88] ss:$16 sps:$4 sm:$0xff]  }
 0x3b6   : > { %4927 = vst [vmem:[#allocation46_spill] sm:$0xff] %v4482_v51 }
 0x3bb   : > { %v3316_v55 = vpop.eup %3315 }
 0x3bc   : > { %v1168_v58 = vmul.f32 %v3316_v55, %v3314_v54  ;;  %v4485_v54 = vld [vmem:[#allocation6 + $0xac] ss:$16 sps:$4 sm:$0xff]   ;;  %v4488_v55 = vld [vmem:[#allocation6 + $0xa8] ss:$16 sps:$4 sm:$0xff]  }
 0x3bd   : > { %4928 = vst [vmem:[#allocation47_spill] sm:$0xff] %v4485_v54  ;;  %4929 = vst [vmem:[#allocation48_spill] sm:$0xff] %v4488_v55 }
 0x3be   : > { %v1169_v59 = vpack.c.bf16 %v1168_v58, %v1168_v58  ;;  %v4491_v58 = vld [vmem:[#allocation6 + $0xcc] ss:$16 sps:$4 sm:$0xff]  }
 0x3bf   : > { %4930 = vst [vmem:[#allocation34_spill] sm:$0xff] %v4491_v58 }
 0x3c0   : > { %2993 = vmatmul.mubr.msk.bf16.vlgmr.msra.gmra.mrb[4].mxu0 %vm676_vm1, %v1169_v59  ;;  %1419 = vmatprep.mubr.bf16.mxu1 %v1169_v59 }
 0x3c1   : > { %1306 = vmatpush1.bf16.msra.mxu0 %v4254_v11  ;;  %1337 = vmatprep.mubr.bf16.mxu0 %v4862_v17 }
 0x3c2   : > { %1307 = vmatprep.subr.bf16.mxu0 %v4256_v2 }
 0x3c5   : > { %1308 = vmatpush1.bf16.msra.mxu0 %v4260_v8 }
 0x3c6   : > { %1309 = vmatprep.subr.bf16.mxu0 %v4264_v23 }
 0x3c9   : > { %1310 = vmatpush1.bf16.msra.mxu0 %v4267_v30 }
 0x3ca   : > { %1311 = vmatprep.subr.bf16.mxu0 %v4270_v33 }
 0x3cd   : > { %1312 = vmatpush1.bf16.msra.mxu0 %v4273_v34 }
 0x3ce   : > { %1313 = vmatprep.subr.bf16.mxu0 %v4276_v18 }
 0x3d1   : > { %1314 = vmatpush1.bf16.msra.mxu0 %v4917_v13 }
 0x3d2   : > { %1315 = vmatprep.subr.bf16.mxu0 %v4918_v62 }
 0x3d5   : > { %1316 = vmatpush1.bf16.msra.mxu0 %v4919_v63 }
 0x3d6   : > { %1317 = vmatprep.subr.bf16.mxu0 %v4920_v1 }
 0x3d9   : > { %1318 = vmatpush1.bf16.msra.mxu0 %v4921_v3 }
 0x3da   : > { %1319 = vmatprep.subr.bf16.mxu0 %v4922_v6 }
 0x3dd   : > { %1320 = vmatpush1.bf16.msra.mxu0 %v4923_v7 }
 0x3de   : > { %1428 = vmatprep.subr.bf16.mxu0 %v4454_v31 }
 0x3e0   : > { %1338 = vmatmul.mubr.bf16.vlgmr.msra.gmra.mrb[16].mxu0 %v4347_v45  ;;  %v4473_v45 = vld [vmem:[#allocation6 + $0x6c] ss:$16 sps:$4 sm:$0xff]  }
 0x3e1   : > { %1460 = vmatprep.mubr.bf16.mxu0 %v1169_v59  ;;  %1429 = vmatpush1.bf16.msra.mxu0 %v4458_v38  ;;  %4924 = vst [vmem:[#allocation43_spill] sm:$0xff] %v4473_v45  ;;  %v4494_v59 = vld [vmem:[#allocation6 + $0xc8] ss:$16 sps:$4 sm:$0xff]  }
 0x3e2   : > { %1430 = vmatprep.subr.bf16.mxu0 %v4461_v39  ;;  %4931 = vst [vmem:[#allocation38_spill] sm:$0xff] %v4494_v59 }
 0x3e5   : > { %1431 = vmatpush1.bf16.msra.mxu0 %v4464_v42 }
 0x3e6   : > { %1432 = vmatprep.subr.bf16.mxu0 %v4467_v43 }
 0x3e9   : > { %1433 = vmatpush1.bf16.msra.mxu0 %v4470_v46 }
 0x3ea   : > { %1434 = vmatprep.subr.bf16.mxu0 %v4473_v45 }
 0x3ed   : > { %1435 = vmatpush1.bf16.msra.mxu0 %v4476_v16 }
 0x3ee   : > { %1436 = vmatprep.subr.bf16.mxu0 %v4479_v19 }
 0x3f1   : > { %1437 = vmatpush1.bf16.msra.mxu0 %v4482_v51 }
 0x3f2   : > { %1438 = vmatprep.subr.bf16.mxu0 %v4485_v54  ;;  %v4953_v54 = vld [vmem:[#allocation17_spill] sm:$0xff] }
 0x3f5   : > { %1439 = vmatpush1.bf16.msra.mxu0 %v4488_v55  ;;  %v4952_v55 = vld [vmem:[#allocation13_spill] sm:$0xff] }
 0x3f6   : > { %1440 = vmatprep.subr.bf16.mxu0 %v4491_v58  ;;  %v4951_v58 = vld [vmem:[#allocation18_spill] sm:$0xff] }
 0x3f9   : > { %1441 = vmatpush1.bf16.msra.mxu0 %v4494_v59  ;;  %v4950_v59 = vld [vmem:[#allocation14_spill] sm:$0xff] }
 0x3fa   : > { %1442 = vmatprep.subr.bf16.mxu0 %v4497_v48  ;;  %v4948_v48 = vld [vmem:[#allocation36_spill] sm:$0xff] }
 0x3fd   : > { %1443 = vmatpush1.bf16.msra.mxu0 %v4500_v21  ;;  %v4946_v21 = vld [vmem:[#allocation33_spill] sm:$0xff] }
 0x3fe   : > { %1444 = vmatprep.subr.bf16.mxu0 %v4503_v27  ;;  %v4944_v27 = vld [vmem:[#allocation31_spill] sm:$0xff] }
 0x401   : > { %1445 = vmatpush1.bf16.msra.mxu0 %v4506_v29  ;;  %v4942_v29 = vld [vmem:[#allocation29_spill] sm:$0xff] }
 0x402   : > { %1446 = vmatprep.subr.bf16.mxu0 %v4509_v57  ;;  %v4943_v57 = vld [vmem:[#allocation30_spill] sm:$0xff] }
 0x405   : > { %1447 = vmatpush1.bf16.msra.mxu0 %v4512_v15  ;;  %v4945_v15 = vld [vmem:[#allocation32_spill] sm:$0xff] }
 0x406   : > { %1448 = vmatprep.subr.bf16.mxu0 %v4515_v49  ;;  %v4947_v49 = vld [vmem:[#allocation35_spill] sm:$0xff] }
 0x409   : > { %1449 = vmatpush1.bf16.msra.mxu0 %v4518_v61  ;;  %v4949_v61 = vld [vmem:[#allocation37_spill] sm:$0xff] }
 0x40a   : > { %1450 = vmatprep.subr.bf16.mxu0 %v4521_v10  ;;  %v1245_v10 = vpop.permute.xlu1 %1244 }
 0x40d   : > { %1451 = vmatpush1.bf16.msra.mxu0 %v4941_v32 }
 0x40e   : > { %1452 = vmatprep.subr.bf16.mxu0 %v4942_v29  ;;  %v1254_v32 = vpop.permute.xlu1 %1253  ;;  %v1248_v29 = vmul.f32 %v1245_v10, %v4950_v59  ;;  %v1249_v59 = vmul.f32 %v1245_v10, %v4889_v26 }
 0x411   : > { %1453 = vmatpush1.bf16.msra.mxu0 %v4943_v57  ;;  %v1257_v57 = vmul.f32 %v1254_v32, %v4951_v58  ;;  %v1258_v58 = vmul.f32 %v1254_v32, %v4890_v9 }
 0x412   : > { %1454 = vmatprep.subr.bf16.mxu0 %v4944_v27  ;;  %v1247_v27 = vmul.f32 %v1245_v10, %v4952_v55  ;;  %v1250_v55 = vmul.f32 %v1245_v10, %v4891_v22 }
 0x413   : > { %v1261_v51 = vadd.f32 %v1257_v57, %v1248_v29 }
 0x415   : > { %1455 = vmatpush1.bf16.msra.mxu0 %v4945_v15  ;;  %v1256_v15 = vmul.f32 %v1254_v32, %v4953_v54  ;;  %v1259_v54 = vmul.f32 %v1254_v32, %v4892_v0 }
 0x416   : > { %1456 = vmatprep.subr.bf16.mxu0 %v4946_v21 }
 0x417   : > { %v1260_v21 = vadd.f32 %v1256_v15, %v1247_v27  ;;  %v1262_v27 = vadd.f32 %v1258_v58, %v1249_v59 }
 0x419   : > { %1457 = vmatpush1.bf16.msra.mxu0 %v4947_v49  ;;  %v1347_v49 = vadd.f32 %v4435_v50, %v1261_v51  ;;  %v1263_v51 = vadd.f32 %v1259_v54, %v1250_v55 }
 0x41a   : > { %1458 = vmatprep.subr.bf16.mxu0 %v4948_v48  ;;  %v1346_v48 = vadd.f32 %v4433_v47, %v1260_v21 }
 0x41b   : > { %v2807_v19 = vmul.f32 -1.442695, %v1347_v49 }
 0x41d   : > { %1459 = vmatpush1.bf16.msra.mxu0 %v4949_v61  ;;  %v2806_v61 = vmul.f32 -1.442695, %v1346_v48  ;;  %3317 = vpow2.f32 %v2807_v19 }
 0x41e   : > { %2996 = vmatprep.subr.bf16.mxu0 %v4884_v60 }
 0x41f   : > { %3319 = vpow2.f32 %v2806_v61 }
 0x427   : > { %v3318_v16 = vpop.eup %3317 }
 0x428   : > { %v1359_v29 = vadd.f32 1.0, %v3318_v16 }
 0x429   : > { %v3320_v45 = vpop.eup %3319 }
 0x42a   : > { %v1353_v57 = vadd.f32 1.0, %v3320_v45  ;;  %3321 = vrcp.f32 %v1359_v29 }
 0x42c   : > { %3323 = vrcp.f32 %v1353_v57 }
 0x434   : > { %v3322_v61 = vpop.eup %3321 }
 0x435   : > { %v1369_v32 = vmul.f32 %v3322_v61, %v4344_v25  ;;  %v4968_v25 = vld [vmem:[#allocation55_spill] sm:$0xff] }
 0x436   : > { %v3324_v9 = vpop.eup %3323 }
 0x4b3   : > { %v1339_v50 = vpop.f32.mrb[16].mxu0 }
 0x4b4   : > { %v1348_v47 = vadd.f32 %v1339_v50, %v1262_v27  ;;  %v1341_v15 = vpop.f32.mrb[17].mxu0 }
 0x4b5   : > { %v1349_v19 = vadd.f32 %v1341_v15, %v1263_v51  ;;  %v1343_v21 = vpop.f32.mrb[18].mxu0 }
 0x4b6   : > { %3325 = vtanh.f32 %v1348_v47  ;;  %v1344_v49 = vpop.f32.mrb[19].mxu0 }
 0x4b7   : > { %v2808_v48 = vmul.f32 -1.442695, %v1349_v19 }
 0x4b9   : > { %3327 = vpow2.f32 %v2808_v48 }
 0x4c0   : > { %v3326_v10 = vpop.eup %3325 }
 0x4c1   : > { %v1370_v16 = vmul.f32 %v3326_v10, %v3324_v9  ;;  %v4967_v9 = vld [vmem:[#allocation54_spill] sm:$0xff] }
 0x4c3   : > { %v3328_v45 = vpop.eup %3327  ;;  %v4545_v58 = vadd.f32 %v1370_v16, %v1369_v32 }
 0x4c4   : > { %v1366_v54 = vadd.f32 1.0, %v3328_v45 }
 0x4c5   : > { %3329 = vtanh.f32 %v4545_v58 }
 0x4c6   : > { %3331 = vrcp.f32 %v1366_v54  ;;  %v4972_v54 = vld [vmem:[#allocation42_spill] sm:$0xff] }
 0x4cf   : > { %v3330_v55 = vpop.eup %3329 }
 0x4d0   : > { %v3332_v59 = vpop.eup %3331 }
 0x4d1   : > { %v1373_v29 = vmul.f32 %v3332_v59, %v3330_v55 }
 0x4d3   : > { %v1386_v57 = vpack.c.bf16 %v1373_v29, %v1373_v29  ;;  %v1578_v29 = vpop.permute.xlu1 %1577 }
 0x4d5   : > { %1420 = vmatmul.mubr.bf16.vlgmr.msra.gmra.mrb[16].mxu1 %v1386_v57  ;;  %1461 = vmatmul.mubr.bf16.vlgmr.msra.gmra.mrb[20].mxu0 %v1386_v57 }
 0x4d6   : > { %1589 = vmatpush1.bf16.msra.mxu1 %v4894_v28  ;;  %1620 = vmatprep.mubr.bf16.mxu1 %v4862_v17  ;;  %v4969_v28 = vld [vmem:[#allocation56_spill] sm:$0xff] }
 0x4d7   : > { %1590 = vmatprep.subr.bf16.mxu1 %v4895_v40  ;;  %3004 = vmatprep.mubr.msk.bf16.mxu0 %vm3784_vm0, %v4884_v60  ;;  %v4970_v40 = vld [vmem:[#allocation57_spill] sm:$0xff] }
 0x4da   : > { %1591 = vmatpush1.bf16.msra.mxu1 %v4896_v37  ;;  %v3429_v37 = vld [vmem:[#allocation6 + $0x168] ss:$16 sps:$4 sm:$0xff]  }
 0x4db   : > { %1592 = vmatprep.subr.bf16.mxu1 %v4897_v36  ;;  %v3430_v36 = vld [vmem:[#allocation6 + $0x18c] ss:$16 sps:$4 sm:$0xff]  }
 0x4de   : > { %1593 = vmatpush1.bf16.msra.mxu1 %v4898_v41  ;;  %v3261_v41 = vld [vmem:[%s4169_s5 + $0x40] sm:$0xff]  }
 0x4df   : > { %1594 = vmatprep.subr.bf16.mxu1 %v4899_v35  ;;  %v3431_v35 = vld [vmem:[#allocation6 + $0x188] ss:$16 sps:$4 sm:$0xff]   ;;  %2997 = vmatpush3.bf16.msra.mxu0 %v3261_v41 }
 0x4e0   : > { %2998 = vmatprep.subr.bf16.mxu0 %v4884_v60 }
 0x4e2   : > { %1595 = vmatpush1.bf16.msra.mxu1 %v4900_v44  ;;  %v3432_v44 = vld [vmem:[#allocation6 + $0x1ac] ss:$16 sps:$4 sm:$0xff]  }
 0x4e3   : > { %1596 = vmatprep.subr.bf16.mxu1 %v4901_v52  ;;  %v3262_v52 = vld [vmem:[%s4169_s5 + $0x48] sm:$0xff]  }
 0x4e4   : > { %2999 = vmatpush3.bf16.msra.mxu0 %v3262_v52 }
 0x4e5   : > { %3000 = vmatprep.subr.bf16.mxu0 %v4884_v60 }
 0x4e6   : > { %1597 = vmatpush1.bf16.msra.mxu1 %v4902_v53  ;;  %v3433_v53 = vld [vmem:[#allocation6 + $0x1a8] ss:$16 sps:$4 sm:$0xff]  }
 0x4e7   : > { %1598 = vmatprep.subr.bf16.mxu1 %v4903_v56  ;;  %v3434_v56 = vld [vmem:[#allocation6 + $0x1cc] ss:$16 sps:$4 sm:$0xff]  }
 0x4ea   : > { %1599 = vmatpush1.bf16.msra.mxu1 %v4181_v12  ;;  %v4954_v12 = vld [vmem:[#allocation43_spill] sm:$0xff] }
 0x4eb   : > { %1600 = vmatprep.subr.bf16.mxu1 %v4183_v4  ;;  %v4955_v4 = vld [vmem:[#allocation44_spill] sm:$0xff] }
 0x4ee   : > { %1601 = vmatpush1.bf16.msra.mxu1 %v4191_v24  ;;  %v4957_v24 = vld [vmem:[#allocation46_spill] sm:$0xff] }
 0x4ef   : > { %1602 = vmatprep.subr.bf16.mxu1 %v4193_v20  ;;  %v4958_v20 = vld [vmem:[#allocation47_spill] sm:$0xff] }
 0x4f2   : > { %1603 = vmatpush1.bf16.msra.mxu1 %v4200_v5  ;;  %v4956_v5 = vld [vmem:[#allocation45_spill] sm:$0xff] }
 0x4f3   : > { %1629 = vmatprep.subr.bf16.mxu1 %v4915_v14  ;;  %v3263_v14 = vld [vmem:[%s4169_s5 + $0x50] sm:$0xff]  }
 0x4f4   : > { %3001 = vmatpush3.bf16.msra.mxu0 %v3263_v14  ;;  %v4980_v14 = vld [vmem:[#allocation26_spill] sm:$0xff] }
 0x4f5   : > { %1621 = vmatmul.mubr.bf16.vlgmr.msra.gmra.mrb[20].mxu1 %v1386_v57  ;;  %3002 = vmatprep.subr.bf16.mxu0 %v4884_v60 }
 0x4f6   : > { %1630 = vmatpush1.bf16.msra.mxu1 %v4254_v11  ;;  %1661 = vmatprep.mubr.bf16.mxu1 %v4862_v17  ;;  %v4959_v11 = vld [vmem:[#allocation48_spill] sm:$0xff] }
 0x4f7   : > { %1631 = vmatprep.subr.bf16.mxu1 %v4256_v2  ;;  %v4960_v2 = vld [vmem:[#allocation34_spill] sm:$0xff] }
 0x4fa   : > { %1632 = vmatpush1.bf16.msra.mxu1 %v4260_v8  ;;  %v4961_v8 = vld [vmem:[#allocation38_spill] sm:$0xff] }
 0x4fb   : > { %1633 = vmatprep.subr.bf16.mxu1 %v4264_v23  ;;  %v4962_v23 = vld [vmem:[#allocation49_spill] sm:$0xff] }
 0x4fe   : > { %1634 = vmatpush1.bf16.msra.mxu1 %v4267_v30  ;;  %v4963_v30 = vld [vmem:[#allocation50_spill] sm:$0xff] }
 0x4ff   : > { %1635 = vmatprep.subr.bf16.mxu1 %v4270_v33  ;;  %v4964_v33 = vld [vmem:[#allocation51_spill] sm:$0xff] }
 0x502   : > { %1636 = vmatpush1.bf16.msra.mxu1 %v4273_v34  ;;  %v4965_v34 = vld [vmem:[#allocation52_spill] sm:$0xff] }
 0x503   : > { %1637 = vmatprep.subr.bf16.mxu1 %v4276_v18  ;;  %v4966_v18 = vld [vmem:[#allocation53_spill] sm:$0xff] }
 0x506   : > { %1638 = vmatpush1.bf16.msra.mxu1 %v4917_v13  ;;  %v3435_v13 = vld [vmem:[#allocation6 + $0x1c8] ss:$16 sps:$4 sm:$0xff]  }
 0x507   : > { %1639 = vmatprep.subr.bf16.mxu1 %v4918_v62  ;;  %v3436_v62 = vld [vmem:[#allocation6 + $0x1ec] ss:$16 sps:$4 sm:$0xff]  }
 0x50a   : > { %1640 = vmatpush1.bf16.msra.mxu1 %v4919_v63  ;;  %v3264_v63 = vld [vmem:[%s4169_s5 + $0x58] sm:$0xff]  }
 0x50b   : > { %1641 = vmatprep.subr.bf16.mxu1 %v4920_v1  ;;  %v3437_v1 = vld [vmem:[#allocation6 + $0x1e8] ss:$16 sps:$4 sm:$0xff]   ;;  %3003 = vmatpush3.bf16.msra.mxu0 %v3264_v63 }
 0x50c   : > { %v4983_v63 = vld [vmem:[#allocation39_spill] sm:$0xff] }
 0x50e   : > { %1642 = vmatpush1.bf16.msra.mxu1 %v4921_v3  ;;  %v3438_v3 = vld [vmem:[#allocation4 + $0xc] ss:$16 sps:$4 sm:$0xff]  }
 0x50f   : > { %1643 = vmatprep.subr.bf16.mxu1 %v4922_v6  ;;  %v4971_v6 = vld [vmem:[#allocation23_spill] sm:$0xff] }
 0x510   : > { %1711 = vmatprep.subr.bf16.mxu0 %v4971_v6 }
 0x512   : > { %1644 = vmatpush1.bf16.msra.mxu1 %v4923_v7 }
 0x513   : > { %1752 = vmatprep.subr.bf16.mxu1 %v4454_v31 }
 0x515   : > { %1662 = vmatmul.mubr.bf16.vlgmr.msra.gmra.mrb[24].mxu1 %v1386_v57 }
 0x516   : > { %1753 = vmatpush1.bf16.msra.mxu1 %v4458_v38 }
 0x517   : > { %1754 = vmatprep.subr.bf16.mxu1 %v4461_v39 }
 0x51a   : > { %1755 = vmatpush1.bf16.msra.mxu1 %v4464_v42 }
 0x51b   : > { %1756 = vmatprep.subr.bf16.mxu1 %v4467_v43 }
 0x51e   : > { %1757 = vmatpush1.bf16.msra.mxu1 %v4470_v46 }
 0x51f   : > { %1758 = vmatprep.subr.bf16.mxu1 %v4954_v12  ;;  %v1569_v12 = vpop.permute.xlu0 %1568 }
 0x520   : > { %v1573_v6 = vmul.f32 %v1569_v12, %v4889_v26 }
 0x522   : > { %1759 = vmatpush1.bf16.msra.mxu1 %v4955_v4 }
 0x523   : > { %1760 = vmatprep.subr.bf16.mxu1 %v4956_v5  ;;  %v4973_v5 = vld [vmem:[#allocation14_spill] sm:$0xff] }
 0x526   : > { %1761 = vmatpush1.bf16.msra.mxu1 %v4957_v24  ;;  %v1572_v24 = vmul.f32 %v1569_v12, %v4973_v5 }
 0x527   : > { %1762 = vmatprep.subr.bf16.mxu1 %v4958_v20  ;;  %v4974_v20 = vld [vmem:[#allocation18_spill] sm:$0xff] }
 0x52a   : > { %1763 = vmatpush1.bf16.msra.mxu1 %v4959_v11  ;;  %v4975_v11 = vmov %v4974_v20 }
 0x52b   : > { %1764 = vmatprep.subr.bf16.mxu1 %v4960_v2  ;;  %v1581_v2 = vmul.f32 %v1578_v29, %v4974_v20 }
 0x52e   : > { %1765 = vmatpush1.bf16.msra.mxu1 %v4961_v8 }
 0x52f   : > { %1766 = vmatprep.subr.bf16.mxu1 %v4962_v23  ;;  %v4976_v23 = vld [vmem:[#allocation13_spill] sm:$0xff] }
 0x532   : > { %1767 = vmatpush1.bf16.msra.mxu1 %v4963_v30  ;;  %v1571_v30 = vmul.f32 %v1569_v12, %v4976_v23 }
 0x533   : > { %1768 = vmatprep.subr.bf16.mxu1 %v4964_v33  ;;  %v4977_v33 = vld [vmem:[#allocation17_spill] sm:$0xff] }
 0x536   : > { %1769 = vmatpush1.bf16.msra.mxu1 %v4965_v34  ;;  %v1580_v34 = vmul.f32 %v1578_v29, %v4977_v33 }
 0x537   : > { %1770 = vmatprep.subr.bf16.mxu1 %v4966_v18 }
 0x53a   : > { %1771 = vmatpush1.bf16.msra.mxu1 %v4967_v9  ;;  %v1585_v9 = vadd.f32 %v1581_v2, %v1572_v24  ;;  %v3446_v24 = vld [vmem:[#allocation6 + $0x104] ss:$16 sps:$4 sm:$0xff]  }
 0x53b   : > { %1772 = vmatprep.subr.bf16.mxu1 %v4968_v25  ;;  %v1584_v25 = vadd.f32 %v1580_v34, %v1571_v30  ;;  %v3447_v34 = vld [vmem:[#allocation6 + $0x100] ss:$16 sps:$4 sm:$0xff]  }
 0x53e   : > { %1773 = vmatpush1.bf16.msra.mxu1 %v4969_v28 }
 0x53f   : > { %1774 = vmatprep.subr.bf16.mxu1 %v4970_v40 }
 0x542   : > { %1775 = vmatpush1.bf16.msra.mxu1 %v3429_v37 }
 0x543   : > { %1776 = vmatprep.subr.bf16.mxu1 %v3430_v36 }
 0x546   : > { %1777 = vmatpush1.bf16.msra.mxu1 %v3431_v35 }
 0x547   : > { %1778 = vmatprep.subr.bf16.mxu1 %v3432_v44 }
 0x54a   : > { %1779 = vmatpush1.bf16.msra.mxu1 %v3433_v53  ;;  %v4978_v53 = vld [vmem:[#allocation24_spill] sm:$0xff] }
 0x54b   : > { %1780 = vmatprep.subr.bf16.mxu1 %v3434_v56  ;;  %v4979_v56 = vld [vmem:[#allocation25_spill] sm:$0xff] }
 0x54e   : > { %1781 = vmatpush1.bf16.msra.mxu1 %v3435_v13  ;;  %v4981_v13 = vld [vmem:[#allocation27_spill] sm:$0xff] }
 0x54f   : > { %1782 = vmatprep.subr.bf16.mxu1 %v3436_v62  ;;  %v4982_v62 = vld [vmem:[#allocation22_spill] sm:$0xff] }
 0x552   : > { %1783 = vmatpush1.bf16.msra.mxu1 %v3437_v1 }
 0x553   : > { %1953 = vmatprep.subr.bf16.mxu1 %v3438_v3 }
 0x5a8   : > { %v1421_v7 = vpop.f32.mrb[16].mxu1  ;;  %v1462_v31 = vpop.f32.mrb[20].mxu0 }
 0x5a9   : > { %v2819_v38 = vmul.f32 -1.442695, %v1421_v7  ;;  %v1423_v39 = vpop.f32.mrb[17].mxu1  ;;  %v1464_v42 = vpop.f32.mrb[21].mxu0  ;;  %v4984_v7 = vld [vmem:[#allocation19_spill] sm:$0xff] }
 0x5aa   : > { %v2820_v43 = vmul.f32 -1.442695, %v1423_v39  ;;  %v1425_v46 = vpop.f32.mrb[18].mxu1  ;;  %v1466_v27 = vpop.f32.mrb[22].mxu0  ;;  %v2821_v47 = vmul.f32 -1.442695, %v1464_v42  ;;  %v1574_v39 = vmul.f32 %v1569_v12, %v4891_v22  ;;  %v1583_v42 = vmul.f32 %v1578_v29, %v4892_v0 }
 0x5ab   : > { %3333 = vpow2.f32 %v2819_v38  ;;  %v1426_v50 = vpop.f32.mrb[19].mxu1  ;;  %v1467_v51 = vpop.f32.mrb[23].mxu0  ;;  %v4985_v38 = vld [vmem:[#allocation40_spill] sm:$0xff]  ;;  %v4986_v46 = vld [vmem:[#allocation41_spill] sm:$0xff] }
 0x5ac   : > { %3335 = vpow2.f32 %v2820_v43  ;;  %v3445_v12 = vld [vmem:[#allocation6 + $0xe0] ss:$16 sps:$4 sm:$0xff]  }
 0x5ad   : > { %3337 = vpow2.f32 %v2821_v47  ;;  %v3439_v47 = vld [vmem:[#allocation6 + $0x80] ss:$16 sps:$4 sm:$0xff]  }
 0x5ae   : > { %3339 = vtanh.f32 %v1462_v31  ;;  %v1582_v31 = vmul.f32 %v1578_v29, %v4984_v7 }
 0x5b0   : > { %v1586_v50 = vadd.f32 %v1582_v31, %v1573_v6  ;;  %v3463_v6 = vld [vmem:[#allocation4 + $0x4c] ss:$16 sps:$4 sm:$0xff]   ;;  %v3464_v31 = vld [vmem:[#allocation6 + $0x1e4] ss:$16 sps:$4 sm:$0xff]  }
 0x5b5   : > { %v3334_v15 = vpop.eup %3333 }
 0x5b6   : > { %v3336_v19 = vpop.eup %3335  ;;  %v1472_v21 = vadd.f32 1.0, %v3334_v15  ;;  %v1587_v15 = vadd.f32 %v1583_v42, %v1574_v39  ;;  %v3466_v39 = vld [vmem:[#allocation6 + $0x1e0] ss:$16 sps:$4 sm:$0xff]   ;;  %v3467_v42 = vld [vmem:[#allocation4 + $0x6c] ss:$16 sps:$4 sm:$0xff]  }
 0x5b7   : > { %v1478_v49 = vadd.f32 1.0, %v3336_v19  ;;  %v3338_v48 = vpop.eup %3337 }
 0x5b8   : > { %3341 = vrcp.f32 %v1472_v21  ;;  %v3340_v61 = vpop.eup %3339  ;;  %v1485_v45 = vadd.f32 1.0, %v3338_v48 }
 0x5b9   : > { %3343 = vrcp.f32 %v1478_v49  ;;  %v3440_v49 = vld [vmem:[#allocation6 + $0xa4] ss:$16 sps:$4 sm:$0xff]  }
 0x5ba   : > { %3345 = vrcp.f32 %v1485_v45  ;;  %v3442_v45 = vld [vmem:[#allocation6 + $0xc4] ss:$16 sps:$4 sm:$0xff]  }
 0x5c2   : > { %v3342_v10 = vpop.eup %3341 }
 0x5c3   : > { %v3344_v32 = vpop.eup %3343  ;;  %v1489_v16 = vmul.f32 %v3342_v10, %v3340_v61 }
 0x5c4   : > { %v1488_v55 = vmul.f32 %v3344_v32, %v4972_v54  ;;  %v3346_v40 = vpop.eup %3345  ;;  %v3443_v54 = vld [vmem:[#allocation6 + $0xc0] ss:$16 sps:$4 sm:$0xff]  }
 0x5c6   : > { %v4615_v59 = vadd.f32 %v1489_v16, %v1488_v55  ;;  %v3441_v16 = vld [vmem:[#allocation6 + $0xa0] ss:$16 sps:$4 sm:$0xff]   ;;  %v3444_v55 = vld [vmem:[#allocation6 + $0xe4] ss:$16 sps:$4 sm:$0xff]  }
 0x5c8   : > { %3347 = vtanh.f32 %v4615_v59  ;;  %v1622_v57 = vpop.f32.mrb[20].mxu1 }
 0x5c9   : > { %v1624_v4 = vpop.f32.mrb[21].mxu1  ;;  %v1670_v37 = vadd.f32 %v1622_v57, %v1584_v25  ;;  %v3449_v25 = vld [vmem:[#allocation6 + $0x120] ss:$16 sps:$4 sm:$0xff]  }
 0x5ca   : > { %v1626_v8 = vpop.f32.mrb[22].mxu1  ;;  %v1671_v28 = vadd.f32 %v1624_v4, %v1585_v9  ;;  %v3448_v9 = vld [vmem:[#allocation6 + $0x124] ss:$16 sps:$4 sm:$0xff]  }
 0x5cb   : > { %v1627_v18 = vpop.f32.mrb[23].mxu1  ;;  %v2833_v44 = vmul.f32 -1.442695, %v1670_v37  ;;  %v3452_v37 = vld [vmem:[#allocation6 + $0x164] ss:$16 sps:$4 sm:$0xff]  }
 0x5cc   : > { %v2834_v35 = vmul.f32 -1.442695, %v1671_v28  ;;  %v3450_v28 = vld [vmem:[#allocation6 + $0x144] ss:$16 sps:$4 sm:$0xff]  }
 0x5ce   : > { %3349 = vpow2.f32 %v2834_v35  ;;  %v3454_v35 = vld [vmem:[#allocation6 + $0x184] ss:$16 sps:$4 sm:$0xff]  }
 0x5cf   : > { %3351 = vpow2.f32 %v2833_v44 }
 0x5d2   : > { %v3348_v36 = vpop.eup %3347 }
 0x5d3   : > { %v1492_v41 = vmul.f32 %v3348_v36, %v3346_v40  ;;  %v3451_v40 = vld [vmem:[#allocation6 + $0x140] ss:$16 sps:$4 sm:$0xff]  }
 0x5d4   : > { %v3453_v36 = vld [vmem:[#allocation6 + $0x160] ss:$16 sps:$4 sm:$0xff]  }
 0x5d5   : > { %v1493_v52 = vpack.c.bf16 %v1492_v41, %v1492_v41 }
 0x5d7   : > { %3005 = vmatmul.mubr.msk.bf16.vlgmr.msra.gmra.mrb[4].mxu0 %vm676_vm1, %v1493_v52  ;;  %1784 = vmatprep.mubr.bf16.mxu1 %v1493_v52 }
 0x5d8   : > { %1712 = vmatpush1.bf16.msra.mxu0 %v4978_v53  ;;  %1743 = vmatprep.mubr.bf16.mxu0 %v1493_v52  ;;  %v3350_v1 = vpop.eup %3349  ;;  %v3455_v52 = vld [vmem:[#allocation6 + $0x180] ss:$16 sps:$4 sm:$0xff]  }
 0x5d9   : > { %1713 = vmatprep.subr.bf16.mxu0 %v4979_v56  ;;  %v3352_v3 = vpop.eup %3351  ;;  %v1683_v43 = vadd.f32 1.0, %v3350_v1  ;;  %v3456_v56 = vld [vmem:[#allocation6 + $0x1a4] ss:$16 sps:$4 sm:$0xff]   ;;  %v3461_v1 = vld [vmem:[#allocation4 + $0x28] ss:$16 sps:$4 sm:$0xff]  }
 0x5da   : > { %v1677_v27 = vadd.f32 1.0, %v3352_v3  ;;  %v3462_v3 = vld [vmem:[#allocation6 + $0x1c0] ss:$16 sps:$4 sm:$0xff]  }
 0x5db   : > { %3353 = vrcp.f32 %v1683_v43  ;;  %v3468_v43 = vld [vmem:[#allocation4 + $0x68] ss:$16 sps:$4 sm:$0xff]  }
 0x5dc   : > { %1714 = vmatpush1.bf16.msra.mxu0 %v4980_v14  ;;  %3355 = vrcp.f32 %v1677_v27  ;;  %v3457_v14 = vld [vmem:[#allocation4 + $0x8] ss:$16 sps:$4 sm:$0xff]  }
 0x5dd   : > { %1715 = vmatprep.subr.bf16.mxu0 %v4981_v13  ;;  %v3458_v13 = vld [vmem:[#allocation6 + $0x1a0] ss:$16 sps:$4 sm:$0xff]   ;;  %v3470_v27 = vld [vmem:[#allocation4 + $0x88] ss:$16 sps:$4 sm:$0xff]  }
 0x5e0   : > { %1716 = vmatpush1.bf16.msra.mxu0 %v4982_v62  ;;  %v3459_v62 = vld [vmem:[#allocation4 + $0x2c] ss:$16 sps:$4 sm:$0xff]  }
 0x5e1   : > { %1717 = vmatprep.subr.bf16.mxu0 %v4983_v63  ;;  %v3460_v63 = vld [vmem:[#allocation6 + $0x1c4] ss:$16 sps:$4 sm:$0xff]  }
 0x5e4   : > { %1718 = vmatpush1.bf16.msra.mxu0 %v4985_v38  ;;  %v3465_v38 = vld [vmem:[#allocation4 + $0x48] ss:$16 sps:$4 sm:$0xff]  }
 0x5e5   : > { %1719 = vmatprep.subr.bf16.mxu0 %v4986_v46  ;;  %v3354_v29 = vpop.eup %3353  ;;  %v3469_v46 = vld [vmem:[#allocation4 + $0x8c] ss:$16 sps:$4 sm:$0xff]  }
 0x5e6   : > { %v3356_v57 = vpop.eup %3355  ;;  %v1693_v20 = vmul.f32 %v3354_v29, %v4545_v58 }
 0x5e8   : > { %v1663_v51 = vpop.f32.mrb[24].mxu1  ;;  %1720 = vmatpush1.bf16.msra.mxu0 %v3439_v47  ;;  %v3473_v47 = vld [vmem:[#allocation4 + $0xcc] ss:$16 sps:$4 sm:$0xff]  }
 0x5e9   : > { %v1672_v19 = vadd.f32 %v1663_v51, %v1586_v50  ;;  %v1665_v21 = vpop.f32.mrb[25].mxu1  ;;  %1721 = vmatprep.subr.bf16.mxu0 %v3440_v49  ;;  %v3471_v50 = vld [vmem:[#allocation4 + $0xac] ss:$16 sps:$4 sm:$0xff]   ;;  %v3472_v51 = vld [vmem:[#allocation4 + $0xa8] ss:$16 sps:$4 sm:$0xff]  }
 0x5ea   : > { %v1673_v48 = vadd.f32 %v1665_v21, %v1587_v15  ;;  %v1667_v61 = vpop.f32.mrb[26].mxu1  ;;  %v3474_v15 = vld [vmem:[#allocation4 + $0xc8] ss:$16 sps:$4 sm:$0xff]  }
 0x5eb   : > { %3357 = vtanh.f32 %v1672_v19  ;;  %v1668_v10 = vpop.f32.mrb[27].mxu1  ;;  %v3475_v19 = vld [vmem:[#allocation4 + $0xec] ss:$16 sps:$4 sm:$0xff]   ;;  %v3476_v21 = vld [vmem:[#allocation4 + $0xe8] ss:$16 sps:$4 sm:$0xff]  }
 0x5ec   : > { %v2835_v32 = vmul.f32 -1.442695, %v1673_v48  ;;  %1722 = vmatpush1.bf16.msra.mxu0 %v3441_v16  ;;  %v3265_v49 = vld [vmem:[%s4169_s5 + $0x60] sm:$0xff]   ;;  %v3266_v48 = vld [vmem:[%s4169_s5 + $0x68] sm:$0xff]   ;;  %v3267_v61 = vld [vmem:[%s4169_s5 + $0x70] sm:$0xff]  }
 0x5ed   : > { %1723 = vmatprep.subr.bf16.mxu0 %v3442_v45  ;;  %v3268_v10 = vld [vmem:[%s4169_s5 + $0x78] sm:$0xff]  }
 0x5ee   : > { %3359 = vpow2.f32 %v2835_v32  ;;  %v3477_v32 = vld [vmem:[#allocation4 + $0x4] ss:$16 sps:$4 sm:$0xff]  }
 0x5f0   : > { %1724 = vmatpush1.bf16.msra.mxu0 %v3443_v54 }
 0x5f1   : > { %1725 = vmatprep.subr.bf16.mxu0 %v3444_v55 }
 0x5f4   : > { %1726 = vmatpush1.bf16.msra.mxu0 %v3445_v12 }
 0x5f5   : > { %v3358_v4 = vpop.eup %3357  ;;  %1727 = vmatprep.subr.bf16.mxu0 %v3446_v24 }
 0x5f6   : > { %v1694_v2 = vmul.f32 %v3358_v4, %v3356_v57 }
 0x5f8   : > { %v3360_v8 = vpop.eup %3359  ;;  %v4636_v30 = vadd.f32 %v1694_v2, %v1693_v20  ;;  %1728 = vmatpush1.bf16.msra.mxu0 %v3447_v34 }
 0x5f9   : > { %v1690_v18 = vadd.f32 1.0, %v3360_v8  ;;  %1729 = vmatprep.subr.bf16.mxu0 %v3448_v9 }
 0x5fa   : > { %3361 = vtanh.f32 %v4636_v30 }
 0x5fb   : > { %3363 = vrcp.f32 %v1690_v18 }
 0x5fc   : > { %1730 = vmatpush1.bf16.msra.mxu0 %v3449_v25 }
 0x5fd   : > { %1731 = vmatprep.subr.bf16.mxu0 %v3450_v28 }
 0x600   : > { %1732 = vmatpush1.bf16.msra.mxu0 %v3451_v40 }
 0x601   : > { %1733 = vmatprep.subr.bf16.mxu0 %v3452_v37 }
 0x604   : > { %v3362_v58 = vpop.eup %3361  ;;  %1734 = vmatpush1.bf16.msra.mxu0 %v3453_v36 }
 0x605   : > { %v3364_v41 = vpop.eup %3363  ;;  %1735 = vmatprep.subr.bf16.mxu0 %v3454_v35 }
 0x606   : > { %v1697_v44 = vmul.f32 %v3364_v41, %v3362_v58 }
 0x608   : > { %1736 = vmatpush1.bf16.msra.mxu0 %v3455_v52  ;;  %v4639_v53 = vpack.c.bf16 %v1697_v44, %v1697_v44 }
 0x609   : > { %1737 = vmatprep.subr.bf16.mxu0 %v3456_v56 }
 0x60a   : > { %1785 = vmatmul.mubr.bf16.vlgmr.msra.gmra.mrb[28].mxu1 %v4639_v53 }
 0x60b   : > { %1954 = vmatpush1.bf16.msra.mxu1 %v3457_v14  ;;  %1985 = vmatprep.mubr.bf16.mxu1 %v4862_v17 }
 0x60c   : > { %1738 = vmatpush1.bf16.msra.mxu0 %v3458_v13  ;;  %1955 = vmatprep.subr.bf16.mxu1 %v3459_v62 }
 0x60d   : > { %1739 = vmatprep.subr.bf16.mxu0 %v3460_v63  ;;  %v3478_v63 = vld [vmem:[#allocation4] ss:$16 sps:$4 sm:$0xff]  }
 0x60f   : > { %1956 = vmatpush1.bf16.msra.mxu1 %v3461_v1  ;;  %v3480_v1 = vld [vmem:[#allocation4 + $0x20] ss:$16 sps:$4 sm:$0xff]  }
 0x610   : > { %1740 = vmatpush1.bf16.msra.mxu0 %v3462_v3  ;;  %1957 = vmatprep.subr.bf16.mxu1 %v3463_v6  ;;  %v3481_v3 = vld [vmem:[#allocation4 + $0x44] ss:$16 sps:$4 sm:$0xff]   ;;  %v3482_v6 = vld [vmem:[#allocation4 + $0x40] ss:$16 sps:$4 sm:$0xff]  }
 0x611   : > { %1741 = vmatprep.subr.bf16.mxu0 %v3464_v31  ;;  %v3483_v31 = vld [vmem:[#allocation4 + $0x64] ss:$16 sps:$4 sm:$0xff]  }
 0x613   : > { %1958 = vmatpush1.bf16.msra.mxu1 %v3465_v38  ;;  %v3484_v38 = vld [vmem:[#allocation4 + $0x60] ss:$16 sps:$4 sm:$0xff]  }
 0x614   : > { %1742 = vmatpush1.bf16.msra.mxu0 %v3466_v39  ;;  %1959 = vmatprep.subr.bf16.mxu1 %v3467_v42  ;;  %v3485_v39 = vld [vmem:[#allocation4 + $0x84] ss:$16 sps:$4 sm:$0xff]   ;;  %v3486_v42 = vld [vmem:[#allocation4 + $0x80] ss:$16 sps:$4 sm:$0xff]  }
 0x615   : > { %3008 = vmatprep.subr.bf16.mxu0 %v4884_v60 }
 0x617   : > { %1960 = vmatpush1.bf16.msra.mxu1 %v3468_v43  ;;  %1744 = vmatmul.mubr.bf16.vlgmr.msra.gmra.mrb[24].mxu0 %v4639_v53  ;;  %v3487_v43 = vld [vmem:[#allocation4 + $0xa4] ss:$16 sps:$4 sm:$0xff]  }
 0x618   : > { %1961 = vmatprep.subr.bf16.mxu1 %v3469_v46  ;;  %3016 = vmatprep.mubr.msk.bf16.mxu0 %vm3784_vm0, %v4884_v60  ;;  %v3488_v46 = vld [vmem:[#allocation4 + $0xa0] ss:$16 sps:$4 sm:$0xff]  }
 0x619   : > { %3009 = vmatpush3.bf16.msra.mxu0 %v3265_v49 }
 0x61a   : > { %3010 = vmatprep.subr.bf16.mxu0 %v4884_v60 }
 0x61b   : > { %1962 = vmatpush1.bf16.msra.mxu1 %v3470_v27  ;;  %v3490_v27 = vld [vmem:[#allocation4 + $0xc0] ss:$16 sps:$4 sm:$0xff]  }
 0x61c   : > { %1963 = vmatprep.subr.bf16.mxu1 %v3471_v50  ;;  %v3491_v50 = vld [vmem:[#allocation4 + $0xe4] ss:$16 sps:$4 sm:$0xff]  }
 0x61d   : > { %3011 = vmatpush3.bf16.msra.mxu0 %v3266_v48 }
 0x61e   : > { %3012 = vmatprep.subr.bf16.mxu0 %v4884_v60 }
 0x61f   : > { %1964 = vmatpush1.bf16.msra.mxu1 %v3472_v51  ;;  %v3492_v51 = vld [vmem:[#allocation4 + $0xe0] ss:$16 sps:$4 sm:$0xff]  }
 0x620   : > { %1965 = vmatprep.subr.bf16.mxu1 %v3473_v47 }
 0x621   : > { %3013 = vmatpush3.bf16.msra.mxu0 %v3267_v61  ;;  %v1902_v61 = vpop.permute.xlu1 %1901 }
 0x622   : > { %3014 = vmatprep.subr.bf16.mxu0 %v4884_v60 }
 0x623   : > { %1966 = vmatpush1.bf16.msra.mxu1 %v3474_v15  ;;  %v4987_v15 = vld [vmem:[#allocation21_spill] sm:$0xff] }
 0x624   : > { %1967 = vmatprep.subr.bf16.mxu1 %v3475_v19 }
 0x625   : > { %3015 = vmatpush3.bf16.msra.mxu0 %v3268_v10  ;;  %v1893_v10 = vpop.permute.xlu0 %1892 }
 0x626   : > { %1912 = vmatprep.subr.bf16.mxu0 %v3477_v32  ;;  %v1904_v32 = vmul.f32 %v1902_v61, %v4977_v33  ;;  %v3522_v33 = vld [vmem:[#allocation6 + $0x6c] ss:$16 sps:$4 sm:$0xff] (%p138_p12)  }
 0x627   : > { %1968 = vmatpush1.bf16.msra.mxu1 %v3476_v21 }
 0x62a   : > { %1986 = vmatmul.mubr.bf16.vlgmr.msra.gmra.mrb[32].mxu1 %v4639_v53 }
 0x6dd   : > { %v1786_v16 = vpop.f32.mrb[28].mxu1 }
 0x6de   : > { %v1788_v45 = vpop.f32.mrb[29].mxu1 }
 0x6df   : > { %v1790_v54 = vpop.f32.mrb[30].mxu1  ;;  %v2848_v2 = vmul.f32 -1.442695, %v1788_v45  ;;  %v1895_v45 = vmul.f32 %v1893_v10, %v4976_v23  ;;  %v3519_v23 = vld [vmem:[#allocation6 + $0x48] ss:$16 sps:$4 sm:$0xff] (%p138_p12)  }
 0x6e0   : > { %v1791_v55 = vpop.f32.mrb[31].mxu1  ;;  %v1905_v54 = vmul.f32 %v1902_v61, %v4975_v11  ;;  %v3516_v11 = vld [vmem:[#allocation6 + $0x4c] ss:$16 sps:$4 sm:$0xff] (%p138_p12)  }
 0x6e1   : > { %v1896_v55 = vmul.f32 %v1893_v10, %v4973_v5  ;;  %v3508_v5 = vld [vmem:[#allocation6 + $0x84] ss:$16 sps:$4 sm:$0xff] (%p138_p12)  }
 0x6ea   : > { %v1745_v29 = vpop.f32.mrb[24].mxu0 }
 0x6eb   : > { %v2846_v57 = vmul.f32 -1.442695, %v1745_v29  ;;  %v1747_v12 = vpop.f32.mrb[25].mxu0  ;;  %v1908_v29 = vadd.f32 %v1904_v32, %v1895_v45  ;;  %v3526_v32 = vld [vmem:[#allocation6 + $0xe4] ss:$16 sps:$4 sm:$0xff] (%p138_p12)  }
 0x6ec   : > { %v2847_v4 = vmul.f32 -1.442695, %v1747_v12  ;;  %v1749_v24 = vpop.f32.mrb[26].mxu0  ;;  %v3537_v45 = vld [vmem:[#allocation6 + $0xa8] ss:$16 sps:$4 sm:$0xff] (%p138_p12)  }
 0x6ed   : > { %3365 = vpow2.f32 %v2846_v57  ;;  %v1750_v20 = vpop.f32.mrb[27].mxu0  ;;  %v1898_v24 = vmul.f32 %v1893_v10, %v4891_v22  ;;  %v3513_v22 = vld [vmem:[#allocation6 + $0x28] ss:$16 sps:$4 sm:$0xff] (%p138_p12)  }
 0x6ee   : > { %3367 = vpow2.f32 %v2847_v4 }
 0x6ef   : > { %3369 = vtanh.f32 %v1786_v16 }
 0x6f0   : > { %3371 = vpow2.f32 %v2848_v2 }
 0x6f7   : > { %v3366_v8 = vpop.eup %3365 }
 0x6f8   : > { %v1796_v34 = vadd.f32 1.0, %v3366_v8  ;;  %v3368_v60 = vpop.eup %3367 }
 0x6f9   : > { %v1802_v18 = vadd.f32 1.0, %v3368_v60  ;;  %v3370_v37 = vpop.eup %3369 }
 0x6fa   : > { %3373 = vrcp.f32 %v1796_v34  ;;  %v3372_v58 = vpop.eup %3371 }
 0x6fb   : > { %3375 = vrcp.f32 %v1802_v18  ;;  %v1809_v44 = vadd.f32 1.0, %v3372_v58 }
 0x6fd   : > { %v4655_v9 = vpop.f32.mrb[32].mxu1  ;;  %3377 = vrcp.f32 %v1809_v44 }
 0x6fe   : > { %v4657_v25 = vpop.f32.mrb[33].mxu1 }
 0x6ff   : > { %v1991_v28 = vpop.f32.mrb[34].mxu1 }
 0x700   : > { %v1992_v40 = vpop.f32.mrb[35].mxu1 }
 0x701   : > { %v1906_v40 = vmul.f32 %v1902_v61, %v4984_v7  ;;  %v3512_v7 = vld [vmem:[#allocation6 + $0x80] ss:$16 sps:$4 sm:$0xff] (%p138_p12)  }
 0x704   : > { %v3374_v36 = vpop.eup %3373 }
 0x705   : > { %v1813_v41 = vmul.f32 %v3374_v36, %v3370_v37  ;;  %v3376_v35 = vpop.eup %3375  ;;  %v1897_v37 = vmul.f32 %v1893_v10, %v4889_v26  ;;  %v3506_v26 = vld [vmem:[#allocation6 + $0x60] ss:$16 sps:$4 sm:$0xff] (%p138_p12)  }
 0x706   : > { %v1812_v52 = vmul.f32 %v3376_v35, %v4615_v59  ;;  %v3479_v59 = vld [vmem:[#allocation4 + $0x24] ss:$16 sps:$4 sm:$0xff]   ;;  %v3524_v10 = vld [vmem:[#allocation6 + $0xc0] ss:$16 sps:$4 sm:$0xff] (%p138_p12)  }
 0x707   : > { %v3378_v14 = vpop.eup %3377  ;;  %v1910_v36 = vadd.f32 %v1906_v40, %v1897_v37  ;;  %v3561_v40 = vld [vmem:[#allocation6 + $0x128] ss:$16 sps:$4 sm:$0xff] (%p138_p12)   ;;  %v3554_v37 = vld [vmem:[#allocation6 + $0x160] ss:$16 sps:$4 sm:$0xff] (%p138_p12)  }
 0x708   : > { %v4660_v56 = vadd.f32 %v1813_v41, %v1812_v52  }
 0x709   : > { %v1996_v35 = vadd.f32 %v4655_v9, %v1910_v36  ;;  %v3556_v36 = vld [vmem:[#allocation6 + $0x184] ss:$16 sps:$4 sm:$0xff] (%p138_p12)  }
 0x70a   : > { %3379 = vtanh.f32 %v4660_v56 }
 0x714   : > { %v3380_v13 = vpop.eup %3379 }
 0x715   : > { %v4663_v18 = vmul.f32 %v3380_v13, %v3378_v14  }
 0x717   : > { %v4667_v62 = vpack.c.bf16 %v4663_v18, %v4663_v18  ;;  %v3514_v18 = vld [vmem:[#allocation6 + $0xa4] ss:$16 sps:$4 sm:$0xff] (%p138_p12)  }
 0x719   : > { %3017 = vmatmul.mubr.msk.bf16.vlgmr.msra.gmra.mrb[4].mxu0 %vm676_vm1, %v4667_v62  ;;  %2490 = vmatprep.mubr.bf16.mxu1 (%p138_p12), %v4667_v62 }
 0x71a   : > { %1913 = vmatpush1.bf16.msra.mxu0 %v3478_v63  ;;  %1944 = vmatprep.mubr.bf16.mxu0 %v4862_v17  ;;  %v3489_v17 = vld [vmem:[#allocation4 + $0xc4] ss:$16 sps:$4 sm:$0xff]  }
 0x71b   : > { %1914 = vmatprep.subr.bf16.mxu0 %v3479_v59 }
 0x71e   : > { %1915 = vmatpush1.bf16.msra.mxu0 %v3480_v1 }
 0x71f   : > { %1916 = vmatprep.subr.bf16.mxu0 %v3481_v3 }
 0x722   : > { %1917 = vmatpush1.bf16.msra.mxu0 %v3482_v6 }
 0x723   : > { %1918 = vmatprep.subr.bf16.mxu0 %v3483_v31 }
 0x726   : > { %1919 = vmatpush1.bf16.msra.mxu0 %v3484_v38 }
 0x727   : > { %1920 = vmatprep.subr.bf16.mxu0 %v3485_v39 }
 0x72a   : > { %1921 = vmatpush1.bf16.msra.mxu0 %v3486_v42  ;;  %v3495_v42 = vld [vmem:[#allocation6] ss:$16 sps:$4 sm:$0xff] (%p138_p12)  }
 0x72b   : > { %1922 = vmatprep.subr.bf16.mxu0 %v3487_v43  ;;  %v3496_v43 = vld [vmem:[#allocation6 + $0x24] ss:$16 sps:$4 sm:$0xff] (%p138_p12)  }
 0x72e   : > { %1923 = vmatpush1.bf16.msra.mxu0 %v3488_v46  ;;  %v3498_v46 = vld [vmem:[#allocation6 + $0x20] ss:$16 sps:$4 sm:$0xff] (%p138_p12)  }
 0x72f   : > { %1924 = vmatprep.subr.bf16.mxu0 %v3489_v17  ;;  %v4991_v17 = vmov %v4660_v56 }
 0x730   :  { %v3528_v17 = vld [vmem:[#allocation6 + $0x8c] ss:$16 sps:$4 sm:$0xff] (%p138_p12)  }
 0x732   : > { %1925 = vmatpush1.bf16.msra.mxu0 %v3490_v27  ;;  %v3499_v27 = vld [vmem:[#allocation6 + $0x44] ss:$16 sps:$4 sm:$0xff] (%p138_p12)  }
 0x733   : > { %1926 = vmatprep.subr.bf16.mxu0 %v3491_v50  ;;  %v3504_v50 = vld [vmem:[#allocation6 + $0xc] ss:$16 sps:$4 sm:$0xff] (%p138_p12)  }
 0x734   :  { %2458 = vmatprep.subr.bf16.mxu1 (%p138_p12), %v3504_v50  ;;  %v3785_v50 = vmov (%p138_p12), 0.0  }
 0x736   : > { %1927 = vmatpush1.bf16.msra.mxu0 %v3492_v51  ;;  %v3507_v51 = vld [vmem:[#allocation6 + $0x8] ss:$16 sps:$4 sm:$0xff] (%p138_p12)  }
 0x737   :  { %2459 = vmatpush1.bf16.msra.mxu1 (%p138_p12), %v3507_v51  ;;  %v3590_v51 = vld [vmem:[#allocation7 + $0x1008] sm:$0xff] (%p138_p12)  }
 0x739   : > { %1945 = vmatmul.mubr.bf16.vlgmr.msra.gmra.mrb[28].mxu0 %v4639_v53  ;;  %v1909_v53 = vadd.f32 %v1905_v54, %v1896_v55  ;;  %v3540_v54 = vld [vmem:[#allocation6 + $0xcc] ss:$16 sps:$4 sm:$0xff] (%p138_p12)   ;;  %v3530_v55 = vld [vmem:[#allocation6 + $0xe0] ss:$16 sps:$4 sm:$0xff] (%p138_p12)  }
 0x73a   :  { %2449 = vmatprep.mubr.bf16.mxu0 (%p138_p12), %v4667_v62  ;;  %v3525_v62 = vld [vmem:[#allocation6 + $0x68] ss:$16 sps:$4 sm:$0xff] (%p138_p12)  }
 0x7ec   : > { %v1879_v47 = vpop.f32.mrb[4].mxu0 }
 0x7ed   : > { %v4674_v16 = vadd.f32 %v4987_v15, %v1879_v47   ;;  %v3018_v19 = vpop.f32.mrb[5].mxu0  ;;  %v3501_v47 = vld [vmem:[#allocation6 + $0x40] ss:$16 sps:$4 sm:$0xff] (%p138_p12)   ;;  %v3502_v15 = vld [vmem:[#allocation6 + $0x64] ss:$16 sps:$4 sm:$0xff] (%p138_p12)  }
 0x7ee   : > { %v1882_v49 = vpop.f32.mrb[6].mxu0 }
 0x7ef   : > { %v4988_v21 = vmov %v4674_v16  ;;  %v3019_v48 = vpop.f32.mrb[7].mxu0  ;;  %v1907_v16 = vmul.f32 %v1902_v61, %v4892_v0  ;;  %v3510_v0 = vld [vmem:[#allocation6 + $0x2c] ss:$16 sps:$4 sm:$0xff] (%p138_p12)   ;;  %v3520_v49 = vld [vmem:[#allocation6 + $0xc4] ss:$16 sps:$4 sm:$0xff] (%p138_p12)  }
 0x7f0   :  { %2460 = vmatprep.subr.bf16.mxu1 (%p138_p12), %v3510_v0  ;;  %v3531_v48 = vld [vmem:[#allocation6 + $0x88] ss:$16 sps:$4 sm:$0xff] (%p138_p12)   ;;  %v3534_v61 = vld [vmem:[#allocation6 + $0xac] ss:$16 sps:$4 sm:$0xff] (%p138_p12)  }
 0x7f1   : > { %v1911_v28 = vadd.f32 %v1907_v16, %v1898_v24  ;;  %v4990_v16 = vmov %v4988_v21  ;;  %2461 = vmatpush1.bf16.msra.mxu1 (%p138_p12), %v3513_v22  ;;  %v3552_v24 = vld [vmem:[#allocation6 + $0x10c] ss:$16 sps:$4 sm:$0xff] (%p138_p12)  }
 0x7f2   :  { %2462 = vmatprep.subr.bf16.mxu1 (%p138_p12), %v3516_v11  ;;  %v3549_v16 = vld [vmem:[#allocation6 + $0xe8] ss:$16 sps:$4 sm:$0xff] (%p138_p12)  }
 0x7f3   : > { %v1997_v58 = vadd.f32 %v4657_v25, %v1911_v28  ;;  %v3550_v28 = vld [vmem:[#allocation6 + $0x164] ss:$16 sps:$4 sm:$0xff] (%p138_p12)  }
 0x7f5   : > { %v2862_v41 = vmul.f32 -1.442695, %v1997_v58  ;;  %2463 = vmatpush1.bf16.msra.mxu1 (%p138_p12), %v3519_v23  ;;  %v3564_v58 = vld [vmem:[#allocation6 + $0x14c] ss:$16 sps:$4 sm:$0xff] (%p138_p12)  }
 0x7f6   :  { %2464 = vmatprep.subr.bf16.mxu1 (%p138_p12), %v3522_v33 }
 0x7f9   :  { %2465 = vmatpush1.bf16.msra.mxu1 (%p138_p12), %v3525_v62 }
 0x7fa   :  { %2466 = vmatprep.subr.bf16.mxu1 (%p138_p12), %v3528_v17 }
 0x7fd   :  { %2467 = vmatpush1.bf16.msra.mxu1 (%p138_p12), %v3531_v48 }
 0x7fe   :  { %2468 = vmatprep.subr.bf16.mxu1 (%p138_p12), %v3534_v61 }
 0x801   :  { %2469 = vmatpush1.bf16.msra.mxu1 (%p138_p12), %v3537_v45 }
 0x802   :  { %2470 = vmatprep.subr.bf16.mxu1 (%p138_p12), %v3540_v54 }
 0x80c   : > { %v1946_v57 = vpop.f32.mrb[28].mxu0 }
 0x80d   : > { %v1994_v12 = vadd.f32 %v1946_v57, %v1908_v29  ;;  %v1948_v4 = vpop.f32.mrb[29].mxu0  ;;  %v3532_v29 = vld [vmem:[#allocation6 + $0x104] ss:$16 sps:$4 sm:$0xff] (%p138_p12)   ;;  %v3543_v57 = vld [vmem:[#allocation6 + $0xc8] ss:$16 sps:$4 sm:$0xff] (%p138_p12)  }
 0x80e   : > { %v1995_v20 = vadd.f32 %v1948_v4, %v1909_v53  ;;  %v1950_v2 = vpop.f32.mrb[30].mxu0  ;;  %v3546_v53 = vld [vmem:[#allocation6 + $0xec] ss:$16 sps:$4 sm:$0xff] (%p138_p12)   ;;  %v3538_v4 = vld [vmem:[#allocation6 + $0x124] ss:$16 sps:$4 sm:$0xff] (%p138_p12)   ;;  %2471 = vmatpush1.bf16.msra.mxu1 (%p138_p12), %v3543_v57 }
 0x80f   : > { %v2860_v8 = vmul.f32 -1.442695, %v1994_v12  ;;  %v1951_v34 = vpop.f32.mrb[31].mxu0  ;;  %v3536_v12 = vld [vmem:[#allocation6 + $0x100] ss:$16 sps:$4 sm:$0xff] (%p138_p12)   ;;  %2472 = vmatprep.subr.bf16.mxu1 (%p138_p12), %v3546_v53 }
 0x810   : > { %v2861_v60 = vmul.f32 -1.442695, %v1995_v20  ;;  %v3544_v2 = vld [vmem:[#allocation6 + $0x144] ss:$16 sps:$4 sm:$0xff] (%p138_p12)   ;;  %v3558_v34 = vld [vmem:[#allocation6 + $0x12c] ss:$16 sps:$4 sm:$0xff] (%p138_p12)  }
 0x811   : > { %3381 = vpow2.f32 %v2860_v8  ;;  %v3555_v8 = vld [vmem:[#allocation6 + $0x108] ss:$16 sps:$4 sm:$0xff] (%p138_p12)  }
 0x812   : > { %3383 = vpow2.f32 %v2861_v60  ;;  %2473 = vmatpush1.bf16.msra.mxu1 (%p138_p12), %v3549_v16  ;;  %v3548_v60 = vld [vmem:[#allocation6 + $0x140] ss:$16 sps:$4 sm:$0xff] (%p138_p12)  }
 0x813   : > { %3385 = vpow2.f32 %v2862_v41  ;;  %2474 = vmatprep.subr.bf16.mxu1 (%p138_p12), %v3552_v24  ;;  %v3567_v41 = vld [vmem:[#allocation6 + $0x148] ss:$16 sps:$4 sm:$0xff] (%p138_p12)  }
 0x814   : > { %3387 = vtanh.f32 %v1996_v35  ;;  %v3570_v35 = vld [vmem:[#allocation6 + $0x16c] ss:$16 sps:$4 sm:$0xff] (%p138_p12)  }
 0x816   :  { %2475 = vmatpush1.bf16.msra.mxu1 (%p138_p12), %v3555_v8 }
 0x817   :  { %2476 = vmatprep.subr.bf16.mxu1 (%p138_p12), %v3558_v34 }
 0x81a   :  { %2477 = vmatpush1.bf16.msra.mxu1 (%p138_p12), %v3561_v40 }
 0x81b   : > { %v3382_v44 = vpop.eup %3381  ;;  %2478 = vmatprep.subr.bf16.mxu1 (%p138_p12), %v3564_v58 }
 0x81c   : > { %v3384_v52 = vpop.eup %3383  ;;  %v2001_v14 = vadd.f32 1.0, %v3382_v44  ;;  %v3560_v44 = vld [vmem:[#allocation6 + $0x180] ss:$16 sps:$4 sm:$0xff] (%p138_p12)  }
 0x81d   : > { %v2007_v13 = vadd.f32 1.0, %v3384_v52  ;;  %v3386_v63 = vpop.eup %3385  ;;  %v3562_v52 = vld [vmem:[#allocation6 + $0x1a4] ss:$16 sps:$4 sm:$0xff] (%p138_p12)  }
 0x81e   : > { %3389 = vrcp.f32 %v2001_v14  ;;  %v3388_v59 = vpop.eup %3387  ;;  %v2014_v6 = vadd.f32 1.0, %v3386_v63  ;;  %2479 = vmatpush1.bf16.msra.mxu1 (%p138_p12), %v3567_v41  ;;  %v3573_v14 = vld [vmem:[#allocation6 + $0x168] ss:$16 sps:$4 sm:$0xff] (%p138_p12)   ;;  %v3566_v63 = vld [vmem:[#allocation6 + $0x1a0] ss:$16 sps:$4 sm:$0xff] (%p138_p12)  }
 0x81f   : > { %3391 = vrcp.f32 %v2007_v13  ;;  %2480 = vmatprep.subr.bf16.mxu1 (%p138_p12), %v3570_v35  ;;  %v3576_v13 = vld [vmem:[#allocation6 + $0x18c] ss:$16 sps:$4 sm:$0xff] (%p138_p12)  }
 0x820   : > { %3393 = vrcp.f32 %v2014_v6  ;;  %v3572_v6 = vld [vmem:[#allocation6 + $0x1c0] ss:$16 sps:$4 sm:$0xff] (%p138_p12)  }
 0x822   :  { %2481 = vmatpush1.bf16.msra.mxu1 (%p138_p12), %v3573_v14 }
 0x823   :  { %2482 = vmatprep.subr.bf16.mxu1 (%p138_p12), %v3576_v13 }
 0x828   : > { %v3390_v1 = vpop.eup %3389 }
 0x829   : > { %v3392_v3 = vpop.eup %3391  ;;  %v2018_v31 = vmul.f32 %v3390_v1, %v3388_v59  ;;  %v3568_v59 = vld [vmem:[#allocation6 + $0x1c4] ss:$16 sps:$4 sm:$0xff] (%p138_p12)   ;;  %v3579_v1 = vld [vmem:[#allocation6 + $0x188] ss:$16 sps:$4 sm:$0xff] (%p138_p12)  }
 0x82a   : > { %v2017_v25 = vmul.f32 %v3392_v3, %v4636_v30  ;;  %v3394_v9 = vpop.eup %3393  ;;  %v3493_v30 = vld [vmem:[#allocation6 + $0x4] ss:$16 sps:$4 sm:$0xff] (%p138_p12)   ;;  %v3580_v3 = vld [vmem:[#allocation6 + $0x1ac] ss:$16 sps:$4 sm:$0xff] (%p138_p12)   ;;  %2483 = vmatpush1.bf16.msra.mxu1 (%p138_p12), %v3579_v1 }
 0x82b   :  { %2417 = vmatprep.subr.bf16.mxu0 (%p138_p12), %v3493_v30  ;;  %2484 = vmatprep.subr.bf16.mxu1 (%p138_p12), %v3580_v3  ;;  %v3585_v30 = vld [vmem:[#allocation6 + $0x1c8] ss:$16 sps:$4 sm:$0xff] (%p138_p12)  }
 0x82c   : > { %v2019_v19 = vadd.f32 %v2018_v31, %v2017_v25   ;;  %2418 = vmatpush1.bf16.msra.mxu0 (%p138_p12), %v3495_v42  ;;  %v3574_v31 = vld [vmem:[#allocation6 + $0x1e4] ss:$16 sps:$4 sm:$0xff] (%p138_p12)   ;;  %v3582_v25 = vld [vmem:[#allocation6 + $0x1a8] ss:$16 sps:$4 sm:$0xff] (%p138_p12)   ;;  %v3586_v42 = vld [vmem:[#allocation6 + $0x1ec] ss:$16 sps:$4 sm:$0xff] (%p138_p12)  }
 0x82d   :  { %2419 = vmatprep.subr.bf16.mxu0 (%p138_p12), %v3496_v43 }
 0x82e   : > { %3395 = vtanh.f32 %v2019_v19  ;;  %v3518_v19 = vld [vmem:[#allocation6 + $0xa0] ss:$16 sps:$4 sm:$0xff] (%p138_p12)   ;;  %2485 = vmatpush1.bf16.msra.mxu1 (%p138_p12), %v3582_v25 }
 0x830   :  { %2420 = vmatpush1.bf16.msra.mxu0 (%p138_p12), %v3498_v46  ;;  %v3588_v46 = vld [vmem:[#allocation6 + $0x1e8] ss:$16 sps:$4 sm:$0xff] (%p138_p12)  }
 0x831   :  { %2421 = vmatprep.subr.bf16.mxu0 (%p138_p12), %v3499_v27  ;;  %v3589_v27 = vld [vmem:[#allocation7 + $0x1000] sm:$0xff] (%p138_p12)  }
 0x834   :  { %2422 = vmatpush1.bf16.msra.mxu0 (%p138_p12), %v3501_v47  ;;  %v3591_v47 = vld [vmem:[#allocation7 + $0x1010] sm:$0xff] (%p138_p12)  }
 0x835   :  { %2423 = vmatprep.subr.bf16.mxu0 (%p138_p12), %v3502_v15 }
 0x836   :  { %140 = sbr.rel (!%p138_p12) target bundleno = 102 (0x66), region = 89 }
 0x838   : > { %v3396_v38 = vpop.eup %3395  ;;  %2424 = vmatpush1.bf16.msra.mxu0 (%p138_p12), %v3506_v26 }
 0x839   : > { %v4687_v20 = vmul.f32 %v3396_v38, %v3394_v9   ;;  %2425 = vmatprep.subr.bf16.mxu0 (%p138_p12), %v3508_v5  ;;  %v3583_v9 = vld [vmem:[#allocation6 + $0x1cc] ss:$16 sps:$4 sm:$0xff] (%p138_p12)   ;;  %v3578_v38 = vld [vmem:[#allocation6 + $0x1e0] ss:$16 sps:$4 sm:$0xff] (%p138_p12)  }
 0x83a   :  { %2486 = vmatprep.subr.bf16.mxu1 (%p138_p12), %v3583_v9 }
 0x83b   : > { %v4989_v39 = vmov %v4687_v20  ;;  %2487 = vmatpush1.bf16.msra.mxu1 (%p138_p12), %v3585_v30 }
 0x83c   : > { %v4992_v20 = vmov %v4989_v39  ;;  %2426 = vmatpush1.bf16.msra.mxu0 (%p138_p12), %v3512_v7  ;;  %v2031_v43 = vpack.c.bf16 (%p138_p12), %v4989_v39, %v4989_v39  ;;  %2488 = vmatprep.subr.bf16.mxu1 (%p138_p12), %v3586_v42  ;;  %v3592_v39 = vld [vmem:[#allocation7 + $0x1018] sm:$0xff] (%p138_p12)  }
 0x83d   :  { %2427 = vmatprep.subr.bf16.mxu0 %v3514_v18  ;;  %v3542_v20 = vld [vmem:[#allocation6 + $0x120] ss:$16 sps:$4 sm:$0xff]  }
 0x83f   :  { %2489 = vmatpush1.bf16.msra.mxu1 %v3588_v46 }
 0x840   :  { %2428 = vmatpush1.bf16.msra.mxu0 %v3518_v19 }
 0x841   :  { %2429 = vmatprep.subr.bf16.mxu0 %v3520_v49 }
 0x842   :  { %2491 = vmatmul.mubr.bf16.vlgmr.msra.gmra.mrb[0].mxu1 %v2031_v43 }
 0x844   :  { %2430 = vmatpush1.bf16.msra.mxu0 %v3524_v10 }
 0x845   :  { %2431 = vmatprep.subr.bf16.mxu0 %v3526_v32 }
 0x848   :  { %2432 = vmatpush1.bf16.msra.mxu0 %v3530_v55 }
 0x849   :  { %2433 = vmatprep.subr.bf16.mxu0 %v3532_v29 }
 0x84c   :  { %2434 = vmatpush1.bf16.msra.mxu0 %v3536_v12 }
 0x84d   :  { %2435 = vmatprep.subr.bf16.mxu0 %v3538_v4 }
 0x850   :  { %2436 = vmatpush1.bf16.msra.mxu0 %v3542_v20  ;;  %v2935_v20 = vld [vmem:[#allocation9] ss:$0 sm:$0xff] }
 0x851   :  { %2437 = vmatprep.subr.bf16.mxu0 %v3544_v2 }
 0x854   :  { %2438 = vmatpush1.bf16.msra.mxu0 %v3548_v60 }
 0x855   :  { %2439 = vmatprep.subr.bf16.mxu0 %v3550_v28 }
 0x858   :  { %2440 = vmatpush1.bf16.msra.mxu0 %v3554_v37 }
 0x859   :  { %2441 = vmatprep.subr.bf16.mxu0 %v3556_v36 }
 0x85c   :  { %2442 = vmatpush1.bf16.msra.mxu0 %v3560_v44 }
 0x85d   :  { %2443 = vmatprep.subr.bf16.mxu0 %v3562_v52 }
 0x860   :  { %2444 = vmatpush1.bf16.msra.mxu0 %v3566_v63 }
 0x861   :  { %2445 = vmatprep.subr.bf16.mxu0 %v3568_v59 }
 0x864   :  { %2446 = vmatpush1.bf16.msra.mxu0 %v3572_v6 }
 0x865   :  { %2447 = vmatprep.subr.bf16.mxu0 %v3574_v31 }
 0x868   :  { %2448 = vmatpush1.bf16.msra.mxu0 %v3578_v38 }
 0x869   :  { %3020 = vmatprep.subr.bf16.mxu0 %v3785_v50 }
 0x86b   :  { %2450 = vmatmul.mubr.bf16.vlgmr.msra.gmra.mrb[0].mxu0 %v2031_v43 }
 0x86c   :  { %3021 = vmatpush3.bf16.msra.mxu0 %v3589_v27  ;;  %3028 = vmatprep.mubr.msk.bf16.mxu0 %vm3786_vm2, %v3785_v50 }
 0x86d   :  { %3022 = vmatprep.subr.bf16.mxu0 %v3785_v50 }
 0x870   :  { %3023 = vmatpush3.bf16.msra.mxu0 %v3590_v51 }
 0x871   :  { %3024 = vmatprep.subr.bf16.mxu0 %v3785_v50 }
 0x874   :  { %3025 = vmatpush3.bf16.msra.mxu0 %v3591_v47 }
 0x875   :  { %3026 = vmatprep.subr.bf16.mxu0 %v3785_v50 }
 0x878   :  { %3027 = vmatpush3.bf16.msra.mxu0 %v3592_v39 }
 0x915   :  { %v2492_v23 = vpop.f32.mrb[0].mxu1 }
 0x916   :  { %v2494_v33 = vpop.f32.mrb[1].mxu1 }
 0x917   :  { %v2496_v7 = vpop.f32.mrb[2].mxu1  ;;  %v2929_v62 = vmul.f32 -1.442695, %v2494_v33 }
 0x918   :  { %v2497_v18 = vpop.f32.mrb[3].mxu1 }
 0x93e   :  { %v2451_v15 = vpop.f32.mrb[0].mxu0 }
 0x93f   :  { %v2927_v0 = vmul.f32 -1.442695, %v2451_v15  ;;  %v2453_v22 = vpop.f32.mrb[1].mxu0 }
 0x940   :  { %v2928_v26 = vmul.f32 -1.442695, %v2453_v22  ;;  %v2455_v5 = vpop.f32.mrb[2].mxu0 }
 0x941   :  { %3593 = vpow2.f32 %v2927_v0  ;;  %v2456_v11 = vpop.f32.mrb[3].mxu0 }
 0x942   :  { %3595 = vpow2.f32 %v2928_v26 }
 0x943   :  { %3597 = vpow2.f32 %v2929_v62 }
 0x944   :  { %3599 = vtanh.f32 %v2492_v23 }
 0x94b   :  { %v3594_v17 = vpop.eup %3593 }
 0x94c   :  { %v3596_v19 = vpop.eup %3595  ;;  %v2502_v49 = vadd.f32 1.0, %v3594_v17 }
 0x94d   :  { %v2508_v48 = vadd.f32 1.0, %v3596_v19  ;;  %v3598_v61 = vpop.eup %3597 }
 0x94e   :  { %3601 = vrcp.f32 %v2502_v49  ;;  %v3600_v10 = vpop.eup %3599  ;;  %v2515_v45 = vadd.f32 1.0, %v3598_v61 }
 0x94f   :  { %3603 = vrcp.f32 %v2508_v48 }
 0x950   :  { %3605 = vrcp.f32 %v2515_v45 }
 0x958   :  { %v3602_v32 = vpop.eup %3601 }
 0x959   :  { %v3604_v54 = vpop.eup %3603  ;;  %v2519_v55 = vmul.f32 %v3602_v32, %v3600_v10 }
 0x95a   :  { %v2518_v29 = vmul.f32 %v3604_v54, %v4660_v56  ;;  %v3606_v53 = vpop.eup %3605 }
 0x95c   :  { %v2520_v57 = vadd.f32 %v2519_v55, %v2518_v29 }
 0x95e   :  { %3607 = vtanh.f32 %v2520_v57 }
 0x968   :  { %v3608_v12 = vpop.eup %3607 }
 0x969   :  { %v2522_v4 = vmul.f32 %v3608_v12, %v3606_v53 }
 0x96b   :  { %v2523_v16 = vpack.c.bf16 %v2522_v4, %v2522_v4 }
 0x96d   :  { %3029 = vmatmul.mubr.msk.bf16.vlgmr.msra.gmra.mrb[4].mxu0 %vm676_vm1, %v2523_v16 }
 0xa40   :  { %v2586_v24 = vpop.f32.mrb[4].mxu0 }
 0xa41   :  { %v2592_v2 = vadd.f32 %v4988_v21, %v2586_v24  ;;  %v3030_v8 = vpop.f32.mrb[5].mxu0 }
 0xa42   :  { %v2589_v34 = vpop.f32.mrb[6].mxu0 }
 0xa43   :  { %v2600_v60 = vadd.f32 %v2935_v20, %v2592_v2  ;;  %v3031_v28 = vpop.f32.mrb[7].mxu0 }
 0xa45   :  { %2601 = vst [vmem:[%s4723_s7] sm:$0xff] %v2600_v60 }
 0xa46   :  { %2606 = vsyncpa [#allocation3], 1 }
 0xa47   :  { %2607 = vsyncpa [#allocation5], 1 }
 0xa48   :  { %2608 = vsyncpa [#allocation8], 1 }

</bundles_post_ra>
